<compile_context>
chip_gen: v5e
topology: v5e:2x2
jax: 0.10.0
libtpu: 0.0.40
codegen_flags: <defaults>
</compile_context>

<pallas_src>
import functools

import jax
import jax.numpy as jnp
import numpy as np
from jax.experimental import pallas as pl
from jax.experimental.pallas import tpu as pltpu

LN_EPS = 1e-5


# ----------------------------- helpers --------------------------------------


def _pick_block_m(m, target):
    if m <= target:
        return m
    assert m % 8 == 0, m
    bm = (min(target, m) // 8) * 8
    while m % bm != 0:
        bm -= 8
    return bm


def _layer_norm_f32(x, g, beta):
    mu = jnp.mean(x, axis=-1, keepdims=True)
    var = jnp.mean(jnp.square(x - mu), axis=-1, keepdims=True)
    return (x - mu) * jax.lax.rsqrt(var + LN_EPS) * g + beta


# ----------------------------- Pallas kernels --------------------------------


def _ln_qkv_kernel(x_ref, g_ref, beta_ref, w_ref, b_ref, o_ref):
    """ln_1(x) @ w_qkv + b_qkv  (bf16 MXU operands, f32 accumulation)."""
    x = x_ref[...]                                         # (tm, D) f32
    xn = _layer_norm_f32(x, g_ref[...], beta_ref[...])
    y = jnp.dot(xn.astype(jnp.bfloat16), w_ref[...],
                preferred_element_type=jnp.float32)
    y = y + b_ref[...]
    o_ref[...] = y.astype(o_ref.dtype)                     # bf16 to HBM


def _attention_kernel(*refs, num_heads, has_mask):
    """Multi-head attention for one batch element, all heads in-kernel."""
    if has_mask:
        qkv_ref, mask_ref, o_ref = refs
    else:
        qkv_ref, o_ref = refs
        mask_ref = None

    qkv = qkv_ref[...]                                     # (L, 3D) bf16
    D = qkv.shape[-1] // 3
    dh = D // num_heads

    outs = []
    for h in range(num_heads):
        qh = qkv[:, h * dh:(h + 1) * dh]                   # (L, dh) bf16
        kh = qkv[:, D + h * dh:D + (h + 1) * dh]
        vh = qkv[:, 2 * D + h * dh:2 * D + (h + 1) * dh]
        # q @ k^T: contract the shared dh axis (trans_b form), no explicit
        # in-kernel transpose of K.  Scale already folded into w_qkv.
        s = jax.lax.dot_general(qh, kh, (((1,), (1,)), ((), ())),
                                preferred_element_type=jnp.float32)
        if has_mask:
            s = s + mask_ref[...]
        s = s - jnp.max(s, axis=-1, keepdims=True)
        p = jnp.exp(s)
        p = p * pl.reciprocal(jnp.sum(p, axis=-1, keepdims=True), approx=True)
        outs.append(jnp.dot(p.astype(vh.dtype), vh,
                            preferred_element_type=jnp.float32))
    o_ref[...] = jnp.concatenate(outs, axis=-1).astype(o_ref.dtype)


def _attn_out_mlp_kernel(attn_ref, xres_ref, w_out_ref, b_out_ref,
                         g2_ref, beta2_ref, w_fc_ref, b_fc_ref,
                         w_proj_ref, b_proj_ref, o_ref):
    """Fused: out_proj + residual -> ln_2 + c_fc + QuickGELU -> c_proj + residual."""
    # attention out_proj + residual add
    x2 = jnp.dot(attn_ref[...], w_out_ref[...],
                 preferred_element_type=jnp.float32)
    x2 = x2 + b_out_ref[...] + xres_ref[...]               # (tm, D) f32

    # ln_2
    hn = _layer_norm_f32(x2, g2_ref[...], beta2_ref[...])

    # c_fc + QuickGELU (sigmoid via approx reciprocal -> EUP)
    h = jnp.dot(hn.astype(jnp.bfloat16), w_fc_ref[...],
                preferred_element_type=jnp.float32)
    h = h + b_fc_ref[...]
    h = h * pl.reciprocal(1.0 + jnp.exp(-1.702 * h), approx=True)

    # c_proj + residual add
    x3 = jnp.dot(h.astype(jnp.bfloat16), w_proj_ref[...],
                 preferred_element_type=jnp.float32)
    o_ref[...] = (x3 + b_proj_ref[...] + x2).astype(o_ref.dtype)


# ----------------------------- pallas_call wrappers ---------------------------


def ln_qkv_proj(x2d, g, beta, w, b, *, block_m=512):
    M, D = x2d.shape
    C = w.shape[1]
    tm = _pick_block_m(M, block_m)
    row = lambda i: (i, 0)
    full = lambda i: (0, 0)
    return pl.pallas_call(
        _ln_qkv_kernel,
        out_shape=jax.ShapeDtypeStruct((M, C), jnp.bfloat16),
        grid=(M // tm,),
        in_specs=[pl.BlockSpec((tm, D), row),
                  pl.BlockSpec((1, D), full),
                  pl.BlockSpec((1, D), full),
                  pl.BlockSpec((D, C), full),
                  pl.BlockSpec((1, C), full)],
        out_specs=pl.BlockSpec((tm, C), row),
        compiler_params=pltpu.CompilerParams(
            dimension_semantics=("parallel",)),
    )(x2d, g, beta, w, b)


def multihead_attention(qkv, mask, *, seq_len, num_heads):
    """qkv: (N*L, 3D) bf16, batch-major rows; mask: (L, L) f32 or None."""
    M, C3 = qkv.shape
    D = C3 // 3
    N = M // seq_len
    has_mask = mask is not None

    kern = functools.partial(_attention_kernel, num_heads=num_heads,
                             has_mask=has_mask)
    in_specs = [pl.BlockSpec((seq_len, C3), lambda n: (n, 0))]
    args = [qkv]
    if has_mask:
        in_specs.append(pl.BlockSpec((seq_len, seq_len), lambda n: (0, 0)))
        args.append(mask)

    return pl.pallas_call(
        kern,
        out_shape=jax.ShapeDtypeStruct((M, D), jnp.bfloat16),
        grid=(N,),
        in_specs=in_specs,
        out_specs=pl.BlockSpec((seq_len, D), lambda n: (n, 0)),
        compiler_params=pltpu.CompilerParams(
            dimension_semantics=("parallel",)),
    )(*args)


def attn_out_mlp(attn, x_res, p, *, block_m=512):
    M, D = x_res.shape
    D4 = p["w_fc"].shape[1]
    tm = _pick_block_m(M, block_m)
    row = lambda i: (i, 0)
    full = lambda i: (0, 0)
    return pl.pallas_call(
        _attn_out_mlp_kernel,
        out_shape=jax.ShapeDtypeStruct((M, D), jnp.float32),
        grid=(M // tm,),
        in_specs=[pl.BlockSpec((tm, D), row),        # attention output (bf16)
                  pl.BlockSpec((tm, D), row),        # residual stream (f32)
                  pl.BlockSpec((D, D), full),        # w_out
                  pl.BlockSpec((1, D), full),        # b_out
                  pl.BlockSpec((1, D), full),        # ln2_g
                  pl.BlockSpec((1, D), full),        # ln2_b
                  pl.BlockSpec((D, D4), full),       # w_fc
                  pl.BlockSpec((1, D4), full),       # b_fc
                  pl.BlockSpec((D4, D), full),       # w_proj
                  pl.BlockSpec((1, D), full)],       # b_proj
        out_specs=pl.BlockSpec((tm, D), row),
        compiler_params=pltpu.CompilerParams(
            dimension_semantics=("parallel",)),
    )(attn, x_res, p["w_out"], p["b_out"], p["ln2_g"], p["ln2_b"],
      p["w_fc"], p["b_fc"], p["w_proj"], p["b_proj"])


# ------------------------------ glue / wrapper --------------------------------


def residual_attention_block(x2d, p, mask, *, seq_len, num_heads):
    """x2d: (N*L, D) f32 residual stream in batch-major row order."""
    qkv = ln_qkv_proj(x2d, p["ln1_g"], p["ln1_b"], p["w_qkv"], p["b_qkv"])
    attn = multihead_attention(qkv, mask, seq_len=seq_len, num_heads=num_heads)
    return attn_out_mlp(attn, x2d, p)


def transformer_forward(x, kernel_params, mask, heads):
    """x: (L, N, D) like the PyTorch module. Returns ({'layer{i}': x[0]}, x)."""
    L, N, D = x.shape
    # TODO(synk): the (L,N,D)<->(N,L,D) layout change and per-layer x[0] slice
    #             run as plain XLA ops in the wrapper (once per forward), not
    #             inside Pallas kernels.
    xi = x.transpose(1, 0, 2).reshape(N * L, D)
    out = {}
    for idx, p in enumerate(kernel_params):
        xi = residual_attention_block(xi, p, mask, seq_len=L, num_heads=heads)
        out["layer" + str(idx)] = xi.reshape(N, L, D)[:, 0, :]
    x_final = xi.reshape(N, L, D).transpose(1, 0, 2)
    return out, x_final


# ------------------------- parameters & reference -----------------------------


def init_params(key, width, layers):
    """Reference params, f32, weights in (in, out) layout."""
    def lin_w(k, fan_in, fan_out):
        return (jax.random.normal(k, (fan_in, fan_out), jnp.float32)
                / np.sqrt(fan_in))

    params = []
    for lk in jax.random.split(key, layers):
        ks = jax.random.split(lk, 12)
        p = {
            "ln1_g": 1.0 + 0.1 * jax.random.normal(ks[0], (width,), jnp.float32),
            "ln1_b": 0.1 * jax.random.normal(ks[1], (width,), jnp.float32),
            "w_qkv": lin_w(ks[2], width, 3 * width),
            "b_qkv": 0.02 * jax.random.normal(ks[3], (3 * width,), jnp.float32),
            "w_out": lin_w(ks[4], width, width),
            "b_out": 0.02 * jax.random.normal(ks[5], (width,), jnp.float32),
            "ln2_g": 1.0 + 0.1 * jax.random.normal(ks[6], (width,), jnp.float32),
            "ln2_b": 0.1 * jax.random.normal(ks[7], (width,), jnp.float32),
            "w_fc": lin_w(ks[8], width, 4 * width),
            "b_fc": 0.02 * jax.random.normal(ks[9], (4 * width,), jnp.float32),
            "w_proj": lin_w(ks[10], 4 * width, width),
            "b_proj": 0.02 * jax.random.normal(ks[11], (width,), jnp.float32),
        }
        params.append(p)
    return params


def prepare_kernel_params(params, heads, width):
    """One-time conversion: bf16 weights, 1/sqrt(dh) folded into Q, (1,C) biases."""
    dh = width // heads
    scale = 1.0 / np.sqrt(dh)
    kparams = []
    for p in params:
        w_qkv = p["w_qkv"].at[:, :width].multiply(scale)
        b_qkv = p["b_qkv"].at[:width].multiply(scale)
        kp = {
            "ln1_g": p["ln1_g"].reshape(1, -1),
            "ln1_b": p["ln1_b"].reshape(1, -1),
            "w_qkv": w_qkv.astype(jnp.bfloat16),
            "b_qkv": b_qkv.reshape(1, -1),
            "w_out": p["w_out"].astype(jnp.bfloat16),
            "b_out": p["b_out"].reshape(1, -1),
            "ln2_g": p["ln2_g"].reshape(1, -1),
            "ln2_b": p["ln2_b"].reshape(1, -1),
            "w_fc": p["w_fc"].astype(jnp.bfloat16),
            "b_fc": p["b_fc"].reshape(1, -1),
            "w_proj": p["w_proj"].astype(jnp.bfloat16),
            "b_proj": p["b_proj"].reshape(1, -1),
        }
        kparams.append(kp)
    return kparams


def build_causal_mask(L):
    return jnp.triu(jnp.full((L, L), float("-inf"), jnp.float32), k=1)


def _quick_gelu_ref(y):
    return y * (1.0 / (1.0 + jnp.exp(-1.702 * y)))


def _layer_norm_ref(x, g, b):
    x = x.astype(jnp.float32)
    mu = jnp.mean(x, axis=-1, keepdims=True)
    var = jnp.mean(jnp.square(x - mu), axis=-1, keepdims=True)
    return (x - mu) * jax.lax.rsqrt(var + LN_EPS) * g + b


def reference_block(x, p, mask, heads):
    L, N, D = x.shape
    H = heads
    dh = D // H
    h = _layer_norm_ref(x, p["ln1_g"], p["ln1_b"])
    qkv = h @ p["w_qkv"] + p["b_qkv"]
    q, k, v = jnp.split(qkv, 3, axis=-1)

    def split(t):
        return t.reshape(L, N, H, dh).transpose(1, 2, 0, 3)   # (N, H, L, dh)

    q, k, v = split(q), split(k), split(v)
    s = jnp.einsum("nhld,nhmd->nhlm", q, k) / np.sqrt(dh)
    if mask is not None:
        s = s + mask
    a = jax.nn.softmax(s, axis=-1)
    o = jnp.einsum("nhlm,nhmd->nhld", a, v)
    o = o.transpose(2, 0, 1, 3).reshape(L, N, D)
    x = x + o @ p["w_out"] + p["b_out"]

    h = _layer_norm_ref(x, p["ln2_g"], p["ln2_b"])
    h = h @ p["w_fc"] + p["b_fc"]
    h = _quick_gelu_ref(h)
    x = x + h @ p["w_proj"] + p["b_proj"]
    return x


def reference_forward(x, layer_params, mask, heads):
    out = {}
    for idx, p in enumerate(layer_params):
        x = reference_block(x, p, mask, heads)
        out["layer" + str(idx)] = x[0]
    return out, x


# ----------------------------------- main -------------------------------------

if __name__ == "__main__":
    L, N, width, heads, layers = 64, 16, 128, 4, 2   # M = N*L = 1024 rows

    key = jax.random.PRNGKey(0)
    kx, kp = jax.random.split(key)
    x = jax.random.normal(kx, (L, N, width), jnp.float32)
    params = init_params(kp, width, layers)
    kernel_params = prepare_kernel_params(params, heads, width)
    mask = build_causal_mask(L)

    out_dict, x_out = transformer_forward(x, kernel_params, mask, heads)
    x_out = jax.block_until_ready(x_out)

    ref_dict, x_ref = reference_forward(x, params, mask, heads)
    x_ref = jax.block_until_ready(x_ref)

    assert x_out.shape == (L, N, width), x_out.shape
    # bf16 MXU operands / bf16 intermediate activations => loosened tolerance.
    np.testing.assert_allclose(np.asarray(x_out), np.asarray(x_ref),
                               rtol=5e-2, atol=5e-2)
    for name in ref_dict:
        np.testing.assert_allclose(np.asarray(out_dict[name]),
                                   np.asarray(ref_dict[name]),
                                   rtol=5e-2, atol=5e-2)
    print("KERNEL_OK")
</pallas_src>

<mosaic_0001>
module attributes {stable_mosaic.version = 11 : i64} {
  func.func @_ln_qkv_kernel(%arg0: i32, %arg1: memref<512x128xf32, #tpu.memory_space<vmem>>, %arg2: memref<1x128xf32, #tpu.memory_space<vmem>>, %arg3: memref<1x128xf32, #tpu.memory_space<vmem>>, %arg4: memref<128x384xbf16, #tpu.memory_space<vmem>>, %arg5: memref<1x384xf32, #tpu.memory_space<vmem>>, %arg6: memref<512x384xbf16, #tpu.memory_space<vmem>>) attributes {dimension_semantics = [#tpu.dimension_semantics<parallel>], iteration_bounds = array<i64: 2>, scalar_prefetch = 0 : i64, scratch_operands = 0 : i64, tpu.core_type = #tpu.core_type<tc>, window_params = [{transform_indices = @transform_0, window_bounds = array<i64: 512, 128>}, {pipeline_mode = #tpu.pipeline_mode<synchronous>, transform_indices = @transform_1, window_bounds = array<i64: 1, 128>}, {pipeline_mode = #tpu.pipeline_mode<synchronous>, transform_indices = @transform_2, window_bounds = array<i64: 1, 128>}, {pipeline_mode = #tpu.pipeline_mode<synchronous>, transform_indices = @transform_3, window_bounds = array<i64: 128, 384>}, {pipeline_mode = #tpu.pipeline_mode<synchronous>, transform_indices = @transform_4, window_bounds = array<i64: 1, 384>}, {transform_indices = @transform_5, window_bounds = array<i64: 512, 384>}]} {
    %c0 = arith.constant 0 : index
    %c0_0 = arith.constant 0 : index
    %0 = vector.load %arg1[%c0, %c0_0] : memref<512x128xf32, #tpu.memory_space<vmem>>, vector<512x128xf32>
    %c0_1 = arith.constant 0 : index
    %c0_2 = arith.constant 0 : index
    %1 = vector.load %arg2[%c0_1, %c0_2] : memref<1x128xf32, #tpu.memory_space<vmem>>, vector<1x128xf32>
    %c0_3 = arith.constant 0 : index
    %c0_4 = arith.constant 0 : index
    %2 = vector.load %arg3[%c0_3, %c0_4] : memref<1x128xf32, #tpu.memory_space<vmem>>, vector<1x128xf32>
    %cst = arith.constant dense<0.000000e+00> : vector<512xf32>
    %3 = vector.multi_reduction <add>, %0, %cst [1] : vector<512x128xf32> to vector<512xf32>
    %4 = vector.shape_cast %3 : vector<512xf32> to vector<512x1xf32>
    %cst_5 = arith.constant 1.280000e+02 : f32
    %5 = vector.broadcast %cst_5 : f32 to vector<512x1xf32>
    %6 = arith.divf %4, %5 : vector<512x1xf32>
    %7 = vector.broadcast %6 : vector<512x1xf32> to vector<512x128xf32>
    %8 = arith.subf %0, %7 : vector<512x128xf32>
    %9 = arith.mulf %8, %8 : vector<512x128xf32>
    %cst_6 = arith.constant dense<0.000000e+00> : vector<512xf32>
    %10 = vector.multi_reduction <add>, %9, %cst_6 [1] : vector<512x128xf32> to vector<512xf32>
    %11 = vector.shape_cast %10 : vector<512xf32> to vector<512x1xf32>
    %cst_7 = arith.constant 1.280000e+02 : f32
    %12 = vector.broadcast %cst_7 : f32 to vector<512x1xf32>
    %13 = arith.divf %11, %12 : vector<512x1xf32>
    %14 = vector.broadcast %6 : vector<512x1xf32> to vector<512x128xf32>
    %15 = arith.subf %0, %14 : vector<512x128xf32>
    %cst_8 = arith.constant 9.99999974E-6 : f32
    %16 = vector.broadcast %cst_8 : f32 to vector<512x1xf32>
    %17 = arith.addf %13, %16 : vector<512x1xf32>
    %18 = math.rsqrt %17 : vector<512x1xf32>
    %19 = vector.broadcast %18 : vector<512x1xf32> to vector<512x128xf32>
    %20 = arith.mulf %15, %19 : vector<512x128xf32>
    %21 = vector.broadcast %1 : vector<1x128xf32> to vector<512x128xf32>
    %22 = arith.mulf %20, %21 : vector<512x128xf32>
    %23 = vector.broadcast %2 : vector<1x128xf32> to vector<512x128xf32>
    %24 = arith.addf %22, %23 : vector<512x128xf32>
    %25 = arith.truncf %24 : vector<512x128xf32> to vector<512x128xbf16>
    %c0_9 = arith.constant 0 : index
    %c0_10 = arith.constant 0 : index
    %26 = vector.load %arg4[%c0_9, %c0_10] : memref<128x384xbf16, #tpu.memory_space<vmem>>, vector<128x384xbf16>
    %cst_11 = arith.constant dense<0.000000e+00> : vector<512x384xf32>
    %27 = tpu.matmul %25, %26, %cst_11 {dimension_numbers = #tpu.dot_dimension_numbers<[1], [0], [0], [1], [0, 0, 1, 1], [], []>} : vector<512x128xbf16>, vector<128x384xbf16>, vector<512x384xf32> -> vector<512x384xf32>
    %c0_12 = arith.constant 0 : index
    %c0_13 = arith.constant 0 : index
    %28 = vector.load %arg5[%c0_12, %c0_13] : memref<1x384xf32, #tpu.memory_space<vmem>>, vector<1x384xf32>
    %29 = vector.broadcast %28 : vector<1x384xf32> to vector<512x384xf32>
    %30 = arith.addf %27, %29 : vector<512x384xf32>
    %31 = arith.truncf %30 : vector<512x384xf32> to vector<512x384xbf16>
    %c0_14 = arith.constant 0 : index
    %c0_15 = arith.constant 0 : index
    %32 = vector.load %arg6[%c0_14, %c0_15] : memref<512x384xbf16, #tpu.memory_space<vmem>>, vector<512x384xbf16>
    tpu.vector_store %arg6[%c0_14, %c0_15], %31 {strides = array<i32>} : memref<512x384xbf16, #tpu.memory_space<vmem>>, vector<512x384xbf16>,
    return
  }
  func.func @transform_0(%arg0: i32) -> (i32, i32) {
    %c0_i32 = arith.constant 0 : i32
    %c0_i32_0 = arith.constant 0 : i32
    return %arg0, %c0_i32 : i32, i32
  }
  func.func @transform_1(%arg0: i32) -> (i32, i32) {
    %c0_i32 = arith.constant 0 : i32
    %c0_i32_0 = arith.constant 0 : i32
    %c0_i32_1 = arith.constant 0 : i32
    return %c0_i32, %c0_i32_0 : i32, i32
  }
  func.func @transform_2(%arg0: i32) -> (i32, i32) {
    %c0_i32 = arith.constant 0 : i32
    %c0_i32_0 = arith.constant 0 : i32
    %c0_i32_1 = arith.constant 0 : i32
    return %c0_i32, %c0_i32_0 : i32, i32
  }
  func.func @transform_3(%arg0: i32) -> (i32, i32) {
    %c0_i32 = arith.constant 0 : i32
    %c0_i32_0 = arith.constant 0 : i32
    %c0_i32_1 = arith.constant 0 : i32
    return %c0_i32, %c0_i32_0 : i32, i32
  }
  func.func @transform_4(%arg0: i32) -> (i32, i32) {
    %c0_i32 = arith.constant 0 : i32
    %c0_i32_0 = arith.constant 0 : i32
    %c0_i32_1 = arith.constant 0 : i32
    return %c0_i32, %c0_i32_0 : i32, i32
  }
  func.func @transform_5(%arg0: i32) -> (i32, i32) {
    %c0_i32 = arith.constant 0 : i32
    %c0_i32_0 = arith.constant 0 : i32
    return %arg0, %c0_i32 : i32, i32
  }
}

</mosaic_0001>

<bundles_post_ra>
// kernel: tpu_custom_call.1
= control target key start
LH: loop header
LB: loop body
LE: loop exit
PB: predicated region body
PF: predicated region fallthrough
CT: control target
= control target key end

     0   :  { %10 = vsyncpa [#allocation3], 0  ;;  %s5661_s0 = inlined_call_operand.hbm [shape: f32[1024,128], index: 0, kind: input, shape index: {}]   ;;  %s5662_s1 = inlined_call_operand.hbm [shape: f32[1,128], index: 1, kind: input, shape index: {}]   ;;  %s5663_s2 = inlined_call_operand.hbm [shape: f32[1,128], index: 2, kind: input, shape index: {}]   ;;  %s5664_s3 = inlined_call_operand.hbm [shape: bf16[128,384], index: 3, kind: input, shape index: {}]   ;;  %s5665_s4 = inlined_call_operand.vmem [shape: f32[1,384], index: 4, kind: input, shape index: {}]   ;;  %s5666_s5 = inlined_call_operand.hbm [shape: bf16[1024,384], index: 5, kind: output, shape index: {}]  }
   0x1   :  { %12 = vsyncpa [#allocation3 + $0x1], 0 }
   0x2   :  { %13 = vsyncpa [#allocation6], 0 }
   0x3   :  { %14 = vsyncpa [#allocation9], 0 }
   0x4   :  { %15 = vsyncpa [#allocation4], 0 }
   0x5   :  { %17 = vsyncpa [#allocation4 + $0x1], 0  ;;  %s3486_s18 = smov 0   ;;  %s3488_s19 = smov 0  }
   0x6   :  { %s3490_s20 = smov 0   ;;  %s3492_s21 = smov 0  }
   0x7 LB: > { %s3507_s22 = sadd.s32 4294967295, %s3444_s21   ;;  %s2862_s23 = sadd.s32 4294967294, %s3444_s21   ;;  %s3444_s21 = sphi %s3492_s21, %s5762_s21   ;;  %s3440_s20 = sphi %s3490_s20, %s5761_s20   ;;  %s3436_s19 = sphi %s3488_s19, %s5760_s19   ;;  %s3432_s18 = sphi %s3486_s18, %s5759_s18  }
   0x8   : > { %p43_p0 = scmp.ne.s32.totalorder %s3436_s19, %s3432_s18  ;;  %p44_p1 = scmp.eq.s32.totalorder %s3507_s22, 0 }
   0x9   : > { %p151_p2 = scmp.eq.s32.totalorder %s3507_s22, 1  ;;  %p157_p3 = scmp.eq.s32.totalorder %s2862_s23, 1 }
   0xa   : > { %p3516_p4 = por %p44_p1, %p43_p0  ;;  %p2863_p5 = scmp.ge.s32.totalorder %s3444_s21, 1 }
   0xb   : > { %p3521_p6 = por %p157_p3, %p43_p0  ;;  %p164_p7 = scmp.lt.s32.totalorder %s3444_s21, 3 }
   0xc   : > { %s176_s28 = sshll.u32 %s5662_s1, 4  ;;  %s3446_s30 = smov [#allocation5]   ;;  %s177_s28 = int_to_ptr.hbm [resolvable:$true] %s176_s28 }
   0xd   : > { %p3529_p8 = pnand %p2863_p5, %p164_p7  ;;  %s178_s6 = sshll.u32 %s3446_s30, 4  ;;  %s179_s6 = int_to_ptr.vmem [resolvable:$true] %s178_s6 }
   0xe   : > { %s188_s9 = sshll.u32 %s5663_s2, 4  ;;  %s199_s13 = sshll.u32 %s5664_s3, 4  ;;  %s189_s9 = int_to_ptr.hbm [resolvable:$true] %s188_s9  ;;  %s200_s13 = int_to_ptr.hbm [resolvable:$true] %s199_s13 }
   0xf   : > { %p3044_p10 = pneg %p3529_p8  ;;  %s3447_s14 = smov [#allocation7]  }
  0x10   : > { %s190_s15 = sshll.u32 %s3447_s14, 4  ;;  %s3448_s16 = smov [#allocation8]   ;;  %s191_s15 = int_to_ptr.vmem [resolvable:$true] %s190_s15 }
  0x11   : > { %p3541_p11 = pnand %p3044_p10, %p44_p1  ;;  %s201_s17 = sshll.u32 %s3448_s16, 4  ;;  %s202_s17 = int_to_ptr.vmem [resolvable:$true] %s201_s17 }
  0x12   : > { %s3449_s23 = smov 192   ;;  %s3450_s26 = smov 12  }
  0x13   : > { %3047 = dma.hbm_to_vmem [thread:$0]  (!%p3541_p11), %s177_s28, 16, %s179_s6, [#allocation6]  }
  0x14   : > { %3050 = dma.hbm_to_vmem [thread:$0]  (!%p3541_p11), %s189_s9, 16, %s191_s15, [#allocation6]  }
  0x15   : > { %3053 = dma.hbm_to_vmem [thread:$0]  (!%p3541_p11), %s200_s13, 3072, %s202_s17, [#allocation9], %s3449_s23, %s3449_s23, %s3450_s26  }
  0x16   : > { %s3555_s27 = sadd.s32 1, %s3444_s21   ;;  %s30_s30 = sadd.s32 1, %s3440_s20 }
  0x17   : > { %s27_s28 = ssub.s32 %s3444_s21, %s3555_s27  ;;  %p37_p13 = scmp.ne.s32.totalorder %s3440_s20, %s3436_s19 }
  0x18   : > { %p28_p12 = scmp.eq.s32.totalorder %s27_s28, 0  ;;  %p38_p0 = scmp.eq.s32.totalorder %s3444_s21, 0 }
  0x19   : > { %p3065_p3 = scmp.lt.s32.totalorder %s3444_s21, 2  ;;  %p3569_p7 = por %p151_p2, %p37_p13 }
  0x1a   : > { %s3565_s6 = scalar_select %p28_p12, %s3440_s20, %s30_s30  }
  0x1b   : > { %p39_p5 = por %p38_p0, %p37_p13  ;;  %s218_s8 = sand.u32 1, %s3440_s20  }
  0x1c   : > { %s2977_s9 = sshll.u32 %s3444_s21, 9  ;;  %s2868_s10 = sshll.u32 %s218_s8, 9 }
  0x1d   : > { %s227_s13 = scalar_lea.hbm %s5661_s0, %s2977_s9  ;;  %s222_s15 = scalar_lea.vmem [#allocation2], %s2868_s10 }
  0x1e   : > { %s228_s14 = sshll.u32 %s227_s13, 4  ;;  %s230_s16 = sshll.u32 %s222_s15, 4  ;;  %s229_s14 = int_to_ptr.hbm [resolvable:$true] %s228_s14  ;;  %s231_s16 = int_to_ptr.vmem [resolvable:$true] %s230_s16 }
  0x1f   : > { %p3580_p10 = pnand %p3065_p3, %p39_p5  ;;  %s219_s23 = scalar_lea.sflag [#allocation3], %s218_s8 }
  0x20   : > { %s3340_s26 = sshra.s32 %s229_s14, 4  ;;  %s3347_s10 = scalar_lea.hbm %s5661_s0, 1024  ;;  %s3341_s26 = int_to_ptr.hbm [resolvable:$true] %s3340_s26 }
  0x21   : > { %s3342_s28 = scalar_lea.hbm %s3341_s26, 512  ;;  %p3344_p11 = pneg %p3580_p10 }
  0x22   : > { %p3343_p2 = scmp.ne.s32.totalorder %s3341_s26, %s3342_s28  ;;  %p3348_p0 = scmp.lt.s32.totalorder %s3341_s26, %s5661_s0 }
  0x23   : > { %p3349_p3 = scmp.lt.s32.totalorder %s3347_s10, %s3342_s28 }
  0x24   : > { %p3345_p12 = pnand %p3344_p11, %p3343_p2 }
  0x25   : > { %p3350_p5 = por %p3349_p3, %p3348_p0 }
  0x26   : > { %p3346_p13 = pneg %p3345_p12 }
  0x28   : > { %p3351_p9 = pnand %p3350_p5, %p3346_p13 }
  0x2a   : > { %3354 = shalt.err (!%p3351_p9)
}
  0x2b   : > { %s3451_s8 = smov 128   ;;  %s3452_s13 = smov 8  }
  0x2c   : > { %3057 = dma.hbm_to_vmem [thread:$0]  (!%p3580_p10), %s229_s14, 8192, %s231_s16, %s219_s23, %s3451_s8, %s3451_s8, %s3452_s13  }
  0x2d   : > { %242 = sbr.rel (%p3529_p8) target bundleno = 1290 (0x50a), region = 40 }
  0x32   : > { %s3597_s15 = sand.u32 1, %s3436_s19  }
  0x33   : > { %s2872_s30 = sshll.u32 %s3597_s15, 9  ;;  %s245_s26 = scalar_lea.sflag [#allocation3], %s3597_s15 }
  0x34   : > { %s3601_s28 = scalar_lea.vmem [#allocation2], %s2872_s30 }
  0x35   : > { %3415 = dma.done.wait (%p3516_p4), %s245_s26, 8192  }
  0x36   : > { %3417 = vsyncadd (%p3516_p4), %s245_s26, 4294959104 }
  0x37   : > { %3419 = dma.done.wait (%p44_p1), [#allocation6], 32  }
  0x38   : > { %3421 = vsyncadd (%p44_p1), [#allocation6], 4294967264 }
  0x39   : > { %3423 = dma.done.wait (%p44_p1), [#allocation9], 3072  }
  0x3a   : > { %3425 = vsyncadd (%p44_p1), [#allocation9], 4294964224  ;;  %v341_v0 = vld [vmem:[%s3601_s28 + $0x180] sm:$0xff]  ;;  %v295_v2 = vld [vmem:[%s3601_s28 + $0x10] sm:$0xff]  ;;  %v3453_v21 = vmov 128.0   ;;  %s3026_s14 = smul.u32 768, %s3597_s15 }
  0x3b   : > { %v293_v1 = vld [vmem:[%s3601_s28] sm:$0xff]  ;;  %455 = vadd.xlane.f32.xlu1 %v341_v0  ;;  %363 = vadd.xlane.f32.xlu2 %v295_v2  ;;  %v342_v3 = vld [vmem:[%s3601_s28 + $0x188] sm:$0xff]  ;;  %v3621_v5 = vld [vmem:[%s3601_s28 + $0x18] sm:$0xff]  ;;  %3114 = vrcp.f32 %v3453_v21  ;;  %s3027_s17 = smul.u32 768, %s3507_s22  ;;  %s2744_s22 = scalar_lea.sflag [#allocation4], %s3597_s15 }
  0x3c   : > { %359 = vadd.xlane.f32.xlu0 %v293_v1  ;;  %v294_v4 = vld [vmem:[%s3601_s28 + $0x8] sm:$0xff]  ;;  %v3625_v6 = vld [vmem:[%s3601_s28 + $0x198] sm:$0xff]  ;;  %v3628_v7 = vld [vmem:[%s3601_s28 + $0x190] sm:$0xff]  ;;  %s4553_s16 = scalar_lea.vmem [#allocation10], %s3026_s14 }
  0x3d   : > { %v3631_v8 = vld [vmem:[%s3601_s28 + $0x20] sm:$0xff]  ;;  %v3637_v9 = vld [vmem:[%s3601_s28 + $0x28] sm:$0xff]  ;;  %v3649_v12 = vld [vmem:[%s3601_s28 + $0x30] sm:$0xff]  ;;  %s2756_s10 = scalar_lea.hbm %s5666_s5, %s3027_s17  ;;  %s2757_s11 = sshll.u32 %s4553_s16, 4  ;;  %s2758_s11 = int_to_ptr.vmem [resolvable:$true] %s2757_s11 }
  0x3e   : > { %v3640_v10 = vld [vmem:[%s3601_s28 + $0x1a0] sm:$0xff]  ;;  %v3643_v11 = vld [vmem:[%s3601_s28 + $0x1a8] sm:$0xff]  ;;  %v3652_v13 = vld [vmem:[%s3601_s28 + $0x1b0] sm:$0xff]  ;;  %s2759_s12 = sshll.u32 %s2756_s10, 4  ;;  %s2760_s12 = int_to_ptr.hbm [resolvable:$true] %s2759_s12 }
  0x3f   : > { %v3655_v14 = vld [vmem:[%s3601_s28 + $0x38] sm:$0xff]  ;;  %v3664_v16 = vld [vmem:[%s3601_s28 + $0x40] sm:$0xff]  ;;  %v3673_v18 = vld [vmem:[%s3601_s28 + $0x1c8] sm:$0xff]  ;;  %s3384_s8 = sshra.s32 %s2760_s12, 4  ;;  %s3385_s8 = int_to_ptr.hbm [resolvable:$true] %s3384_s8 }
  0x40   : > { %v3661_v15 = vld [vmem:[%s3601_s28 + $0x1b8] sm:$0xff]  ;;  %v3667_v17 = vld [vmem:[%s3601_s28 + $0x1c0] sm:$0xff]  ;;  %v3676_v19 = vld [vmem:[%s3601_s28 + $0x48] sm:$0xff]  ;;  %s3386_s13 = scalar_lea.hbm %s3385_s8, 768  ;;  %p3391_p9 = scmp.lt.s32.totalorder %s3385_s8, %s5666_s5 }
  0x41   : > { %v3679_v20 = vld [vmem:[%s3601_s28 + $0x50] sm:$0xff]  ;;  %v3115_v22 = vpop.eup %3114  ;;  %v3717_v54 = vld [vmem:[%s3601_s28 + $0x58] sm:$0xff]  ;;  %p3387_p1 = scmp.ne.s32.totalorder %s3385_s8, %s3386_s13 }
  0x42   : > { %v488_v23 = vmul.f32 128.0, %v3115_v22  ;;  %vm492_vm0 = vweird.f32 %v3115_v22  ;;  %v3723_v57 = vld [vmem:[%s3601_s28 + $0x1d0] sm:$0xff]  ;;  %v3737_v63 = vld [vmem:[%s3601_s28 + $0x1d8] sm:$0xff] }
  0x43   : > { %457 = vadd.xlane.f32.xlu1 %v342_v3  ;;  %365 = vadd.xlane.f32.xlu2 %v3621_v5  ;;  %p3388_p4 = pnand %p3387_p1, %p3569_p7 }
  0x44   : > { %361 = vadd.xlane.f32.xlu0 %v294_v4  ;;  %v489_v24 = vsub.f32 1.0, %v488_v23 }
  0x45   : > { %p3389_p8 = pneg %p3388_p4 }
  0x46   : > { %v490_v25 = vmul.f32 %v3115_v22, %v489_v24 }
  0x48   : > { %v491_v26 = vadd.f32 %v3115_v22, %v490_v25 }
  0x4a   : > { %v3684_v27 = vsel %vm492_vm0, %v3115_v22, %v491_v26  ;;  %v3753_v22 = vld [vmem:[%s3601_s28 + $0x60] sm:$0xff] }
  0x4b   : > { %461 = vadd.xlane.f32.xlu1 %v3625_v6  ;;  %367 = vadd.xlane.f32.xlu2 %v3631_v8 }
  0x4c   : > { %459 = vadd.xlane.f32.xlu0 %v3628_v7 }
  0x53   : > { %463 = vadd.xlane.f32.xlu1 %v3640_v10  ;;  %465 = vadd.xlane.f32.xlu2 %v3643_v11 }
  0x54   : > { %369 = vadd.xlane.f32.xlu0 %v3637_v9 }
  0x5b   : > { %371 = vadd.xlane.f32.xlu1 %v3649_v12  ;;  %373 = vadd.xlane.f32.xlu2 %v3655_v14 }
  0x5c   : > { %467 = vadd.xlane.f32.xlu0 %v3652_v13 }
  0x63   : > { %469 = vadd.xlane.f32.xlu1 %v3661_v15  ;;  %471 = vadd.xlane.f32.xlu2 %v3667_v17 }
  0x64   : > { %375 = vadd.xlane.f32.xlu0 %v3664_v16 }
  0x6b   : > { %377 = vadd.xlane.f32.xlu1 %v3676_v19  ;;  %379 = vadd.xlane.f32.xlu2 %v3679_v20 }
  0x6c   : > { %473 = vadd.xlane.f32.xlu0 %v3673_v18 }
  0xae   : > { %v456_v28 = vpop.xlane.xlu1 %455  ;;  %v364_v32 = vpop.xlane.xlu2 %363 }
  0xaf   : > { %v360_v29 = vpop.xlane.xlu0 %359  ;;  %v542_v30 = vmul.f32 %v3684_v27, %v456_v28  ;;  %v496_v35 = vmul.f32 %v3684_v27, %v364_v32 }
  0xb0   : > { %v494_v31 = vmul.f32 %v3684_v27, %v360_v29 }
  0xb1   : > { %v3688_v33 = vsub.f32 %v341_v0, %v542_v30  ;;  %v3697_v38 = vsub.f32 %v295_v2, %v496_v35 }
  0xb2   : > { %v3690_v34 = vsub.f32 %v293_v1, %v494_v31  ;;  %v3770_v31 = vld [vmem:[%s3601_s28 + $0x68] sm:$0xff] }
  0xb3   : > { %v670_v36 = vmul.f32 %v3688_v33, %v3688_v33  ;;  %v624_v45 = vmul.f32 %v3697_v38, %v3697_v38 }
  0xb4   : > { %v622_v37 = vmul.f32 %v3690_v34, %v3690_v34 }
  0xb5   : > { %782 = vadd.xlane.f32.xlu2 %v670_v36 }
  0xb6   : > { %686 = vadd.xlane.f32.xlu0 %v622_v37  ;;  %v458_v39 = vpop.xlane.xlu1 %457  ;;  %v366_v48 = vpop.xlane.xlu2 %365 }
  0xb7   : > { %v362_v40 = vpop.xlane.xlu0 %361  ;;  %v543_v41 = vmul.f32 %v3684_v27, %v458_v39  ;;  %v497_v53 = vmul.f32 %v3684_v27, %v366_v48 }
  0xb8   : > { %v495_v42 = vmul.f32 %v3684_v27, %v362_v40 }
  0xb9   : > { %v3701_v43 = vsub.f32 %v342_v3, %v543_v41  ;;  %v3727_v58 = vsub.f32 %v3621_v5, %v497_v53 }
  0xba   : > { %v3703_v44 = vsub.f32 %v294_v4, %v495_v42 }
  0xbb   : > { %v671_v46 = vmul.f32 %v3701_v43, %v3701_v43  ;;  %v625_v61 = vmul.f32 %v3727_v58, %v3727_v58 }
  0xbc   : > { %v623_v47 = vmul.f32 %v3703_v44, %v3703_v44 }
  0xbd   : > { %690 = vadd.xlane.f32.xlu2 %v624_v45 }
  0xbe   : > { %784 = vadd.xlane.f32.xlu0 %v671_v46  ;;  %688 = vadd.xlane.f32.xlu1 %v623_v47  ;;  %v462_v49 = vpop.xlane.xlu1 %461  ;;  %v368_v3 = vpop.xlane.xlu2 %367 }
  0xbf   : > { %v460_v50 = vpop.xlane.xlu0 %459  ;;  %v545_v51 = vmul.f32 %v3684_v27, %v462_v49 }
  0xc0   : > { %v544_v55 = vmul.f32 %v3684_v27, %v460_v50 }
  0xc1   : > { %v3713_v52 = vsub.f32 %v3625_v6, %v545_v51  ;;  %v3749_v6 = vld [vmem:[%s3601_s28 + $0x1e0] sm:$0xff]  ;;  %v3804_v51 = vld [vmem:[%s3601_s28 + $0x1e8] sm:$0xff] }
  0xc2   : > { %v3731_v59 = vsub.f32 %v3628_v7, %v544_v55  ;;  %v498_v7 = vmul.f32 %v3684_v27, %v368_v3  ;;  %v3832_v3 = vld [vmem:[%s3601_s28 + $0x78] sm:$0xff] }
  0xc3   : > { %v673_v56 = vmul.f32 %v3713_v52, %v3713_v52 }
  0xc4   : > { %v672_v0 = vmul.f32 %v3731_v59, %v3731_v59  ;;  %v3761_v24 = vsub.f32 %v3631_v8, %v498_v7 }
  0xc5   : > { %788 = vadd.xlane.f32.xlu2 %v673_v56 }
  0xc6   : > { %381 = vadd.xlane.f32.xlu0 %v3717_v54  ;;  %475 = vadd.xlane.f32.xlu1 %v3723_v57  ;;  %v464_v1 = vpop.xlane.xlu1 %463  ;;  %v466_v25 = vpop.xlane.xlu2 %465  ;;  %v626_v30 = vmul.f32 %v3761_v24, %v3761_v24 }
  0xc7   : > { %v370_v60 = vpop.xlane.xlu0 %369  ;;  %v546_v5 = vmul.f32 %v3684_v27, %v464_v1 }
  0xc8   : > { %v499_v62 = vmul.f32 %v3684_v27, %v370_v60  ;;  %v3817_v60 = vld [vmem:[%s3601_s28 + $0x70] sm:$0xff] }
  0xca   : > { %v3743_v2 = vsub.f32 %v3637_v9, %v499_v62  ;;  %v3757_v9 = vsub.f32 %v3640_v10, %v546_v5  ;;  %v547_v10 = vmul.f32 %v3684_v27, %v466_v25  ;;  %v3840_v5 = vld [vmem:[%s3601_s28 + $0x1f8] sm:$0xff] }
  0xcc   : > { %v627_v4 = vmul.f32 %v3743_v2, %v3743_v2  ;;  %v674_v26 = vmul.f32 %v3757_v9, %v3757_v9  ;;  %v3781_v36 = vsub.f32 %v3643_v11, %v547_v10  ;;  %v2970_v10 = vld [vmem:[#allocation8 + $0xb0] sm:$0xf] }
  0xcd   : > { %477 = vadd.xlane.f32.xlu2 %v3737_v63 }
  0xce   : > { %692 = vadd.xlane.f32.xlu0 %v625_v61  ;;  %786 = vadd.xlane.f32.xlu1 %v672_v0  ;;  %v372_v23 = vpop.xlane.xlu1 %371  ;;  %v374_v46 = vpop.xlane.xlu2 %373  ;;  %v3828_v0 = vld [vmem:[%s3601_s28 + $0x1f0] sm:$0xff] }
  0xcf   : > { %v468_v21 = vpop.xlane.xlu0 %467  ;;  %v500_v28 = vmul.f32 %v3684_v27, %v372_v23  ;;  %v501_v50 = vmul.f32 %v3684_v27, %v374_v46  ;;  %v2998_v46 = vld [vmem:[#allocation8 + $0xa0] sm:$0xf0] }
  0xd0   : > { %v548_v29 = vmul.f32 %v3684_v27, %v468_v21 }
  0xd1   : > { %v3775_v8 = vsub.f32 %v3649_v12, %v500_v28  ;;  %v2999_v28 = vld [vmem:[#allocation8 + $0xac] sm:$0xf] }
  0xd2   : > { %v3778_v35 = vsub.f32 %v3652_v13, %v548_v29  ;;  %v675_v13 = vmul.f32 %v3781_v36, %v3781_v36 }
  0xd3   : > { %v628_v39 = vmul.f32 %v3775_v8, %v3775_v8 }
  0xd4   : > { %5680 = vst [vmem:[#allocation15_spill] sm:$0xff] %v3778_v35  ;;  %v676_v40 = vmul.f32 %v3778_v35, %v3778_v35 }
  0xd5   : > { %696 = vadd.xlane.f32.xlu2 %v627_v4 }
  0xd6   : > { %479 = vadd.xlane.f32.xlu0 %v3749_v6  ;;  %383 = vadd.xlane.f32.xlu1 %v3753_v22  ;;  %v470_v37 = vpop.xlane.xlu1 %469 }
  0xd7   : > { %v376_v32 = vpop.xlane.xlu0 %375  ;;  %v549_v41 = vmul.f32 %v3684_v27, %v470_v37 }
  0xd8   : > { %v502_v12 = vmul.f32 %v3684_v27, %v376_v32  ;;  %v3001_v32 = vld [vmem:[#allocation8 + $0xb8] sm:$0xf0] }
  0xd9   : > { %v3792_v11 = vsub.f32 %v3661_v15, %v549_v41  ;;  %v2996_v41 = vld [vmem:[#allocation8 + $0x94] sm:$0xf] }
  0xda   : > { %v3795_v42 = vsub.f32 %v3664_v16, %v502_v12  ;;  %v3811_v16 = vsub.f32 %v3655_v14, %v501_v50  ;;  %v472_v14 = vpop.xlane.xlu2 %471  ;;  %v2994_v50 = vld [vmem:[#allocation8 + $0x80] sm:$0xf0] }
  0xdb   : > { %v677_v47 = vmul.f32 %v3792_v11, %v3792_v11  ;;  %v550_v1 = vmul.f32 %v3684_v27, %v472_v14  ;;  %v2995_v14 = vld [vmem:[#allocation8 + $0x88] sm:$0xf0] }
  0xdc   : > { %5681 = vst [vmem:[#allocation16_spill] sm:$0xff] %v3795_v42  ;;  %v630_v48 = vmul.f32 %v3795_v42, %v3795_v42  ;;  %v629_v61 = vmul.f32 %v3811_v16, %v3811_v16 }
  0xdd   : > { %385 = vadd.xlane.f32.xlu2 %v3770_v31  ;;  %5683 = vst [vmem:[#allocation18_spill] sm:$0xff] %v3811_v16  ;;  %v3837_v4 = vsub.f32 %v3667_v17, %v550_v1  ;;  %v2962_v17 = vld [vmem:[#allocation8 + $0xa8] sm:$0xf] }
  0xde   : > { %790 = vadd.xlane.f32.xlu0 %v674_v26  ;;  %694 = vadd.xlane.f32.xlu1 %v626_v30  ;;  %v378_v53 = vpop.xlane.xlu1 %377  ;;  %v3000_v26 = vld [vmem:[#allocation8 + $0xb0] sm:$0xf0]  ;;  %v2964_v30 = vld [vmem:[#allocation8 + $0xb4] sm:$0xf0] }
  0xdf   : > { %v474_v45 = vpop.xlane.xlu0 %473  ;;  %v503_v56 = vmul.f32 %v3684_v27, %v378_v53  ;;  %5685 = vst [vmem:[#allocation20_spill] sm:$0xff] %v3837_v4  ;;  %v678_v7 = vmul.f32 %v3837_v4, %v3837_v4  ;;  %v2963_v29 = vor.u32 %v3000_v26, %v2962_v17  ;;  %v3851_v37 = vor.u32 %v2999_v28, %v2964_v30  ;;  %v2993_v53 = vld [vmem:[#allocation8 + $0x7c] sm:$0xf]  ;;  %v2928_v17 = vld [vmem:[#allocation8 + $0x6c] sm:$0xf0] }
  0xe0   : > { %v551_v49 = vmul.f32 %v3684_v27, %v474_v45  ;;  %v2958_v45 = vld [vmem:[#allocation8 + $0x98] sm:$0xf]  ;;  %v2934_v26 = vld [vmem:[#allocation8 + $0x68] sm:$0xf]  ;;  %v2992_v28 = vld [vmem:[#allocation8 + $0x70] sm:$0xf0] }
  0xe1   : > { %1980 = vmatpush.bf16.msra.mxu0 %v2963_v29  ;;  %3002 = vmatpush.bf16.msra.mxu3 %v2963_v29  ;;  %v3871_v30 = vor.u32 %v2992_v28, %v2934_v26  ;;  %v2890_v28 = vld [vmem:[#allocation8 + $0x18] sm:$0xf] }
  0xe2   : > { %v3807_v15 = vsub.f32 %v3673_v18, %v551_v49  ;;  %v3823_v18 = vsub.f32 %v3676_v19, %v503_v56  ;;  %v380_v19 = vpop.xlane.xlu2 %379  ;;  %2149 = vmatpush.bf16.msra.mxu1 %v3851_v37  ;;  %v2938_v49 = vld [vmem:[#allocation8 + $0x78] sm:$0xf]  ;;  %v2940_v56 = vld [vmem:[#allocation8 + $0x84] sm:$0xf0] }
  0xe3   : > { %v504_v21 = vmul.f32 %v3684_v27, %v380_v19  ;;  %v2926_v19 = vld [vmem:[#allocation8 + $0x60] sm:$0xf] }
  0xe4   : > { %5682 = vst [vmem:[#allocation17_spill] sm:$0xff] %v3807_v15  ;;  %v679_v55 = vmul.f32 %v3807_v15, %v3807_v15  ;;  %v631_v62 = vmul.f32 %v3823_v18, %v3823_v18 }
  0xe5   : > { %794 = vadd.xlane.f32.xlu2 %v676_v40  ;;  %5684 = vst [vmem:[#allocation19_spill] sm:$0xff] %v3823_v18  ;;  %v3847_v23 = vsub.f32 %v3679_v20, %v504_v21  ;;  %v2950_v20 = vld [vmem:[#allocation8 + $0x90] sm:$0xf]  ;;  %v2997_v40 = vld [vmem:[#allocation8 + $0x98] sm:$0xf0] }
  0xe6   : > { %698 = vadd.xlane.f32.xlu0 %v628_v39  ;;  %792 = vadd.xlane.f32.xlu1 %v675_v13  ;;  %v3853_v39 = vor.u32 %v3001_v32, %v2970_v10  ;;  %v2951_v12 = vor.u32 %v2997_v40, %v2950_v20  ;;  %v2952_v13 = vld [vmem:[#allocation8 + $0x9c] sm:$0xf0]  ;;  %v2990_v21 = vld [vmem:[#allocation8 + $0x64] sm:$0xf]  ;;  %v2914_v10 = vld [vmem:[#allocation8 + $0x48] sm:$0xf] }
  0xe7   : > { %5686 = vst [vmem:[#allocation21_spill] sm:$0xff] %v3847_v23  ;;  %v632_v25 = vmul.f32 %v3847_v23, %v3847_v23  ;;  %v3869_v29 = vor.u32 %v2990_v21, %v2928_v17  ;;  %v2988_v32 = vld [vmem:[#allocation8 + $0x50] sm:$0xf0]  ;;  %v2987_v20 = vld [vmem:[#allocation8 + $0x4c] sm:$0xf] }
  0xe8   : > { %2318 = vmatpush.bf16.msra.mxu2 %v3853_v39  ;;  %1981 = vmatpush.bf16.msra.mxu0 %v2951_v12  ;;  %v2915_v40 = vor.u32 %v2988_v32, %v2914_v10  ;;  %v2982_v10 = vld [vmem:[#allocation8 + $0x20] sm:$0xf0]  ;;  %v2981_v32 = vld [vmem:[#allocation8 + $0x1c] sm:$0xf] }
  0xe9   : > { %3003 = vmatpush.bf16.msra.mxu3 %v2951_v12  ;;  %v2922_v12 = vld [vmem:[#allocation8 + $0x50] sm:$0xf] }
  0xed   : > { %702 = vadd.xlane.f32.xlu2 %v630_v48  ;;  %v3859_v48 = vor.u32 %v2998_v46, %v2958_v45 }
  0xee   : > { %796 = vadd.xlane.f32.xlu0 %v677_v47  ;;  %481 = vadd.xlane.f32.xlu1 %v3804_v51  ;;  %v3857_v47 = vor.u32 %v2996_v41, %v2952_v13  ;;  %v2916_v41 = vld [vmem:[#allocation8 + $0x54] sm:$0xf0]  ;;  %v2989_v13 = vld [vmem:[#allocation8 + $0x58] sm:$0xf0] }
  0xef   : > { %2319 = vmatpush.bf16.msra.mxu2 %v3859_v48  ;;  %v3875_v45 = vor.u32 %v2987_v20, %v2916_v41  ;;  %v3877_v46 = vor.u32 %v2989_v13, %v2922_v12  ;;  %v2891_v20 = vor.u32 %v2982_v10, %v2890_v28 }
  0xf0   : > { %2150 = vmatpush.bf16.msra.mxu1 %v3857_v47 }
  0xf5   : > { %800 = vadd.xlane.f32.xlu2 %v679_v55  ;;  %v2939_v55 = vor.u32 %v2994_v50, %v2938_v49  ;;  %v2902_v49 = vld [vmem:[#allocation8 + $0x30] sm:$0xf]  ;;  %v2985_v50 = vld [vmem:[#allocation8 + $0x38] sm:$0xf0] }
  0xf6   : > { %387 = vadd.xlane.f32.xlu0 %v3817_v60  ;;  %700 = vadd.xlane.f32.xlu1 %v629_v61  ;;  %v2946_v61 = vld [vmem:[#allocation8 + $0x80] sm:$0xf] }
  0xf7   : > { %v3865_v1 = vor.u32 %v2995_v14, %v2946_v61  ;;  %1982 = vmatpush.bf16.msra.mxu0 %v2939_v55  ;;  %3004 = vmatpush.bf16.msra.mxu3 %v2939_v55  ;;  %v2903_v55 = vor.u32 %v2985_v50, %v2902_v49  ;;  %v2910_v61 = vld [vmem:[#allocation8 + $0x38] sm:$0xf]  ;;  %v2986_v14 = vld [vmem:[#allocation8 + $0x40] sm:$0xf0]  ;;  %v2898_v49 = vld [vmem:[#allocation8 + $0x20] sm:$0xf] }
  0xf8   : > { %v2983_v50 = vld [vmem:[#allocation8 + $0x28] sm:$0xf0] }
  0xf9   : > { %2320 = vmatpush.bf16.msra.mxu2 %v3865_v1 }
  0xfd   : > { %483 = vadd.xlane.f32.xlu2 %v3828_v0  ;;  %2321 = vmatpush.bf16.msra.mxu2 %v3871_v30 }
  0xfe   : > { %704 = vadd.xlane.f32.xlu0 %v631_v62  ;;  %389 = vadd.xlane.f32.xlu1 %v3832_v3  ;;  %v3863_v62 = vor.u32 %v2993_v53, %v2940_v56  ;;  %v2984_v53 = vld [vmem:[#allocation8 + $0x34] sm:$0xf]  ;;  %v2904_v56 = vld [vmem:[#allocation8 + $0x3c] sm:$0xf0] }
 0x100   : > { %2151 = vmatpush.bf16.msra.mxu1 %v3863_v62 }
 0x101   : > { %2322 = vmatpush.bf16.msra.mxu2 %v3877_v46 }
 0x104   : > { %2152 = vmatpush.bf16.msra.mxu1 %v3869_v29 }
 0x106   : > { %485 = vadd.xlane.f32.xlu0 %v3840_v5  ;;  %798 = vadd.xlane.f32.xlu1 %v678_v7  ;;  %v2991_v7 = vld [vmem:[#allocation8 + $0x68] sm:$0xf0] }
 0x108   : > { %2153 = vmatpush.bf16.msra.mxu1 %v3875_v45 }
 0x10e   : > { %706 = vadd.xlane.f32.xlu1 %v632_v25  ;;  %v2927_v25 = vor.u32 %v2991_v7, %v2926_v19  ;;  %v3881_v19 = vor.u32 %v2984_v53, %v2904_v56  ;;  %v3883_v7 = vor.u32 %v2986_v14, %v2910_v61  ;;  %v3897_v53 = vor.u32 %v2983_v50, %v2898_v49  ;;  %v2979_v56 = vld [vmem:[#allocation8 + $0x8] sm:$0xf0]  ;;  %v2978_v61 = vld [vmem:[#allocation8 + $0x4] sm:$0xf] }
 0x110   : > { %1983 = vmatpush.bf16.msra.mxu0 %v2927_v25  ;;  %3005 = vmatpush.bf16.msra.mxu3 %v2927_v25 }
 0x111   : > { %2154 = vmatpush.bf16.msra.mxu1 %v3881_v19  ;;  %2323 = vmatpush.bf16.msra.mxu2 %v3883_v7 }
 0x114   : > { %1984 = vmatpush.bf16.msra.mxu0 %v2915_v40  ;;  %3006 = vmatpush.bf16.msra.mxu3 %v2915_v40  ;;  %v2892_v40 = vld [vmem:[#allocation8 + $0x24] sm:$0xf0] }
 0x115   : > { %v3893_v13 = vor.u32 %v2981_v32, %v2892_v40  ;;  %2324 = vmatpush.bf16.msra.mxu2 %v3897_v53 }
 0x117   : > { %2155 = vmatpush.bf16.msra.mxu1 %v3893_v13 }
 0x118   : > { %1985 = vmatpush.bf16.msra.mxu0 %v2903_v55  ;;  %3007 = vmatpush.bf16.msra.mxu3 %v2903_v55  ;;  %v2878_v55 = vld [vmem:[#allocation8] sm:$0xf] }
 0x119   : > { %v2879_v14 = vor.u32 %v2979_v56, %v2878_v55 }
 0x11c   : > { %1986 = vmatpush.bf16.msra.mxu0 %v2891_v20  ;;  %3008 = vmatpush.bf16.msra.mxu3 %v2891_v20 }
 0x120   : > { %1987 = vmatpush.bf16.msra.mxu0 %v2879_v14  ;;  %3009 = vmatpush.bf16.msra.mxu3 %v2879_v14 }
 0x124   : > { %3010 = vmatpush.bf16.msrb.mxu3 %v3851_v37 }
 0x128   : > { %v783_v21 = vpop.xlane.xlu2 %782  ;;  %3011 = vmatpush.bf16.msrb.mxu3 %v3857_v47 }
 0x129   : > { %v687_v25 = vpop.xlane.xlu0 %686  ;;  %v862_v17 = vmul.f32 %v783_v21, %v3684_v27  ;;  %v2880_v21 = vld [vmem:[#allocation8 + $0xc] sm:$0xf0] }
 0x12a   : > { %v814_v26 = vmul.f32 %v687_v25, %v3684_v27  ;;  %v2886_v25 = vld [vmem:[#allocation8 + $0x8] sm:$0xf] }
 0x12b   : > { %v3889_v41 = vadd.f32 1e-05, %v862_v17  ;;  %v2980_v17 = vld [vmem:[#allocation8 + $0x10] sm:$0xf0] }
 0x12c   : > { %v3891_v12 = vadd.f32 1e-05, %v814_v26  ;;  %v3901_v26 = vor.u32 %v2978_v61, %v2880_v21  ;;  %v3903_v28 = vor.u32 %v2980_v17, %v2886_v25  ;;  %3012 = vmatpush.bf16.msrb.mxu3 %v3863_v62 }
 0x12d   : > { %3116 = vrsqrt.f32 %v3889_v41  ;;  %vm1428_vm2 = vweird.f32 %v3889_v41 }
 0x12e   : > { %3118 = vrsqrt.f32 %v3891_v12  ;;  %2156 = vmatpush.bf16.msra.mxu1 %v3901_v26  ;;  %2325 = vmatpush.bf16.msra.mxu2 %v3903_v28  ;;  %vm948_vm5 = vweird.f32 %v3891_v12 }
 0x130   : > { %v691_v10 = vpop.xlane.xlu2 %690  ;;  %3013 = vmatpush.bf16.msrb.mxu3 %v3869_v29 }
 0x131   : > { %v785_v32 = vpop.xlane.xlu0 %784  ;;  %v816_v20 = vmul.f32 %v691_v10, %v3684_v27  ;;  %v689_v40 = vpop.xlane.xlu1 %688 }
 0x132   : > { %v863_v49 = vmul.f32 %v785_v32, %v3684_v27  ;;  %v815_v50 = vmul.f32 %v689_v40, %v3684_v27 }
 0x133   : > { %v3910_v55 = vpop.eup %3116  ;;  %v3912_v56 = vadd.f32 1e-05, %v816_v20 }
 0x134   : > { %v3914_v61 = vadd.f32 1e-05, %v863_v49  ;;  %v3119_v14 = vpop.eup %3118  ;;  %v1423_v21 = vmul.f32 %v3910_v55, %v3889_v41  ;;  %v3919_v25 = vadd.f32 1e-05, %v815_v50  ;;  %vm1429_vm1 = vweird.f32 %v3910_v55  ;;  %3014 = vmatpush.bf16.msrb.mxu3 %v3875_v45 }
 0x135   : > { %v943_v17 = vmul.f32 %v3119_v14, %v3891_v12  ;;  %3120 = vrsqrt.f32 %v3912_v56  ;;  %vm949_vm3 = vweird.f32 %v3119_v14  ;;  %vm3952_vm4 = vmor %vm1428_vm2, %vm1429_vm1  ;;  %vm968_vm11 = vweird.f32 %v3912_v56 }
 0x136   : > { %v1424_v37 = vmul.f32 %v3910_v55, %v1423_v21  ;;  %3122 = vrsqrt.f32 %v3919_v25  ;;  %vm3961_vm6 = vmor %vm948_vm5, %vm949_vm3  ;;  %vm958_vm7 = vweird.f32 %v3919_v25  ;;  %vm1438_vm12 = vweird.f32 %v3914_v61 }
 0x137   : > { %v944_v10 = vmul.f32 %v3119_v14, %v943_v17  ;;  %3124 = vrsqrt.f32 %v3914_v61 }
 0x138   : > { %v1425_v32 = vmul.f32 0.5, %v1424_v37  ;;  %v789_v20 = vpop.xlane.xlu2 %788  ;;  %3015 = vmatpush.bf16.msrb.mxu3 %v3881_v19 }
 0x139   : > { %v382_v40 = vpop.xlane.xlu0 %381  ;;  %v945_v49 = vmul.f32 0.5, %v944_v10  ;;  %v865_v50 = vmul.f32 %v789_v20, %v3684_v27  ;;  %v476_v23 = vpop.xlane.xlu1 %475 }
 0x13a   : > { %v505_v4 = vmul.f32 %v3684_v27, %v382_v40  ;;  %v1426_v15 = vsub.f32 1.5, %v1425_v32  ;;  %v552_v47 = vmul.f32 %v3684_v27, %v476_v23 }
 0x13b   : > { %v3931_v21 = vpop.eup %3120  ;;  %v946_v17 = vsub.f32 1.5, %v945_v49  ;;  %v3934_v42 = vadd.f32 1e-05, %v865_v50 }
 0x13c   : > { %v3936_v37 = vpop.eup %3122  ;;  %v1427_v10 = vmul.f32 %v3910_v55, %v1426_v15  ;;  %v3941_v20 = vsub.f32 %v3723_v57, %v552_v47  ;;  %v3949_v40 = vsub.f32 %v3717_v54, %v505_v4  ;;  %v963_v57 = vmul.f32 %v3931_v21, %v3912_v56  ;;  %3016 = vmatpush.bf16.msrb.mxu3 %v3893_v13 }
 0x13d   : > { %v3943_v62 = vpop.eup %3124  ;;  %v947_v23 = vmul.f32 %v3119_v14, %v946_v17  ;;  %v953_v32 = vmul.f32 %v3936_v37, %v3919_v25  ;;  %3126 = vrsqrt.f32 %v3934_v42  ;;  %vm959_vm8 = vweird.f32 %v3936_v37 }
 0x13e   : > { %v1433_v41 = vmul.f32 %v3943_v62, %v3914_v61  ;;  %v1431_v4 = vsel %vm3952_vm4, %v3910_v55, %v1427_v10  ;;  %v680_v50 = vmul.f32 %v3941_v20, %v3941_v20  ;;  %v964_v55 = vmul.f32 %v3931_v21, %v963_v57  ;;  %vm3998_vm9 = vmor %vm958_vm7, %vm959_vm8 }
 0x13f   : > { %v954_v54 = vmul.f32 %v3936_v37, %v953_v32  ;;  %v951_v29 = vsel %vm3961_vm6, %v3119_v14, %v947_v23  ;;  %v633_v32 = vmul.f32 %v3949_v40, %v3949_v40  ;;  %v1630_v45 = vmul.f32 %v1431_v4, %v3688_v33 }
 0x140   : > { %v1434_v12 = vmul.f32 %v3943_v62, %v1433_v41  ;;  %v478_v47 = vpop.xlane.xlu2 %477  ;;  %802 = vadd.xlane.f32.xlu0 %v680_v50  ;;  %v1582_v41 = vmul.f32 %v951_v29, %v3690_v34  ;;  %vm1439_vm10 = vweird.f32 %v3943_v62  ;;  %vm969_vm13 = vweird.f32 %v3931_v21  ;;  %v4022_v29 = vld [vmem:[%s3601_s28 + $0x88] sm:$0xff]  ;;  %3017 = vmatpush.bf16.msrb.mxu3 %v3901_v26 }
 0x141   : > { %v693_v17 = vpop.xlane.xlu0 %692  ;;  %v955_v18 = vmul.f32 0.5, %v954_v54  ;;  %v553_v35 = vmul.f32 %v3684_v27, %v478_v47  ;;  %v787_v16 = vpop.xlane.xlu1 %786  ;;  %708 = vadd.xlane.f32.xlu2 %v633_v32  ;;  %vm1440_vm14 = vmor %vm1438_vm12, %vm1439_vm10  ;;  %vm1458_vm15 = vweird.f32 %v3934_v42 }
 0x142   : > { %v817_v15 = vmul.f32 %v693_v17, %v3684_v27  ;;  %v1435_v14 = vmul.f32 0.5, %v1434_v12  ;;  %v864_v10 = vmul.f32 %v787_v16, %v3684_v27  ;;  %v3991_v17 = vld [vmem:[#allocation5] ss:$0 sm:$0xff]  ;;  %v4025_v12 = vld [vmem:[#allocation7] ss:$0 sm:$0xff]  ;;  %vm4086_vm3 = vmor %vm968_vm11, %vm969_vm13 }
 0x143   : > { %v3983_v23 = vpop.eup %3126  ;;  %v956_v49 = vsub.f32 1.5, %v955_v18  ;;  %v3987_v54 = vsub.f32 %v3737_v63, %v553_v35  ;;  %v965_v18 = vmul.f32 0.5, %v964_v55  ;;  %v1649_v19 = vmul.f32 %v3991_v17, %v1582_v41  ;;  %v4030_v55 = vld [vmem:[%s3601_s28 + $0x80] sm:$0xff] }
 0x144   : > { %v3989_v47 = vadd.f32 1e-05, %v817_v15  ;;  %v1436_v34 = vsub.f32 1.5, %v1435_v14  ;;  %v1453_v63 = vmul.f32 %v3983_v23, %v3934_v42  ;;  %v4008_v33 = vadd.f32 1e-05, %v864_v10 }
 0x145   : > { %v957_v35 = vmul.f32 %v3936_v37, %v956_v49  ;;  %v681_v4 = vmul.f32 %v3987_v54, %v3987_v54  ;;  %vm1459_vm0 = vweird.f32 %v3983_v23 }
 0x146   : > { %3128 = vrsqrt.f32 %v3989_v47  ;;  %v1437_v25 = vmul.f32 %v3943_v62, %v1436_v34  ;;  %v1454_v57 = vmul.f32 %v3983_v23, %v1453_v63  ;;  %vm4070_vm1 = vmor %vm1458_vm15, %vm1459_vm0  ;;  %vm978_vm2 = vweird.f32 %v3989_v47 }
 0x147   : > { %v961_v61 = vsel %vm3998_vm9, %v3936_v37, %v957_v35  ;;  %3130 = vrsqrt.f32 %v4008_v33  ;;  %804 = vadd.xlane.f32.xlu1 %v681_v4  ;;  %v1697_v37 = vmul.f32 %v3991_v17, %v1630_v45  ;;  %vm1448_vm5 = vweird.f32 %v4008_v33 }
 0x148   : > { %v1583_v50 = vmul.f32 %v961_v61, %v3703_v44  ;;  %v1441_v32 = vsel %vm1440_vm14, %v3943_v62, %v1437_v25  ;;  %v1455_v15 = vmul.f32 0.5, %v1454_v57  ;;  %v697_v14 = vpop.xlane.xlu2 %696  ;;  %v966_v44 = vsub.f32 1.5, %v965_v18  ;;  %393 = vadd.xlane.f32.xlu0 %v4022_v29 }
 0x149   : > { %v480_v10 = vpop.xlane.xlu0 %479  ;;  %v1631_v49 = vmul.f32 %v1441_v32, %v3701_v43  ;;  %v384_v16 = vpop.xlane.xlu1 %383  ;;  %v819_v41 = vmul.f32 %v697_v14, %v3684_v27  ;;  %391 = vadd.xlane.f32.xlu2 %v4030_v55  ;;  %v1716_v25 = vadd.f32 %v4025_v12, %v1649_v19  ;;  %v1764_v61 = vadd.f32 %v4025_v12, %v1697_v37 }
 0x14a   : > { %v554_v34 = vmul.f32 %v3684_v27, %v480_v10  ;;  %v1456_v62 = vsub.f32 1.5, %v1455_v15  ;;  %v506_v63 = vmul.f32 %v3684_v27, %v384_v16  ;;  %v1650_v35 = vmul.f32 %v3991_v17, %v1583_v50 }
 0x14b   : > { %v4045_v43 = vadd.f32 1e-05, %v819_v41  ;;  %v1698_v13 = vmul.f32 %v3991_v17, %v1631_v49 }
 0x14c   : > { %v4041_v45 = vpop.eup %3128  ;;  %v4052_v57 = vsub.f32 %v3753_v22, %v506_v63  ;;  %v4055_v4 = vsub.f32 %v3749_v6, %v554_v34  ;;  %v1457_v32 = vmul.f32 %v3983_v23, %v1456_v62  ;;  %v1717_v19 = vadd.f32 %v4025_v12, %v1650_v35 }
 0x14d   : > { %v973_v18 = vmul.f32 %v4041_v45, %v3989_v47  ;;  %v4058_v50 = vpop.eup %3130  ;;  %3132 = vrsqrt.f32 %v4045_v43  ;;  %v1765_v15 = vadd.f32 %v4025_v12, %v1698_v13  ;;  %v967_v22 = vmul.f32 %v3931_v21, %v966_v44 }
 0x14e   : > { %v1443_v14 = vmul.f32 %v4058_v50, %v4008_v33  ;;  %v634_v26 = vmul.f32 %v4052_v57, %v4052_v57  ;;  %v1780_v37 = vpack.c.bf16 %v1717_v19, %v1716_v25  ;;  %vm979_vm4 = vweird.f32 %v4041_v45 }
 0x14f   : > { %v974_v10 = vmul.f32 %v4041_v45, %v973_v18  ;;  %v4080_v49 = vpack.c.bf16 %v1765_v15, %v1764_v61  ;;  %v682_v34 = vmul.f32 %v4055_v4, %v4055_v4  ;;  %v1461_v63 = vsel %vm4070_vm1, %v3983_v23, %v1457_v32  ;;  %vm4112_vm7 = vmor %vm978_vm2, %vm979_vm4  ;;  %v4172_v32 = vld [vmem:[%s3601_s28 + $0x90] sm:$0xff] }
 0x150   : > { %v1444_v16 = vmul.f32 %v4058_v50, %v1443_v14  ;;  %v386_v44 = vpop.xlane.xlu2 %385  ;;  %710 = vadd.xlane.f32.xlu1 %v634_v26  ;;  %1988 = vmatmul.bf16.vlgmr.msra.gmra.mxu0 %v1780_v37  ;;  %vm1449_vm6 = vweird.f32 %v4058_v50  ;;  %v971_v23 = vsel %vm4086_vm3, %v3931_v21, %v967_v22  ;;  %v1633_v14 = vmul.f32 %v1461_v63, %v3713_v52 }
 0x151   : > { %v975_v41 = vmul.f32 0.5, %v974_v10  ;;  %v791_v62 = vpop.xlane.xlu0 %790  ;;  %v695_v56 = vpop.xlane.xlu1 %694  ;;  %v507_v35 = vmul.f32 %v3684_v27, %v386_v44  ;;  %2108 = vmatmul.bf16.vlgmr.msra.gmra.mxu3 %v4080_v49  ;;  %2157 = vmatmul.bf16.vlgmr.msra.gmra.mxu1 %v1780_v37  ;;  %vm4130_vm8 = vmor %vm1448_vm5, %vm1449_vm6  ;;  %v1584_v26 = vmul.f32 %v971_v23, %v3697_v38  ;;  %vm998_vm9 = vweird.f32 %v4045_v43 }
 0x152   : > { %v866_v25 = vmul.f32 %v791_v62, %v3684_v27  ;;  %v1445_v13 = vmul.f32 0.5, %v1444_v16  ;;  %v818_v61 = vmul.f32 %v695_v56, %v3684_v27  ;;  %2326 = vmatmul.bf16.vlgmr.msra.gmra.mxu2 %v1780_v37  ;;  %806 = vadd.xlane.f32.xlu0 %v682_v34  ;;  %v4151_v34 = vld [vmem:[%s3601_s28 + $0x98] sm:$0xff]  ;;  %v1700_v62 = vmul.f32 %v3991_v17, %v1633_v14 }
 0x153   : > { %v976_v18 = vsub.f32 1.5, %v975_v41  ;;  %v4103_v19 = vpop.eup %3132  ;;  %v4117_v15 = vsub.f32 %v3770_v31, %v507_v35  ;;  %3018 = vmatpush.bf16.msra.mxu3 %v3853_v39 }
 0x154   : > { %v4119_v6 = vadd.f32 1e-05, %v866_v25  ;;  %v1446_v10 = vsub.f32 1.5, %v1445_v13  ;;  %v993_v47 = vmul.f32 %v4103_v19, %v4045_v43  ;;  %v4134_v22 = vadd.f32 1e-05, %v818_v61 }
 0x155   : > { %v977_v21 = vmul.f32 %v4041_v45, %v976_v18  ;;  %v635_v52 = vmul.f32 %v4117_v15, %v4117_v15  ;;  %v1651_v25 = vmul.f32 %v3991_v17, %v1584_v26  ;;  %v1767_v31 = vadd.f32 %v4025_v12, %v1700_v62 }
 0x156   : > { %3134 = vrsqrt.f32 %v4119_v6  ;;  %v1447_v37 = vmul.f32 %v4058_v50, %v1446_v10  ;;  %v994_v33 = vmul.f32 %v4103_v19, %v993_v47  ;;  %vm999_vm10 = vweird.f32 %v4103_v19 }
 0x157   : > { %v981_v39 = vsel %vm4112_vm7, %v4041_v45, %v977_v21  ;;  %3136 = vrsqrt.f32 %v4134_v22  ;;  %712 = vadd.xlane.f32.xlu2 %v635_v52  ;;  %3019 = vmatpush.bf16.msra.mxu3 %v3859_v48  ;;  %vm4196_vm11 = vmor %vm998_vm9, %vm999_vm10  ;;  %vm988_vm12 = vweird.f32 %v4134_v22  ;;  %vm1468_vm15 = vweird.f32 %v4119_v6 }
 0x158   : > { %v1585_v42 = vmul.f32 %v981_v39, %v3727_v58  ;;  %v1451_v16 = vsel %vm4130_vm8, %v4058_v50, %v1447_v37  ;;  %v995_v41 = vmul.f32 0.5, %v994_v33  ;;  %v795_v38 = vpop.xlane.xlu2 %794  ;;  %v1718_v37 = vadd.f32 %v4025_v12, %v1651_v25 }
 0x159   : > { %v699_v44 = vpop.xlane.xlu0 %698  ;;  %v1632_v45 = vmul.f32 %v1451_v16, %v3731_v59  ;;  %v793_v58 = vpop.xlane.xlu1 %792  ;;  %v868_v63 = vmul.f32 %v795_v38, %v3684_v27 }
 0x15a   : > { %v820_v56 = vmul.f32 %v699_v44, %v3684_v27  ;;  %v1652_v35 = vmul.f32 %v3991_v17, %v1585_v42  ;;  %v867_v50 = vmul.f32 %v793_v58, %v3684_v27  ;;  %v996_v18 = vsub.f32 1.5, %v995_v41  ;;  %397 = vadd.xlane.f32.xlu0 %v4151_v34 }
 0x15b   : > { %v1699_v48 = vmul.f32 %v3991_v17, %v1632_v45  ;;  %3020 = vmatpush.bf16.msra.mxu3 %v3865_v1  ;;  %v4177_v21 = vadd.f32 1e-05, %v868_v63 }
 0x15c   : > { %v4161_v13 = vpop.eup %3134  ;;  %v4167_v61 = vadd.f32 1e-05, %v867_v50  ;;  %v4169_v23 = vadd.f32 1e-05, %v820_v56  ;;  %v1719_v14 = vadd.f32 %v4025_v12, %v1652_v35  ;;  %v997_v39 = vmul.f32 %v4103_v19, %v996_v18 }
 0x15d   : > { %v1463_v59 = vmul.f32 %v4161_v13, %v4119_v6  ;;  %v3137_v10 = vpop.eup %3136  ;;  %v1766_v47 = vadd.f32 %v4025_v12, %v1699_v48  ;;  %vm1469_vm0 = vweird.f32 %v4161_v13  ;;  %vm1488_vm6 = vweird.f32 %v4177_v21 }
 0x15e   : > { %v983_v52 = vmul.f32 %v3137_v10, %v4134_v22  ;;  %3138 = vrsqrt.f32 %v4167_v61  ;;  %v1781_v16 = vpack.c.bf16 %v1719_v14, %v1718_v37  ;;  %vm989_vm13 = vweird.f32 %v3137_v10  ;;  %vm4248_vm1 = vmor %vm1468_vm15, %vm1469_vm0 }
 0x15f   : > { %v1464_v26 = vmul.f32 %v4161_v13, %v1463_v59  ;;  %v4187_v1 = vpack.c.bf16 %v1767_v31, %v1766_v47  ;;  %395 = vadd.xlane.f32.xlu2 %v4172_v32  ;;  %3140 = vrsqrt.f32 %v4169_v23  ;;  %3021 = vmatpush.bf16.msra.mxu3 %v3871_v30  ;;  %v1001_v56 = vsel %vm4196_vm11, %v4103_v19, %v997_v39  ;;  %vm4214_vm14 = vmor %vm988_vm12, %vm989_vm13 }
 0x160   : > { %v984_v33 = vmul.f32 %v3137_v10, %v983_v52  ;;  %v703_v41 = vpop.xlane.xlu2 %702  ;;  %3142 = vrsqrt.f32 %v4177_v21  ;;  %1993 = vmatmul.bf16.gmra.mxu0 %v1781_v16  ;;  %v1587_v47 = vmul.f32 %v1001_v56, %v3743_v2  ;;  %vm1478_vm2 = vweird.f32 %v4167_v61 }
 0x161   : > { %v1465_v42 = vmul.f32 0.5, %v1464_v26  ;;  %v797_v38 = vpop.xlane.xlu0 %796  ;;  %v482_v62 = vpop.xlane.xlu1 %481  ;;  %v822_v45 = vmul.f32 %v703_v41, %v3684_v27  ;;  %2113 = vmatmul.bf16.gmra.mxu3 %v4187_v1  ;;  %2162 = vmatmul.bf16.gmra.mxu1 %v1781_v16  ;;  %vm1008_vm5 = vweird.f32 %v4169_v23 }
 0x162   : > { %v869_v58 = vmul.f32 %v797_v38, %v3684_v27  ;;  %v985_v63 = vmul.f32 0.5, %v984_v33  ;;  %v555_v30 = vmul.f32 %v3684_v27, %v482_v62  ;;  %2331 = vmatmul.bf16.gmra.mxu2 %v1781_v16  ;;  %v1654_v62 = vmul.f32 %v3991_v17, %v1587_v47 }
 0x163   : > { %v1466_v43 = vsub.f32 1.5, %v1465_v42  ;;  %3022 = vmatpush.bf16.msra.mxu3 %v3877_v46  ;;  %v4221_v48 = vadd.f32 1e-05, %v822_v45 }
 0x164   : > { %v986_v35 = vsub.f32 1.5, %v985_v63  ;;  %v4209_v50 = vadd.f32 1e-05, %v869_v58  ;;  %v4212_v25 = vpop.eup %3138  ;;  %v4219_v18 = vsub.f32 %v3804_v51, %v555_v30 }
 0x165   : > { %v4223_v59 = vpop.eup %3140  ;;  %v1473_v19 = vmul.f32 %v4212_v25, %v4167_v61  ;;  %v1467_v31 = vmul.f32 %v4161_v13, %v1466_v43  ;;  %vm1479_vm3 = vweird.f32 %v4212_v25 }
 0x166   : > { %v987_v14 = vmul.f32 %v3137_v10, %v986_v35  ;;  %v4228_v46 = vpop.eup %3142  ;;  %v1003_v51 = vmul.f32 %v4223_v59, %v4169_v23  ;;  %3144 = vrsqrt.f32 %v4209_v50  ;;  %v683_v37 = vmul.f32 %v4219_v18, %v4219_v18  ;;  %vm4271_vm4 = vmor %vm1478_vm2, %vm1479_vm3 }
 0x167   : > { %v1474_v26 = vmul.f32 %v4212_v25, %v1473_v19  ;;  %3023 = vmatpush.bf16.msra.mxu3 %v3883_v7  ;;  %3146 = vrsqrt.f32 %v4221_v48  ;;  %v1483_v44 = vmul.f32 %v4228_v46, %v4177_v21  ;;  %v1471_v30 = vsel %vm4248_vm1, %v4161_v13, %v1467_v31 }
 0x168   : > { %v991_v52 = vsel %vm4214_vm14, %v3137_v10, %v987_v14  ;;  %v801_v39 = vpop.xlane.xlu2 %800  ;;  %v1004_v42 = vmul.f32 %v4223_v59, %v1003_v51  ;;  %808 = vadd.xlane.f32.xlu1 %v683_v37  ;;  %v1721_v13 = vadd.f32 %v4025_v12, %v1654_v62  ;;  %v1634_v19 = vmul.f32 %v1471_v30, %v3757_v9 }
 0x169   : > { %v388_v33 = vpop.xlane.xlu0 %387  ;;  %v1586_v2 = vmul.f32 %v991_v52, %v3761_v24  ;;  %v701_v16 = vpop.xlane.xlu1 %700  ;;  %v871_v10 = vmul.f32 %v801_v39, %v3684_v27  ;;  %v1475_v38 = vmul.f32 0.5, %v1474_v26  ;;  %v1484_v22 = vmul.f32 %v4228_v46, %v1483_v44 }
 0x16a   : > { %v821_v24 = vmul.f32 %v701_v16, %v3684_v27  ;;  %v1005_v45 = vmul.f32 0.5, %v1004_v42  ;;  %v508_v63 = vmul.f32 %v3684_v27, %v388_v33  ;;  %vm1489_vm7 = vweird.f32 %v4228_v46 }
 0x16b   : > { %v4257_v7 = vadd.f32 1e-05, %v871_v10  ;;  %v1476_v6 = vsub.f32 1.5, %v1475_v38  ;;  %3024 = vmatpush.bf16.msra.mxu3 %v3897_v53  ;;  %v1653_v61 = vmul.f32 %v3991_v17, %v1586_v2  ;;  %vm1009_vm8 = vweird.f32 %v4223_v59  ;;  %vm4364_vm15 = vmor %vm1488_vm6, %vm1489_vm7 }
 0x16c   : > { %v4260_v58 = vadd.f32 1e-05, %v821_v24  ;;  %v4268_v43 = vpop.eup %3144  ;;  %v1006_v47 = vsub.f32 1.5, %v1005_v45  ;;  %v4288_v31 = vsub.f32 %v3817_v60, %v508_v63  ;;  %v1485_v33 = vmul.f32 0.5, %v1484_v22  ;;  %vm4318_vm10 = vmor %vm1008_vm5, %vm1009_vm8 }
 0x16d   : > { %v1477_v56 = vmul.f32 %v4212_v25, %v1476_v6  ;;  %v4277_v14 = vpop.eup %3146  ;;  %v1493_v53 = vmul.f32 %v4268_v43, %v4209_v50  ;;  %v1720_v37 = vadd.f32 %v4025_v12, %v1653_v61  ;;  %vm1498_vm9 = vweird.f32 %v4209_v50  ;;  %v4392_v6 = vld [vmem:[%s3601_s28 + $0xa8] sm:$0xff] }
 0x16e   : > { %3148 = vrsqrt.f32 %v4260_v58  ;;  %v1023_v60 = vmul.f32 %v4277_v14, %v4221_v48  ;;  %v636_v2 = vmul.f32 %v4288_v31, %v4288_v31  ;;  %v1007_v44 = vmul.f32 %v4223_v59, %v1006_v47 }
 0x16f   : > { %3150 = vrsqrt.f32 %v4257_v7  ;;  %3025 = vmatpush.bf16.msra.mxu3 %v3903_v28  ;;  %v1481_v26 = vsel %vm4271_vm4, %v4212_v25, %v1477_v56  ;;  %v1494_v9 = vmul.f32 %v4268_v43, %v1493_v53  ;;  %v1782_v16 = vpack.c.bf16 %v1721_v13, %v1720_v37 }
 0x170   : > { %v484_v51 = vpop.xlane.xlu2 %483  ;;  %v1635_v38 = vmul.f32 %v1481_v26, %v3781_v36  ;;  %714 = vadd.xlane.f32.xlu1 %v636_v2  ;;  %v1486_v30 = vsub.f32 1.5, %v1485_v33  ;;  %v1024_v61 = vmul.f32 %v4277_v14, %v1023_v60  ;;  %vm1499_vm11 = vweird.f32 %v4268_v43 }
 0x171   : > { %v705_v52 = vpop.xlane.xlu0 %704  ;;  %v390_v39 = vpop.xlane.xlu1 %389  ;;  %v1495_v42 = vmul.f32 0.5, %v1494_v9  ;;  %v556_v25 = vmul.f32 %v3684_v27, %v484_v51  ;;  %1998 = vmatmul.bf16.gmra.mxu0 %v1782_v16  ;;  %2167 = vmatmul.bf16.gmra.mxu1 %v1782_v16  ;;  %vm1018_vm12 = vweird.f32 %v4260_v58  ;;  %v1011_v22 = vsel %vm4318_vm10, %v4223_v59, %v1007_v44  ;;  %vm4352_vm14 = vmor %vm1498_vm9, %vm1499_vm11  ;;  %v4386_v44 = vld [vmem:[%s3601_s28 + $0xa0] sm:$0xff] }
 0x172   : > { %v509_v28 = vmul.f32 %v3684_v27, %v390_v39  ;;  %v823_v10 = vmul.f32 %v705_v52, %v3684_v27  ;;  %2336 = vmatmul.bf16.gmra.mxu2 %v1782_v16  ;;  %v1702_v13 = vmul.f32 %v3991_v17, %v1635_v38  ;;  %v1487_v33 = vmul.f32 %v4228_v46, %v1486_v30 }
 0x173   : > { %v1496_v45 = vsub.f32 1.5, %v1495_v42  ;;  %v4325_v63 = vsub.f32 %v3828_v0, %v556_v25  ;;  %v1025_v50 = vmul.f32 0.5, %v1024_v61  ;;  %v1588_v42 = vmul.f32 %v1011_v22, %v3775_v8  ;;  %v5717_v61 = vld [vmem:[#allocation18_spill] sm:$0xff] }
 0x174   : > { %v4304_v41 = vpop.eup %3148  ;;  %v4310_v24 = vsub.f32 %v3832_v3, %v509_v28  ;;  %v1701_v3 = vmul.f32 %v3991_v17, %v1634_v19  ;;  %v4329_v23 = vadd.f32 1e-05, %v823_v10  ;;  %v1769_v37 = vadd.f32 %v4025_v12, %v1702_v13 }
 0x175   : > { %v4312_v62 = vpop.eup %3150  ;;  %v1013_v36 = vmul.f32 %v4304_v41, %v4260_v58  ;;  %v684_v0 = vmul.f32 %v4325_v63, %v4325_v63  ;;  %v1497_v47 = vmul.f32 %v4268_v43, %v1496_v45  ;;  %vm1019_vm13 = vweird.f32 %v4304_v41 }
 0x176   : > { %v637_v56 = vmul.f32 %v4310_v24, %v4310_v24  ;;  %v1513_v53 = vmul.f32 %v4312_v62, %v4257_v7  ;;  %3152 = vrsqrt.f32 %v4329_v23  ;;  %v1768_v9 = vadd.f32 %v4025_v12, %v1701_v3  ;;  %vm4374_vm0 = vmor %vm1018_vm12, %vm1019_vm13 }
 0x177   : > { %v1014_v35 = vmul.f32 %v4304_v41, %v1013_v36  ;;  %810 = vadd.xlane.f32.xlu0 %v684_v0  ;;  %v1501_v38 = vsel %vm4352_vm14, %v4268_v43, %v1497_v47  ;;  %v1491_v45 = vsel %vm4364_vm15, %v4228_v46, %v1487_v33  ;;  %v1026_v36 = vsub.f32 1.5, %v1025_v50  ;;  %v5718_v46 = vld [vmem:[#allocation15_spill] sm:$0xff] }
 0x178   : > { %716 = vadd.xlane.f32.xlu2 %v637_v56  ;;  %v1514_v21 = vmul.f32 %v4312_v62, %v1513_v53  ;;  %v4379_v25 = vpack.c.bf16 %v1769_v37, %v1768_v9  ;;  %v1637_v30 = vmul.f32 %v1501_v38, %v3792_v11  ;;  %v1655_v0 = vmul.f32 %v3991_v17, %v1588_v42 }
 0x179   : > { %v486_v19 = vpop.xlane.xlu0 %485  ;;  %v1015_v51 = vmul.f32 0.5, %v1014_v35  ;;  %v799_v52 = vpop.xlane.xlu1 %798  ;;  %v1636_v53 = vmul.f32 %v1491_v45, %v5718_v46  ;;  %vm1028_vm1 = vweird.f32 %v4221_v48  ;;  %vm1029_vm2 = vweird.f32 %v4277_v14 }
 0x17a   : > { %v557_v26 = vmul.f32 %v3684_v27, %v486_v19  ;;  %v870_v39 = vmul.f32 %v799_v52, %v3684_v27  ;;  %2118 = vmatmul.bf16.gmra.mxu3 %v4379_v25  ;;  %v1515_v35 = vmul.f32 0.5, %v1514_v21  ;;  %v1027_v11 = vmul.f32 %v4277_v14, %v1026_v36  ;;  %vm4415_vm5 = vmor %vm1028_vm1, %vm1029_vm2  ;;  %v5724_v36 = vld [vmem:[#allocation16_spill] sm:$0xff] }
 0x17b   : > { %v1016_v2 = vsub.f32 1.5, %v1015_v51  ;;  %vm1038_vm3 = vweird.f32 %v4329_v23  ;;  %v1722_v51 = vadd.f32 %v4025_v12, %v1655_v0  ;;  %v1703_v33 = vmul.f32 %v3991_v17, %v1636_v53 }
 0x17c   : > { %v4369_v28 = vsub.f32 %v3840_v5, %v557_v26  ;;  %v934_v10 = vadd.f32 1e-05, %v870_v39  ;;  %v3153_v58 = vpop.eup %3152  ;;  %v1516_v47 = vsub.f32 1.5, %v1515_v35  ;;  %v1704_v26 = vmul.f32 %v3991_v17, %v1637_v30  ;;  %v5726_v35 = vld [vmem:[#allocation20_spill] sm:$0xff] }
 0x17d   : > { %v1017_v5 = vmul.f32 %v4304_v41, %v1016_v2  ;;  %v1033_v3 = vmul.f32 %v3153_v58, %v4329_v23  ;;  %vm1039_vm4 = vweird.f32 %v3153_v58  ;;  %v4424_v23 = vld [vmem:[%s3601_s28 + $0xb0] sm:$0xff]  ;;  %vm1518_vm7 = vweird.f32 %v4257_v7 }
 0x17e   : > { %v685_v8 = vmul.f32 %v4369_v28, %v4369_v28  ;;  %3154 = vrsqrt.f32 %v934_v10  ;;  %vm4419_vm6 = vmor %vm1038_vm3, %vm1039_vm4  ;;  %vm1519_vm8 = vweird.f32 %v4312_v62  ;;  %v1031_v2 = vsel %vm4415_vm5, %v4277_v14, %v1027_v11  ;;  %v5725_v7 = vld [vmem:[#allocation17_spill] sm:$0xff] }
 0x17f   : > { %v1021_v43 = vsel %vm4374_vm0, %v4304_v41, %v1017_v5  ;;  %v1034_v22 = vmul.f32 %v3153_v58, %v1033_v3  ;;  %401 = vadd.xlane.f32.xlu0 %v4392_v6  ;;  %v1517_v42 = vmul.f32 %v4312_v62, %v1516_v47  ;;  %v1771_v16 = vadd.f32 %v4025_v12, %v1704_v26  ;;  %vm1520_vm11 = vmor %vm1518_vm7, %vm1519_vm8  ;;  %v5723_v5 = vld [vmem:[#allocation19_spill] sm:$0xff] }
 0x180   : > { %812 = vadd.xlane.f32.xlu1 %v685_v8  ;;  %v1589_v56 = vmul.f32 %v1021_v43, %v5717_v61  ;;  %399 = vadd.xlane.f32.xlu2 %v4386_v44  ;;  %vm1508_vm9 = vweird.f32 %v934_v10  ;;  %v1770_v8 = vadd.f32 %v4025_v12, %v1703_v33  ;;  %v1590_v43 = vmul.f32 %v1031_v2, %v5724_v36 }
 0x181   : > { %v1035_v13 = vmul.f32 0.5, %v1034_v22  ;;  %v707_v47 = vpop.xlane.xlu1 %706 }
 0x182   : > { %v1656_v41 = vmul.f32 %v3991_v17, %v1589_v56  ;;  %v4442_v3 = vpack.c.bf16 %v1771_v16, %v1770_v8  ;;  %v1657_v22 = vmul.f32 %v3991_v17, %v1590_v43 }
 0x183   : > { %v1036_v59 = vsub.f32 1.5, %v1035_v13 }
 0x184   : > { %v3155_v19 = vpop.eup %3154  ;;  %v1723_v52 = vadd.f32 %v4025_v12, %v1656_v41  ;;  %v1724_v41 = vadd.f32 %v4025_v12, %v1657_v22 }
 0x185   : > { %v1503_v9 = vmul.f32 %v3155_v19, %v934_v10  ;;  %v1037_v60 = vmul.f32 %v3153_v58, %v1036_v59  ;;  %vm1509_vm10 = vweird.f32 %v3155_v19 }
 0x186   : > { %v1783_v39 = vpack.c.bf16 %v1723_v52, %v1722_v51  ;;  %vm1510_vm12 = vmor %vm1508_vm9, %vm1509_vm10  ;;  %v824_v52 = vmul.f32 %v707_v47, %v3684_v27 }
 0x187   : > { %v1504_v50 = vmul.f32 %v3155_v19, %v1503_v9  ;;  %v1041_v21 = vsel %vm4419_vm6, %v3153_v58, %v1037_v60  ;;  %403 = vadd.xlane.f32.xlu0 %v4424_v23  ;;  %v1521_v58 = vsel %vm1520_vm11, %v4312_v62, %v1517_v42 }
 0x188   : > { %2003 = vmatmul.bf16.gmra.mxu0 %v1783_v39  ;;  %2172 = vmatmul.bf16.gmra.mxu1 %v1783_v39  ;;  %v1591_v14 = vmul.f32 %v1041_v21, %v5723_v5  ;;  %v1639_v56 = vmul.f32 %v1521_v58, %v5725_v7  ;;  %v888_v26 = vadd.f32 1e-05, %v824_v52 }
 0x189   : > { %v1505_v38 = vmul.f32 0.5, %v1504_v50  ;;  %2341 = vmatmul.bf16.gmra.mxu2 %v1783_v39 }
 0x18a   : > { %2123 = vmatmul.bf16.gmra.mxu3 %v4442_v3  ;;  %v1658_v30 = vmul.f32 %v3991_v17, %v1591_v14  ;;  %v1706_v62 = vmul.f32 %v3991_v17, %v1639_v56  ;;  %3156 = vrsqrt.f32 %v888_v26  ;;  %vm1048_vm13 = vweird.f32 %v888_v26 }
 0x18b   : > { %v1506_v45 = vsub.f32 1.5, %v1505_v38 }
 0x18c   : > { %v1725_v46 = vadd.f32 %v4025_v12, %v1658_v30 }
 0x18d   : > { %v1507_v10 = vmul.f32 %v3155_v19, %v1506_v45 }
 0x18e   : > { %v1784_v11 = vpack.c.bf16 %v1725_v46, %v1724_v41  ;;  %v5729_v41 = vld [vmem:[#allocation21_spill] sm:$0xff] }
 0x18f   : > { %v1511_v61 = vsel %vm1510_vm12, %v3155_v19, %v1507_v10  ;;  %v1773_v19 = vadd.f32 %v4025_v12, %v1706_v62 }
 0x190   : > { %v1638_v0 = vmul.f32 %v1511_v61, %v5726_v35  ;;  %v3157_v48 = vpop.eup %3156 }
 0x191   : > { %v1043_v59 = vmul.f32 %v3157_v48, %v888_v26  ;;  %vm1049_vm14 = vweird.f32 %v3157_v48 }
 0x192   : > { %v1705_v53 = vmul.f32 %v3991_v17, %v1638_v0  ;;  %vm4463_vm15 = vmor %vm1048_vm13, %vm1049_vm14 }
 0x193   : > { %v1044_v9 = vmul.f32 %v3157_v48, %v1043_v59 }
 0x194   : > { %v1772_v13 = vadd.f32 %v4025_v12, %v1705_v53 }
 0x195   : > { %v1045_v37 = vmul.f32 0.5, %v1044_v9 }
 0x196   : > { %v4456_v51 = vpack.c.bf16 %v1773_v19, %v1772_v13 }
 0x197   : > { %v1046_v42 = vsub.f32 1.5, %v1045_v37 }
 0x198   : > { %2008 = vmatmul.bf16.gmra.mxu0 %v1784_v11  ;;  %2177 = vmatmul.bf16.gmra.mxu1 %v1784_v11 }
 0x199   : > { %2346 = vmatmul.bf16.gmra.mxu2 %v1784_v11  ;;  %v1047_v5 = vmul.f32 %v3157_v48, %v1046_v42 }
 0x19a   : > { %2128 = vmatmul.bf16.gmra.mxu3 %v4456_v51 }
 0x19b   : > { %v1051_v7 = vsel %vm4463_vm15, %v3157_v48, %v1047_v5 }
 0x19c   : > { %v1592_v62 = vmul.f32 %v1051_v7, %v5729_v41 }
 0x1b3   : > { %v803_v39 = vpop.xlane.xlu0 %802 }
 0x1b4   : > { %v709_v33 = vpop.xlane.xlu2 %708  ;;  %v872_v60 = vmul.f32 %v803_v39, %v3684_v27 }
 0x1b5   : > { %v825_v50 = vmul.f32 %v709_v33, %v3684_v27 }
 0x1b6   : > { %v936_v2 = vadd.f32 1e-05, %v872_v60 }
 0x1b7   : > { %v889_v16 = vadd.f32 1e-05, %v825_v50  ;;  %v1844_v50 = vld [vmem:[%s5665_s4] sm:$0x7] }
 0x1b8   : > { %3158 = vrsqrt.f32 %v936_v2  ;;  %vm1528_vm0 = vweird.f32 %v936_v2 }
 0x1b9   : > { %3160 = vrsqrt.f32 %v889_v16  ;;  %vm1058_vm4 = vweird.f32 %v889_v16 }
 0x1ba   : > { %v805_v21 = vpop.xlane.xlu1 %804 }
 0x1bb   : > { %v873_v38 = vmul.f32 %v805_v21, %v3684_v27  ;;  %v394_v14 = vpop.xlane.xlu0 %393 }
 0x1bc   : > { %v392_v36 = vpop.xlane.xlu2 %391  ;;  %v511_v43 = vmul.f32 %v3684_v27, %v394_v14 }
 0x1bd   : > { %v937_v45 = vadd.f32 1e-05, %v873_v38  ;;  %v510_v58 = vmul.f32 %v3684_v27, %v392_v36  ;;  %v4498_v38 = vld [vmem:[%s3601_s28 + $0xb8] sm:$0xff] }
 0x1be   : > { %v3159_v10 = vpop.eup %3158  ;;  %v4470_v30 = vsub.f32 %v4022_v29, %v511_v43 }
 0x1bf   : > { %3162 = vrsqrt.f32 %v937_v45  ;;  %v3161_v61 = vpop.eup %3160  ;;  %v1523_v56 = vmul.f32 %v3159_v10, %v936_v2  ;;  %v4475_v35 = vsub.f32 %v4030_v55, %v510_v58  ;;  %vm1529_vm1 = vweird.f32 %v3159_v10 }
 0x1c0   : > { %v1053_v0 = vmul.f32 %v3161_v61, %v889_v16  ;;  %v639_v22 = vmul.f32 %v4470_v30, %v4470_v30  ;;  %vm1059_vm2 = vweird.f32 %v3161_v61  ;;  %vm4485_vm3 = vmor %vm1528_vm0, %vm1529_vm1  ;;  %v1659_v2 = vmul.f32 %v3991_v17, %v1592_v62 }
 0x1c1   : > { %v1524_v46 = vmul.f32 %v3159_v10, %v1523_v56  ;;  %v638_v53 = vmul.f32 %v4475_v35, %v4475_v35  ;;  %vm1538_vm5 = vweird.f32 %v937_v45  ;;  %vm1060_vm6 = vmor %vm1058_vm4, %vm1059_vm2  ;;  %v4504_v58 = vperm.slane %v1844_v50, 0 }
 0x1c2   : > { %v1054_v29 = vmul.f32 %v3161_v61, %v1053_v0  ;;  %720 = vadd.xlane.f32.xlu2 %v639_v22  ;;  %v4506_v16 = vperm.slane %v1844_v50, 1 }
 0x1c3   : > { %v711_v11 = vpop.xlane.xlu1 %710  ;;  %v1525_v13 = vmul.f32 0.5, %v1524_v46  ;;  %718 = vadd.xlane.f32.xlu1 %v638_v53 }
 0x1c4   : > { %v826_v55 = vmul.f32 %v711_v11, %v3684_v27  ;;  %v1055_v47 = vmul.f32 0.5, %v1054_v29  ;;  %v1726_v11 = vadd.f32 %v4025_v12, %v1659_v2 }
 0x1c5   : > { %v3163_v19 = vpop.eup %3162  ;;  %v807_v52 = vpop.xlane.xlu0 %806  ;;  %v1526_v26 = vsub.f32 1.5, %v1525_v13 }
 0x1c6   : > { %v1533_v48 = vmul.f32 %v3163_v19, %v937_v45  ;;  %v4483_v59 = vadd.f32 1e-05, %v826_v55  ;;  %v1056_v9 = vsub.f32 1.5, %v1055_v47  ;;  %v874_v39 = vmul.f32 %v807_v52, %v3684_v27 }
 0x1c7   : > { %v1527_v33 = vmul.f32 %v3159_v10, %v1526_v26  ;;  %vm1539_vm7 = vweird.f32 %v3163_v19  ;;  %v4534_v52 = vperm.slane %v1844_v50, 2 }
 0x1c8   : > { %v1534_v60 = vmul.f32 %v3163_v19, %v1533_v48  ;;  %3164 = vrsqrt.f32 %v4483_v59  ;;  %v1057_v42 = vmul.f32 %v3161_v61, %v1056_v9  ;;  %v4495_v21 = vadd.f32 1e-05, %v874_v39  ;;  %vm4515_vm8 = vmor %vm1538_vm5, %vm1539_vm7  ;;  %v4541_v39 = vld [vmem:[%s3601_s28 + $0xc0] sm:$0xff] }
 0x1c9   : > { %v1531_v14 = vsel %vm4485_vm3, %v3159_v10, %v1527_v33  ;;  %vm1068_vm9 = vweird.f32 %v4483_v59 }
 0x1ca   : > { %v713_v5 = vpop.xlane.xlu2 %712  ;;  %v1535_v8 = vmul.f32 0.5, %v1534_v60  ;;  %v1061_v43 = vsel %vm1060_vm6, %v3161_v61, %v1057_v42  ;;  %3166 = vrsqrt.f32 %v4495_v21  ;;  %v1640_v10 = vmul.f32 %v1531_v14, %v3941_v20 }
 0x1cb   : > { %v827_v36 = vmul.f32 %v713_v5, %v3684_v27  ;;  %v1593_v7 = vmul.f32 %v1061_v43, %v3949_v40  ;;  %405 = vadd.xlane.f32.xlu1 %v4498_v38  ;;  %vm1548_vm15 = vweird.f32 %v4495_v21 }
 0x1cc   : > { %v1536_v56 = vsub.f32 1.5, %v1535_v8 }
 0x1cd   : > { %v4510_v0 = vadd.f32 1e-05, %v827_v36  ;;  %v398_v61 = vpop.xlane.xlu0 %397  ;;  %v1989_v46 = vpop.f32.mrf.mxu0  ;;  %v1660_v47 = vmul.f32 %v3991_v17, %v1593_v7 }
 0x1ce   : > { %v4519_v53 = vpop.eup %3164  ;;  %v1537_v41 = vmul.f32 %v3163_v19, %v1536_v56  ;;  %v513_v40 = vmul.f32 %v3684_v27, %v398_v61  ;;  %v2158_v62 = vpop.f32.mrf.mxu1  ;;  %v1990_v20 = vadd.f32 %v1989_v46, %v4504_v58 }
 0x1cf   : > { %3168 = vrsqrt.f32 %v4510_v0  ;;  %v1063_v29 = vmul.f32 %v4519_v53, %v4483_v59  ;;  %v2159_v45 = vadd.f32 %v2158_v62, %v4506_v16  ;;  %v1727_v60 = vadd.f32 %v4025_v12, %v1660_v47 }
 0x1d0   : > { %v1541_v13 = vsel %vm4515_vm8, %v3163_v19, %v1537_v41  ;;  %v4531_v55 = vsub.f32 %v4151_v34, %v513_v40  ;;  %v4536_v26 = vpop.eup %3166  ;;  %v1707_v19 = vmul.f32 %v3991_v17, %v1640_v10  ;;  %vm1069_vm10 = vweird.f32 %v4519_v53 }
 0x1d1   : > { %v1641_v48 = vmul.f32 %v1541_v13, %v3987_v54  ;;  %v1064_v9 = vmul.f32 %v4519_v53, %v1063_v29  ;;  %v2487_v37 = vpack.c.bf16 %v2159_v45, %v1990_v20  ;;  %v1543_v34 = vmul.f32 %v4536_v26, %v4495_v21  ;;  %vm4566_vm11 = vmor %vm1068_vm9, %vm1069_vm10 }
 0x1d2   : > { %v396_v33 = vpop.xlane.xlu2 %395  ;;  %v641_v50 = vmul.f32 %v4531_v55, %v4531_v55  ;;  %v1785_v14 = vpack.c.bf16 %v1727_v60, %v1726_v11  ;;  %v1774_v10 = vadd.f32 %v4025_v12, %v1707_v19  ;;  %vm1078_vm12 = vweird.f32 %v4510_v0 }
 0x1d3   : > { %v1065_v2 = vmul.f32 0.5, %v1064_v9  ;;  %2615 = vst [vmem:[%s4553_s16] sm:$0xff] %v2487_v37  ;;  %v512_v54 = vmul.f32 %v3684_v27, %v396_v33  ;;  %v1708_v42 = vmul.f32 %v3991_v17, %v1641_v48  ;;  %407 = vadd.xlane.f32.xlu1 %v4541_v39  ;;  %v1544_v36 = vmul.f32 %v4536_v26, %v1543_v34  ;;  %v4614_v17 = vld [vmem:[#allocation7] ss:$0 sm:$0xff] }
 0x1d4   : > { %724 = vadd.xlane.f32.xlu0 %v641_v50  ;;  %2013 = vmatmul.bf16.gmra.mxu0 %v1785_v14  ;;  %vm1549_vm0 = vweird.f32 %v4536_v26 }
 0x1d5   : > { %v3169_v5 = vpop.eup %3168  ;;  %v1066_v8 = vsub.f32 1.5, %v1065_v2  ;;  %v2327_v7 = vpop.f32.mrf.mxu2  ;;  %2182 = vmatmul.bf16.gmra.mxu1 %v1785_v14  ;;  %v4572_v61 = vsub.f32 %v4172_v32, %v512_v54  ;;  %2351 = vmatmul.bf16.gmra.mxu2 %v1785_v14  ;;  %v1775_v29 = vadd.f32 %v4025_v12, %v1708_v42  ;;  %v1545_v48 = vmul.f32 0.5, %v1544_v36  ;;  %vm4609_vm1 = vmor %vm1548_vm15, %vm1549_vm0 }
 0x1d6   : > { %v1073_v43 = vmul.f32 %v3169_v5, %v4510_v0  ;;  %v1991_v56 = vpop.f32.mrf.mxu0  ;;  %v2328_v22 = vadd.f32 %v2327_v7, %v4534_v52  ;;  %v2160_v41 = vpop.f32.mrf.mxu1  ;;  %vm1079_vm13 = vweird.f32 %v3169_v5 }
 0x1d7   : > { %v1992_v46 = vadd.f32 %v1991_v56, %v4504_v58  ;;  %v1067_v40 = vmul.f32 %v4519_v53, %v1066_v8  ;;  %v2161_v59 = vadd.f32 %v2160_v41, %v4506_v16  ;;  %v640_v32 = vmul.f32 %v4572_v61, %v4572_v61  ;;  %vm1080_vm14 = vmor %vm1078_vm12, %vm1079_vm13 }
 0x1d8   : > { %v1074_v62 = vmul.f32 %v3169_v5, %v1073_v43  ;;  %v2488_v20 = vpack.c.bf16 %v2328_v22, %v2328_v22  ;;  %v4584_v47 = vpack.c.bf16 %v1775_v29, %v1774_v10  ;;  %v1546_v50 = vsub.f32 1.5, %v1545_v48  ;;  %v4600_v43 = vld [vmem:[#allocation5] ss:$0 sm:$0xff] }
 0x1d9   : > { %v1071_v45 = vsel %vm4566_vm11, %v4519_v53, %v1067_v40  ;;  %v2489_v13 = vpack.c.bf16 %v2161_v59, %v1992_v46  ;;  %722 = vadd.xlane.f32.xlu2 %v640_v32 }
 0x1da   : > { %v1075_v11 = vmul.f32 0.5, %v1074_v62  ;;  %2616 = vst [vmem:[%s4553_s16 + $0x8] sm:$0xf] %v2488_v20  ;;  %2133 = vmatmul.bf16.gmra.mxu3 %v4584_v47  ;;  %v1594_v12 = vmul.f32 %v1071_v45, %v4052_v57  ;;  %v4596_v57 = vld [vmem:[%s3601_s28 + $0xc8] sm:$0xff] }
 0x1db   : > { %2617 = vst [vmem:[%s4553_s16 + $0xc] sm:$0xff] %v2489_v13  ;;  %v809_v37 = vpop.xlane.xlu1 %808  ;;  %v4625_v13 = vld [vmem:[%s3601_s28 + $0xd0] sm:$0xff] }
 0x1dc   : > { %v1076_v9 = vsub.f32 1.5, %v1075_v11  ;;  %v875_v53 = vmul.f32 %v809_v37, %v3684_v27  ;;  %v1661_v7 = vmul.f32 %v4600_v43, %v1594_v12 }
 0x1dd   : > { %v2329_v19 = vpop.f32.mrf.mxu2 }
 0x1de   : > { %v1077_v33 = vmul.f32 %v3169_v5, %v1076_v9  ;;  %v2330_v34 = vadd.f32 %v2329_v19, %v4534_v52  ;;  %v1994_v60 = vpop.f32.mrf.mxu0  ;;  %v939_v54 = vadd.f32 1e-05, %v875_v53  ;;  %v2163_v14 = vpop.f32.mrf.mxu1  ;;  %v1728_v21 = vadd.f32 %v4614_v17, %v1661_v7 }
 0x1df   : > { %v1995_v42 = vadd.f32 %v1994_v60, %v4504_v58  ;;  %v2164_v36 = vadd.f32 %v2163_v14, %v4506_v16 }
 0x1e0   : > { %v1081_v2 = vsel %vm1080_vm14, %v3169_v5, %v1077_v33  ;;  %v2490_v8 = vpack.c.bf16 %v2330_v34, %v2330_v34  ;;  %3170 = vrsqrt.f32 %v939_v54  ;;  %vm1558_vm2 = vweird.f32 %v939_v54 }
 0x1e1   : > { %v1595_v0 = vmul.f32 %v1081_v2, %v4117_v15  ;;  %v2491_v5 = vpack.c.bf16 %v2164_v36, %v1995_v42  ;;  %409 = vadd.xlane.f32.xlu2 %v4596_v57  ;;  %v1547_v15 = vmul.f32 %v4536_v26, %v1546_v50 }
 0x1e2   : > { %2618 = vst [vmem:[%s4553_s16 + $0x14] sm:$0xf] %v2490_v8 }
 0x1e3   : > { %v1662_v56 = vmul.f32 %v4600_v43, %v1595_v0  ;;  %2619 = vst [vmem:[%s4553_s16 + $0x18] sm:$0xff] %v2491_v5  ;;  %v715_v40 = vpop.xlane.xlu1 %714  ;;  %v1551_v20 = vsel %vm4609_vm1, %v4536_v26, %v1547_v15 }
 0x1e4   : > { %v828_v32 = vmul.f32 %v715_v40, %v3684_v27  ;;  %v1642_v19 = vmul.f32 %v1551_v20, %v4055_v4 }
 0x1e5   : > { %v1729_v22 = vadd.f32 %v4614_v17, %v1662_v56  ;;  %v2332_v46 = vpop.f32.mrf.mxu2 }
 0x1e6   : > { %v2333_v41 = vadd.f32 %v2332_v46, %v4534_v52  ;;  %v1996_v62 = vpop.f32.mrf.mxu0  ;;  %v3171_v29 = vpop.eup %3170  ;;  %v4628_v37 = vadd.f32 1e-05, %v828_v32 }
 0x1e7   : > { %v1786_v59 = vpack.c.bf16 %v1729_v22, %v1728_v21  ;;  %v1997_v45 = vadd.f32 %v1996_v62, %v4504_v58  ;;  %v2165_v11 = vpop.f32.mrf.mxu1  ;;  %v1553_v48 = vmul.f32 %v3171_v29, %v939_v54  ;;  %vm1559_vm3 = vweird.f32 %v3171_v29 }
 0x1e8   : > { %v2492_v9 = vpack.c.bf16 %v2333_v41, %v2333_v41  ;;  %v2166_v12 = vadd.f32 %v2165_v11, %v4506_v16  ;;  %3172 = vrsqrt.f32 %v4628_v37  ;;  %vm1560_vm4 = vmor %vm1558_vm2, %vm1559_vm3  ;;  %v1709_v54 = vmul.f32 %v4600_v43, %v1642_v19 }
 0x1e9   : > { %2018 = vmatmul.bf16.gmra.mxu0 %v1786_v59  ;;  %2187 = vmatmul.bf16.gmra.mxu1 %v1786_v59  ;;  %v1554_v33 = vmul.f32 %v3171_v29, %v1553_v48  ;;  %vm1088_vm5 = vweird.f32 %v4628_v37 }
 0x1ea   : > { %2356 = vmatmul.bf16.gmra.mxu2 %v1786_v59  ;;  %2620 = vst [vmem:[%s4553_s16 + $0x20] sm:$0xf] %v2492_v9  ;;  %v2493_v26 = vpack.c.bf16 %v2166_v12, %v1997_v45  ;;  %411 = vadd.xlane.f32.xlu2 %v4625_v13  ;;  %v811_v60 = vpop.xlane.xlu0 %810  ;;  %v1776_v11 = vadd.f32 %v4614_v17, %v1709_v54 }
 0x1eb   : > { %v717_v53 = vpop.xlane.xlu2 %716  ;;  %v1555_v50 = vmul.f32 0.5, %v1554_v33  ;;  %v876_v2 = vmul.f32 %v811_v60, %v3684_v27 }
 0x1ec   : > { %v829_v34 = vmul.f32 %v717_v53, %v3684_v27  ;;  %2621 = vst [vmem:[%s4553_s16 + $0x24] sm:$0xff] %v2493_v26 }
 0x1ed   : > { %v2334_v14 = vpop.f32.mrf.mxu2  ;;  %v1556_v0 = vsub.f32 1.5, %v1555_v50  ;;  %v4640_v36 = vadd.f32 1e-05, %v876_v2 }
 0x1ee   : > { %v4637_v42 = vadd.f32 1e-05, %v829_v34  ;;  %v2335_v8 = vadd.f32 %v2334_v14, %v4534_v52  ;;  %v3173_v5 = vpop.eup %3172  ;;  %v1999_v56 = vpop.f32.mrf.mxu0 }
 0x1ef   : > { %v1557_v4 = vmul.f32 %v3171_v29, %v1556_v0  ;;  %v2168_v15 = vpop.f32.mrf.mxu1  ;;  %v1083_v21 = vmul.f32 %v3173_v5, %v4628_v37  ;;  %v2000_v22 = vadd.f32 %v1999_v56, %v4504_v58  ;;  %vm1089_vm6 = vweird.f32 %v3173_v5 }
 0x1f0   : > { %3174 = vrsqrt.f32 %v4637_v42  ;;  %v2494_v7 = vpack.c.bf16 %v2335_v8, %v2335_v8  ;;  %v2169_v62 = vadd.f32 %v2168_v15, %v4506_v16  ;;  %vm1098_vm7 = vweird.f32 %v4637_v42  ;;  %vm4678_vm9 = vmor %vm1088_vm5, %vm1089_vm6 }
 0x1f1   : > { %3176 = vrsqrt.f32 %v4640_v36  ;;  %v1561_v10 = vsel %vm1560_vm4, %v3171_v29, %v1557_v4  ;;  %v1084_v45 = vmul.f32 %v3173_v5, %v1083_v21  ;;  %vm1568_vm8 = vweird.f32 %v4640_v36 }
 0x1f2   : > { %2622 = vst [vmem:[%s4553_s16 + $0x2c] sm:$0xf] %v2494_v7  ;;  %v1643_v40 = vmul.f32 %v1561_v10, %v4219_v18  ;;  %v402_v32 = vpop.xlane.xlu0 %401  ;;  %v2495_v9 = vpack.c.bf16 %v2169_v62, %v2000_v22 }
 0x1f3   : > { %v400_v46 = vpop.xlane.xlu2 %399  ;;  %v813_v41 = vpop.xlane.xlu1 %812  ;;  %v515_v29 = vmul.f32 %v3684_v27, %v402_v32  ;;  %v1085_v53 = vmul.f32 0.5, %v1084_v45 }
 0x1f4   : > { %v514_v59 = vmul.f32 %v3684_v27, %v400_v46  ;;  %v877_v20 = vmul.f32 %v813_v41, %v3684_v27  ;;  %v1710_v33 = vmul.f32 %v4600_v43, %v1643_v40  ;;  %2623 = vst [vmem:[%s4553_s16 + $0x30] sm:$0xff] %v2495_v9 }
 0x1f5   : > { %v4665_v34 = vsub.f32 %v4392_v6, %v515_v29  ;;  %v2337_v2 = vpop.f32.mrf.mxu2 }
 0x1f6   : > { %v3175_v48 = vpop.eup %3174  ;;  %v4656_v12 = vsub.f32 %v4386_v44, %v514_v59  ;;  %v4658_v18 = vadd.f32 1e-05, %v877_v20  ;;  %v1086_v44 = vsub.f32 1.5, %v1085_v53  ;;  %v1777_v14 = vadd.f32 %v4614_v17, %v1710_v33  ;;  %v2001_v7 = vpop.f32.mrf.mxu0  ;;  %v4715_v53 = vld [vmem:[%s3601_s28 + $0xd8] sm:$0xff] }
 0x1f7   : > { %v4661_v26 = vpop.eup %3176  ;;  %v1093_v19 = vmul.f32 %v3175_v48, %v4637_v42  ;;  %vm1099_vm10 = vweird.f32 %v3175_v48  ;;  %v2338_v4 = vadd.f32 %v2337_v2, %v4534_v52  ;;  %v2170_v54 = vpop.f32.mrf.mxu1  ;;  %v643_v56 = vmul.f32 %v4665_v34, %v4665_v34 }
 0x1f8   : > { %v1563_v60 = vmul.f32 %v4661_v26, %v4640_v36  ;;  %3178 = vrsqrt.f32 %v4658_v18  ;;  %v642_v0 = vmul.f32 %v4656_v12, %v4656_v12  ;;  %v1087_v15 = vmul.f32 %v3173_v5, %v1086_v44  ;;  %vm1100_vm12 = vmor %vm1098_vm7, %vm1099_vm10 }
 0x1f9   : > { %v1094_v50 = vmul.f32 %v3175_v48, %v1093_v19  ;;  %v2002_v21 = vadd.f32 %v2001_v7, %v4504_v58  ;;  %v2171_v37 = vadd.f32 %v2170_v54, %v4506_v16  ;;  %vm1569_vm11 = vweird.f32 %v4661_v26  ;;  %728 = vadd.xlane.f32.xlu1 %v643_v56 }
 0x1fa   : > { %v1564_v8 = vmul.f32 %v4661_v26, %v1563_v60  ;;  %726 = vadd.xlane.f32.xlu0 %v642_v0  ;;  %v2496_v46 = vpack.c.bf16 %v2338_v4, %v2338_v4  ;;  %v4689_v41 = vpack.c.bf16 %v1777_v14, %v1776_v11  ;;  %v404_v40 = vpop.xlane.xlu0 %403  ;;  %v1091_v62 = vsel %vm4678_vm9, %v3173_v5, %v1087_v15  ;;  %vm4704_vm13 = vmor %vm1568_vm8, %vm1569_vm11 }
 0x1fb   : > { %v1095_v10 = vmul.f32 0.5, %v1094_v50  ;;  %v2497_v20 = vpack.c.bf16 %v2171_v37, %v2002_v21  ;;  %v516_v32 = vmul.f32 %v3684_v27, %v404_v40  ;;  %v1596_v29 = vmul.f32 %v1091_v62, %v4288_v31  ;;  %v4735_v37 = vld [vmem:[%s3601_s28 + $0xe0] sm:$0xff] }
 0x1fc   : > { %v1565_v22 = vmul.f32 0.5, %v1564_v8  ;;  %2624 = vst [vmem:[%s4553_s16 + $0x38] sm:$0xf] %v2496_v46  ;;  %2138 = vmatmul.bf16.gmra.mxu3 %v4689_v41  ;;  %vm1578_vm14 = vweird.f32 %v4658_v18 }
 0x1fd   : > { %v1096_v59 = vsub.f32 1.5, %v1095_v10  ;;  %2625 = vst [vmem:[%s4553_s16 + $0x3c] sm:$0xff] %v2497_v20  ;;  %v4711_v31 = vsub.f32 %v4424_v23, %v516_v32  ;;  %v2339_v44 = vpop.f32.mrf.mxu2  ;;  %v1663_v14 = vmul.f32 %v4600_v43, %v1596_v29 }
 0x1fe   : > { %v3179_v45 = vpop.eup %3178  ;;  %v1566_v11 = vsub.f32 1.5, %v1565_v22  ;;  %v2340_v23 = vadd.f32 %v2339_v44, %v4534_v52  ;;  %v4738_v22 = vld [vmem:[%s3601_s28 + $0xe8] sm:$0xff] }
 0x1ff   : > { %v1097_v9 = vmul.f32 %v3175_v48, %v1096_v59  ;;  %v1573_v33 = vmul.f32 %v3179_v45, %v4658_v18  ;;  %v644_v36 = vmul.f32 %v4711_v31, %v4711_v31  ;;  %vm1579_vm15 = vweird.f32 %v3179_v45 }
 0x200   : > { %v1567_v42 = vmul.f32 %v4661_v26, %v1566_v11  ;;  %vm1580_vm0 = vmor %vm1578_vm14, %vm1579_vm15  ;;  %v1730_v54 = vadd.f32 %v4614_v17, %v1663_v14 }
 0x201   : > { %v1101_v19 = vsel %vm1100_vm12, %v3175_v48, %v1097_v9  ;;  %v1574_v60 = vmul.f32 %v3179_v45, %v1573_v33  ;;  %v2498_v48 = vpack.c.bf16 %v2340_v23, %v2340_v23  ;;  %730 = vadd.xlane.f32.xlu1 %v644_v36 }
 0x202   : > { %v1597_v50 = vmul.f32 %v1101_v19, %v4310_v24  ;;  %v1571_v2 = vsel %vm4704_vm13, %v4661_v26, %v1567_v42  ;;  %413 = vadd.xlane.f32.xlu0 %v4715_v53  ;;  %v4753_v19 = vpop.f32.mrf.mxu3 }
 0x203   : > { %v1575_v0 = vmul.f32 0.5, %v1574_v60  ;;  %v1644_v6 = vmul.f32 %v1571_v2, %v4325_v63  ;;  %2626 = vst [vmem:[%s4553_s16 + $0x44] sm:$0xf] %v2498_v48  ;;  %v4757_v60 = vld [vmem:[%s3601_s28 + $0xf0] sm:$0xff] }
 0x204   : > { %v1664_v24 = vmul.f32 %v4600_v43, %v1597_v50 }
 0x205   : > { %v1576_v8 = vsub.f32 1.5, %v1575_v0  ;;  %v2004_v26 = vpop.f32.mrf.mxu0  ;;  %v2173_v4 = vpop.f32.mrf.mxu1  ;;  %v1711_v40 = vmul.f32 %v4600_v43, %v1644_v6 }
 0x206   : > { %v2005_v7 = vadd.f32 %v2004_v26, %v4504_v58  ;;  %v2174_v18 = vadd.f32 %v2173_v4, %v4506_v16  ;;  %v1731_v56 = vadd.f32 %v4614_v17, %v1664_v24 }
 0x207   : > { %v1577_v15 = vmul.f32 %v3179_v45, %v1576_v8  ;;  %v1778_v11 = vadd.f32 %v4614_v17, %v1711_v40 }
 0x208   : > { %v2499_v10 = vpack.c.bf16 %v2174_v18, %v2005_v7  ;;  %v1787_v21 = vpack.c.bf16 %v1731_v56, %v1730_v54 }
 0x209   : > { %v1581_v63 = vsel %vm1580_vm0, %v3179_v45, %v1577_v15  ;;  %417 = vadd.xlane.f32.xlu1 %v4738_v22 }
 0x20a   : > { %v1645_v46 = vmul.f32 %v1581_v63, %v4369_v28  ;;  %2627 = vst [vmem:[%s4553_s16 + $0x48] sm:$0xff] %v2499_v10  ;;  %2023 = vmatmul.bf16.gmra.mxu0 %v1787_v21  ;;  %2192 = vmatmul.bf16.gmra.mxu1 %v1787_v21  ;;  %v4767_v24 = vpop.f32.mrf.mxu3 }
 0x20b   : > { %2361 = vmatmul.bf16.gmra.mxu2 %v1787_v21  ;;  %415 = vadd.xlane.f32.xlu0 %v4735_v37 }
 0x20c   : > { %v2342_v62 = vpop.f32.mrf.mxu2  ;;  %v1712_v59 = vmul.f32 %v4600_v43, %v1645_v46 }
 0x20d   : > { %v2343_v20 = vadd.f32 %v2342_v62, %v4534_v52  ;;  %v2006_v32 = vpop.f32.mrf.mxu0  ;;  %v2175_v28 = vpop.f32.mrf.mxu1 }
 0x20e   : > { %v2007_v45 = vadd.f32 %v2006_v32, %v4504_v58  ;;  %v2176_v29 = vadd.f32 %v2175_v28, %v4506_v16  ;;  %v1779_v9 = vadd.f32 %v4614_v17, %v1712_v59 }
 0x20f   : > { %v2500_v5 = vpack.c.bf16 %v2343_v20, %v2343_v20 }
 0x210   : > { %v2501_v33 = vpack.c.bf16 %v2176_v29, %v2007_v45  ;;  %v4751_v42 = vpack.c.bf16 %v1779_v9, %v1778_v11 }
 0x211   : > { %2628 = vst [vmem:[%s4553_s16 + $0x50] sm:$0xf] %v2500_v5  ;;  %419 = vadd.xlane.f32.xlu1 %v4757_v60 }
 0x212   : > { %2629 = vst [vmem:[%s4553_s16 + $0x54] sm:$0xff] %v2501_v33  ;;  %2143 = vmatmul.bf16.gmra.mxu3 %v4751_v42  ;;  %v4775_v10 = vpop.f32.mrf.mxu3 }
 0x214   : > { %v2344_v44 = vpop.f32.mrf.mxu2 }
 0x215   : > { %v2345_v36 = vadd.f32 %v2344_v44, %v4534_v52  ;;  %v2009_v50 = vpop.f32.mrf.mxu0  ;;  %v2178_v2 = vpop.f32.mrf.mxu1 }
 0x216   : > { %v2010_v23 = vadd.f32 %v2009_v50, %v4504_v58  ;;  %v2179_v14 = vadd.f32 %v2178_v2, %v4506_v16 }
 0x217   : > { %v2502_v0 = vpack.c.bf16 %v2345_v36, %v2345_v36 }
 0x218   : > { %v2503_v48 = vpack.c.bf16 %v2179_v14, %v2010_v23 }
 0x219   : > { %2630 = vst [vmem:[%s4553_s16 + $0x5c] sm:$0xf] %v2502_v0 }
 0x21a   : > { %2631 = vst [vmem:[%s4553_s16 + $0x60] sm:$0xff] %v2503_v48  ;;  %v4779_v46 = vpop.f32.mrf.mxu3 }
 0x21c   : > { %v2347_v6 = vpop.f32.mrf.mxu2 }
 0x21d   : > { %v2348_v8 = vadd.f32 %v2347_v6, %v4534_v52  ;;  %v2011_v26 = vpop.f32.mrf.mxu0  ;;  %v2180_v4 = vpop.f32.mrf.mxu1 }
 0x21e   : > { %v2012_v7 = vadd.f32 %v2011_v26, %v4504_v58  ;;  %v2181_v18 = vadd.f32 %v2180_v4, %v4506_v16 }
 0x21f   : > { %v2504_v54 = vpack.c.bf16 %v2348_v8, %v2348_v8 }
 0x220   : > { %v2505_v56 = vpack.c.bf16 %v2181_v18, %v2012_v7 }
 0x221   : > { %2632 = vst [vmem:[%s4553_s16 + $0x68] sm:$0xf] %v2504_v54 }
 0x222   : > { %2633 = vst [vmem:[%s4553_s16 + $0x6c] sm:$0xff] %v2505_v56  ;;  %2277 = vmatmul.bf16.vlgmr.msrb.gmra.mxu3 %v4080_v49  ;;  %v4782_v40 = vpop.f32.mrf.mxu3 }
 0x224   : > { %v2349_v15 = vpop.f32.mrf.mxu2 }
 0x225   : > { %v2350_v21 = vadd.f32 %v2349_v15, %v4534_v52 }
 0x227   : > { %v2506_v63 = vpack.c.bf16 %v2350_v21, %v2350_v21 }
 0x229   : > { %2634 = vst [vmem:[%s4553_s16 + $0x74] sm:$0xf] %v2506_v63 }
 0x22a   : > { %v4786_v11 = vpop.f32.mrf.mxu3 }
 0x232   : > { %2282 = vmatmul.bf16.gmra.mxu3 %v4187_v1  ;;  %v4797_v18 = vpop.f32.mrf.mxu3 }
 0x235   : > { %v721_v62 = vpop.xlane.xlu2 %720 }
 0x236   : > { %v719_v59 = vpop.xlane.xlu1 %718  ;;  %v831_v20 = vmul.f32 %v721_v62, %v3684_v27 }
 0x237   : > { %v830_v32 = vmul.f32 %v719_v59, %v3684_v27 }
 0x238   : > { %v895_v28 = vadd.f32 1e-05, %v831_v20 }
 0x239   : > { %v894_v45 = vadd.f32 1e-05, %v830_v32 }
 0x23a   : > { %3180 = vrsqrt.f32 %v895_v28  ;;  %vm1118_vm1 = vweird.f32 %v895_v28 }
 0x23b   : > { %3182 = vrsqrt.f32 %v894_v45  ;;  %vm1108_vm5 = vweird.f32 %v894_v45 }
 0x23e   : > { %v406_v29 = vpop.xlane.xlu1 %405 }
 0x23f   : > { %v517_v9 = vmul.f32 %v3684_v27, %v406_v29 }
 0x240   : > { %v3181_v5 = vpop.eup %3180 }
 0x241   : > { %v3183_v33 = vpop.eup %3182  ;;  %v1113_v44 = vmul.f32 %v3181_v5, %v895_v28  ;;  %v4791_v36 = vsub.f32 %v4498_v38, %v517_v9  ;;  %vm1119_vm2 = vweird.f32 %v3181_v5 }
 0x242   : > { %2287 = vmatmul.bf16.gmra.mxu3 %v4379_v25  ;;  %v1103_v50 = vmul.f32 %v3183_v33, %v894_v45  ;;  %vm1109_vm3 = vweird.f32 %v3183_v33  ;;  %vm1120_vm4 = vmor %vm1118_vm1, %vm1119_vm2 }
 0x243   : > { %v1114_v2 = vmul.f32 %v3181_v5, %v1113_v44  ;;  %v645_v23 = vmul.f32 %v4791_v36, %v4791_v36  ;;  %vm1110_vm6 = vmor %vm1108_vm5, %vm1109_vm3 }
 0x244   : > { %v1104_v14 = vmul.f32 %v3183_v33, %v1103_v50 }
 0x245   : > { %v1115_v0 = vmul.f32 0.5, %v1114_v2  ;;  %732 = vadd.xlane.f32.xlu2 %v645_v23  ;;  %v4815_v23 = vpop.f32.mrf.mxu3 }
 0x246   : > { %v1105_v48 = vmul.f32 0.5, %v1104_v14  ;;  %v408_v6 = vpop.xlane.xlu1 %407 }
 0x247   : > { %v725_v8 = vpop.xlane.xlu0 %724  ;;  %v1116_v26 = vsub.f32 1.5, %v1115_v0  ;;  %v518_v4 = vmul.f32 %v3684_v27, %v408_v6 }
 0x248   : > { %v833_v7 = vmul.f32 %v725_v8, %v3684_v27  ;;  %v1106_v38 = vsub.f32 1.5, %v1105_v48 }
 0x249   : > { %v1117_v54 = vmul.f32 %v3181_v5, %v1116_v26  ;;  %v4800_v56 = vsub.f32 %v4541_v39, %v518_v4 }
 0x24a   : > { %v897_v15 = vadd.f32 1e-05, %v833_v7  ;;  %v1107_v21 = vmul.f32 %v3183_v33, %v1106_v38 }
 0x24b   : > { %v1121_v63 = vsel %vm1120_vm4, %v3181_v5, %v1117_v54  ;;  %v646_v62 = vmul.f32 %v4800_v56, %v4800_v56 }
 0x24c   : > { %3184 = vrsqrt.f32 %v897_v15  ;;  %v1111_v59 = vsel %vm1110_vm6, %v3183_v33, %v1107_v21  ;;  %v1599_v20 = vmul.f32 %v1121_v63, %v4470_v30  ;;  %v723_v32 = vpop.xlane.xlu2 %722  ;;  %vm1138_vm7 = vweird.f32 %v897_v15 }
 0x24d   : > { %v1598_v28 = vmul.f32 %v1111_v59, %v4475_v35  ;;  %734 = vadd.xlane.f32.xlu2 %v646_v62  ;;  %v832_v39 = vmul.f32 %v723_v32, %v3684_v27  ;;  %v4813_v35 = vld [vmem:[%s3601_s28 + $0xf8] sm:$0xff] }
 0x24e   : > { %v1666_v29 = vmul.f32 %v4600_v43, %v1599_v20 }
 0x24f   : > { %v896_v9 = vadd.f32 1e-05, %v832_v39  ;;  %v1665_v45 = vmul.f32 %v4600_v43, %v1598_v28 }
 0x250   : > { %v1733_v5 = vadd.f32 %v4614_v17, %v1666_v29 }
 0x251   : > { %3186 = vrsqrt.f32 %v896_v9  ;;  %v1732_v30 = vadd.f32 %v4614_v17, %v1665_v45  ;;  %v2014_v50 = vpop.f32.mrf.mxu0  ;;  %v4833_v45 = vld [vmem:[%s3601_s28 + $0x100] sm:$0xff]  ;;  %vm1128_vm10 = vweird.f32 %v896_v9 }
 0x252   : > { %2292 = vmatmul.bf16.gmra.mxu3 %v4442_v3  ;;  %v3185_v44 = vpop.eup %3184  ;;  %v2183_v2 = vpop.f32.mrf.mxu1  ;;  %v2015_v14 = vadd.f32 %v2014_v50, %v4504_v58 }
 0x253   : > { %v1133_v33 = vmul.f32 %v3185_v44, %v897_v15  ;;  %v2184_v0 = vadd.f32 %v2183_v2, %v4506_v16  ;;  %v1788_v48 = vpack.c.bf16 %v1733_v5, %v1732_v30  ;;  %vm1139_vm8 = vweird.f32 %v3185_v44 }
 0x254   : > { %v410_v8 = vpop.xlane.xlu2 %409  ;;  %vm4825_vm9 = vmor %vm1138_vm7, %vm1139_vm8 }
 0x255   : > { %v1134_v6 = vmul.f32 %v3185_v44, %v1133_v33  ;;  %v2507_v26 = vpack.c.bf16 %v2184_v0, %v2015_v14  ;;  %421 = vadd.xlane.f32.xlu2 %v4813_v35  ;;  %2028 = vmatmul.bf16.gmra.mxu0 %v1788_v48  ;;  %v519_v4 = vmul.f32 %v3684_v27, %v410_v8  ;;  %v4839_v14 = vpop.f32.mrf.mxu3 }
 0x256   : > { %2197 = vmatmul.bf16.gmra.mxu1 %v1788_v48  ;;  %2366 = vmatmul.bf16.gmra.mxu2 %v1788_v48 }
 0x257   : > { %v1135_v7 = vmul.f32 0.5, %v1134_v6  ;;  %v3187_v38 = vpop.eup %3186  ;;  %2635 = vst [vmem:[%s4553_s16 + $0x78] sm:$0xff] %v2507_v26  ;;  %v4823_v54 = vsub.f32 %v4596_v57, %v519_v4 }
 0x258   : > { %v1123_v63 = vmul.f32 %v3187_v38, %v896_v9  ;;  %v2352_v59 = vpop.f32.mrf.mxu2  ;;  %vm1129_vm11 = vweird.f32 %v3187_v38 }
 0x259   : > { %v1136_v21 = vsub.f32 1.5, %v1135_v7  ;;  %v647_v20 = vmul.f32 %v4823_v54, %v4823_v54  ;;  %v2353_v28 = vadd.f32 %v2352_v59, %v4534_v52  ;;  %v2016_v39 = vpop.f32.mrf.mxu0  ;;  %vm1130_vm12 = vmor %vm1128_vm10, %vm1129_vm11 }
 0x25a   : > { %v1124_v32 = vmul.f32 %v3187_v38, %v1123_v63  ;;  %v2185_v29 = vpop.f32.mrf.mxu1  ;;  %v2017_v57 = vadd.f32 %v2016_v39, %v4504_v58 }
 0x25b   : > { %v1137_v15 = vmul.f32 %v3185_v44, %v1136_v21  ;;  %v2186_v5 = vadd.f32 %v2185_v29, %v4506_v16  ;;  %736 = vadd.xlane.f32.xlu0 %v647_v20  ;;  %v2508_v50 = vpack.c.bf16 %v2353_v28, %v2353_v28  ;;  %v4865_v29 = vld [vmem:[%s3601_s28 + $0x108] sm:$0xff] }
 0x25c   : > { %v1125_v33 = vmul.f32 0.5, %v1124_v32 }
 0x25d   : > { %v1141_v30 = vsel %vm4825_vm9, %v3185_v44, %v1137_v15  ;;  %v412_v2 = vpop.xlane.xlu2 %411  ;;  %v2509_v0 = vpack.c.bf16 %v2186_v5, %v2017_v57  ;;  %423 = vadd.xlane.f32.xlu2 %v4833_v45  ;;  %2636 = vst [vmem:[%s4553_s16 + $0x80] sm:$0xf] %v2508_v50 }
 0x25e   : > { %v520_v48 = vmul.f32 %v3684_v27, %v412_v2  ;;  %v1126_v6 = vsub.f32 1.5, %v1125_v33  ;;  %v1601_v8 = vmul.f32 %v1141_v30, %v4531_v55 }
 0x25f   : > { %2637 = vst [vmem:[%s4553_s16 + $0x84] sm:$0xff] %v2509_v0 }
 0x260   : > { %v4848_v44 = vsub.f32 %v4625_v13, %v520_v48  ;;  %v1127_v26 = vmul.f32 %v3187_v38, %v1126_v6  ;;  %v2354_v4 = vpop.f32.mrf.mxu2  ;;  %v1668_v9 = vmul.f32 %v4600_v43, %v1601_v8 }
 0x261   : > { %v2355_v63 = vadd.f32 %v2354_v4, %v4534_v52 }
 0x262   : > { %2297 = vmatmul.bf16.gmra.mxu3 %v4456_v51  ;;  %v648_v7 = vmul.f32 %v4848_v44, %v4848_v44  ;;  %v1131_v21 = vsel %vm1130_vm12, %v3187_v38, %v1127_v26  ;;  %v4860_v38 = vpop.f32.mrf.mxu3 }
 0x263   : > { %v1600_v55 = vmul.f32 %v1131_v21, %v4572_v61  ;;  %v2510_v13 = vpack.c.bf16 %v2355_v63, %v2355_v63  ;;  %v1735_v61 = vadd.f32 %v4614_v17, %v1668_v9  ;;  %v4879_v9 = vld [vmem:[%s3601_s28 + $0x110] sm:$0xff] }
 0x264   : > { %738 = vadd.xlane.f32.xlu0 %v648_v7 }
 0x265   : > { %v1667_v32 = vmul.f32 %v4600_v43, %v1600_v55  ;;  %2638 = vst [vmem:[%s4553_s16 + $0x8c] sm:$0xf] %v2510_v13 }
 0x266   : > { %v2019_v62 = vpop.f32.mrf.mxu0  ;;  %v2188_v59 = vpop.f32.mrf.mxu1 }
 0x267   : > { %v2020_v20 = vadd.f32 %v2019_v62, %v4504_v58  ;;  %v2189_v15 = vadd.f32 %v2188_v59, %v4506_v16  ;;  %v1734_v39 = vadd.f32 %v4614_v17, %v1667_v32 }
 0x269   : > { %v2511_v28 = vpack.c.bf16 %v2189_v15, %v2020_v20  ;;  %v1789_v57 = vpack.c.bf16 %v1735_v61, %v1734_v39 }
 0x26a   : > { %v4874_v7 = vpop.f32.mrf.mxu3 }
 0x26b   : > { %2639 = vst [vmem:[%s4553_s16 + $0x90] sm:$0xff] %v2511_v28  ;;  %2033 = vmatmul.bf16.gmra.mxu0 %v1789_v57  ;;  %2202 = vmatmul.bf16.gmra.mxu1 %v1789_v57 }
 0x26c   : > { %425 = vadd.xlane.f32.xlu0 %v4865_v29  ;;  %2371 = vmatmul.bf16.gmra.mxu2 %v1789_v57  ;;  %v729_v2 = vpop.xlane.xlu1 %728 }
 0x26d   : > { %v2357_v5 = vpop.f32.mrf.mxu2  ;;  %v727_v33 = vpop.xlane.xlu0 %726  ;;  %v835_v26 = vmul.f32 %v729_v2, %v3684_v27 }
 0x26e   : > { %v2358_v30 = vadd.f32 %v2357_v5, %v4534_v52  ;;  %v2021_v50 = vpop.f32.mrf.mxu0  ;;  %v834_v0 = vmul.f32 %v727_v33, %v3684_v27  ;;  %v2190_v6 = vpop.f32.mrf.mxu1 }
 0x26f   : > { %v2022_v48 = vadd.f32 %v2021_v50, %v4504_v58  ;;  %v2191_v4 = vadd.f32 %v2190_v6, %v4506_v16  ;;  %v899_v63 = vadd.f32 1e-05, %v835_v26 }
 0x270   : > { %v2512_v8 = vpack.c.bf16 %v2358_v30, %v2358_v30  ;;  %v898_v21 = vadd.f32 1e-05, %v834_v0 }
 0x271   : > { %v2513_v55 = vpack.c.bf16 %v2191_v4, %v2022_v48  ;;  %vm1158_vm15 = vweird.f32 %v899_v63 }
 0x272   : > { %2640 = vst [vmem:[%s4553_s16 + $0x98] sm:$0xf] %v2512_v8  ;;  %2302 = vmatmul.bf16.gmra.mxu3 %v4584_v47  ;;  %3188 = vrsqrt.f32 %v898_v21  ;;  %v4891_v5 = vpop.f32.mrf.mxu3  ;;  %vm1148_vm13 = vweird.f32 %v898_v21 }
 0x273   : > { %3190 = vrsqrt.f32 %v899_v63  ;;  %2641 = vst [vmem:[%s4553_s16 + $0x9c] sm:$0xff] %v2513_v55 }
 0x274   : > { %427 = vadd.xlane.f32.xlu0 %v4879_v9  ;;  %v4884_v20 = vpop.xlane.xlu1 %730 }
 0x275   : > { %v2359_v13 = vpop.f32.mrf.mxu2  ;;  %v414_v59 = vpop.xlane.xlu0 %413 }
 0x276   : > { %v2360_v62 = vadd.f32 %v2359_v13, %v4534_v52  ;;  %v521_v15 = vmul.f32 %v3684_v27, %v414_v59 }
 0x278   : > { %v2514_v32 = vpack.c.bf16 %v2360_v62, %v2360_v62  ;;  %v3189_v28 = vpop.eup %3188  ;;  %v4888_v39 = vsub.f32 %v4715_v53, %v521_v15 }
 0x279   : > { %v3191_v61 = vpop.eup %3190  ;;  %v1143_v57 = vmul.f32 %v3189_v28, %v898_v21  ;;  %vm1149_vm14 = vweird.f32 %v3189_v28 }
 0x27a   : > { %2642 = vst [vmem:[%s4553_s16 + $0xa4] sm:$0xf] %v2514_v32  ;;  %v1153_v30 = vmul.f32 %v3191_v61, %v899_v63  ;;  %v649_v33 = vmul.f32 %v4888_v39, %v4888_v39  ;;  %vm1159_vm0 = vweird.f32 %v3191_v61  ;;  %vm1150_vm1 = vmor %vm1148_vm13, %vm1149_vm14 }
 0x27b   : > { %v1144_v50 = vmul.f32 %v3189_v28, %v1143_v57  ;;  %vm1160_vm2 = vmor %vm1158_vm15, %vm1159_vm0 }
 0x27c   : > { %v1154_v2 = vmul.f32 %v3191_v61, %v1153_v30  ;;  %740 = vadd.xlane.f32.xlu1 %v649_v33  ;;  %v418_v53 = vpop.xlane.xlu1 %417 }
 0x27d   : > { %v1145_v0 = vmul.f32 0.5, %v1144_v50  ;;  %v523_v4 = vmul.f32 %v3684_v27, %v418_v53 }
 0x27e   : > { %v416_v48 = vpop.xlane.xlu0 %415  ;;  %v1155_v6 = vmul.f32 0.5, %v1154_v2 }
 0x27f   : > { %v522_v8 = vmul.f32 %v3684_v27, %v416_v48  ;;  %v1146_v26 = vsub.f32 1.5, %v1145_v0  ;;  %v4901_v21 = vsub.f32 %v4738_v22, %v523_v4  ;;  %v4904_v59 = vpop.f32.mrf.mxu3 }
 0x280   : > { %v1156_v55 = vsub.f32 1.5, %v1155_v6 }
 0x281   : > { %v4898_v13 = vsub.f32 %v4735_v37, %v522_v8  ;;  %v1147_v62 = vmul.f32 %v3189_v28, %v1146_v26  ;;  %v651_v57 = vmul.f32 %v4901_v21, %v4901_v21  ;;  %v4923_v8 = vld [vmem:[%s3601_s28 + $0x118] sm:$0xff] }
 0x282   : > { %2307 = vmatmul.bf16.gmra.mxu3 %v4689_v41  ;;  %v1157_v63 = vmul.f32 %v3191_v61, %v1156_v55 }
 0x283   : > { %v650_v15 = vmul.f32 %v4898_v13, %v4898_v13  ;;  %v1151_v32 = vsel %vm1150_vm1, %v3189_v28, %v1147_v62  ;;  %744 = vadd.xlane.f32.xlu2 %v651_v57 }
 0x284   : > { %v1161_v30 = vsel %vm1160_vm2, %v3191_v61, %v1157_v63  ;;  %v1602_v37 = vmul.f32 %v1151_v32, %v4656_v12  ;;  %v420_v33 = vpop.xlane.xlu1 %419 }
 0x285   : > { %742 = vadd.xlane.f32.xlu1 %v650_v15  ;;  %v1603_v22 = vmul.f32 %v1161_v30, %v4665_v34  ;;  %v524_v0 = vmul.f32 %v3684_v27, %v420_v33  ;;  %v4936_v30 = vld [vmem:[%s3601_s28 + $0x120] sm:$0xff] }
 0x286   : > { %v1669_v2 = vmul.f32 %v4600_v43, %v1602_v37 }
 0x287   : > { %v2024_v50 = vpop.f32.mrf.mxu0  ;;  %v2193_v48 = vpop.f32.mrf.mxu1  ;;  %v1670_v6 = vmul.f32 %v4600_v43, %v1603_v22  ;;  %v4919_v53 = vsub.f32 %v4757_v60, %v524_v0  ;;  %v4940_v22 = vld [vmem:[%s3601_s28 + $0x128] sm:$0xff] }
 0x288   : > { %v2025_v28 = vadd.f32 %v2024_v50, %v4504_v58  ;;  %v2194_v61 = vadd.f32 %v2193_v48, %v4506_v16  ;;  %v1736_v12 = vadd.f32 %v4614_v17, %v1669_v2  ;;  %v4927_v62 = vpop.f32.mrf.mxu3 }
 0x289   : > { %v1737_v34 = vadd.f32 %v4614_v17, %v1670_v6  ;;  %v652_v4 = vmul.f32 %v4919_v53, %v4919_v53  ;;  %v836_v6 = vmul.f32 %v4884_v20, %v3684_v27 }
 0x28a   : > { %v2515_v26 = vpack.c.bf16 %v2194_v61, %v2025_v28  ;;  %v4950_v28 = vld [vmem:[%s3601_s28 + $0x130] sm:$0xff] }
 0x28b   : > { %v1790_v55 = vpack.c.bf16 %v1737_v34, %v1736_v12  ;;  %746 = vadd.xlane.f32.xlu2 %v652_v4  ;;  %v2110_v12 = vadd.f32 %v4753_v19, %v4504_v58  ;;  %v900_v4 = vadd.f32 1e-05, %v836_v6  ;;  %v2115_v19 = vadd.f32 %v4775_v10, %v4504_v58 }
 0x28c   : > { %2643 = vst [vmem:[%s4553_s16 + $0xa8] sm:$0xff] %v2515_v26 }
 0x28d   : > { %429 = vadd.xlane.f32.xlu1 %v4923_v8  ;;  %2038 = vmatmul.bf16.gmra.mxu0 %v1790_v55  ;;  %3192 = vrsqrt.f32 %v900_v4  ;;  %vm1168_vm3 = vweird.f32 %v900_v4 }
 0x28e   : > { %v2362_v43 = vpop.f32.mrf.mxu2  ;;  %2207 = vmatmul.bf16.gmra.mxu1 %v1790_v55  ;;  %2376 = vmatmul.bf16.gmra.mxu2 %v1790_v55 }
 0x28f   : > { %v2363_v17 = vadd.f32 %v2362_v43, %v4534_v52  ;;  %v2026_v60 = vpop.f32.mrf.mxu0  ;;  %v2195_v15 = vpop.f32.mrf.mxu1  ;;  %v2112_v43 = vadd.f32 %v4767_v24, %v4504_v58 }
 0x290   : > { %v2027_v63 = vadd.f32 %v2026_v60, %v4504_v58  ;;  %v2196_v57 = vadd.f32 %v2195_v15, %v4506_v16 }
 0x291   : > { %v2516_v32 = vpack.c.bf16 %v2363_v17, %v2363_v17 }
 0x292   : > { %2312 = vmatmul.bf16.gmra.mxu3 %v4751_v42  ;;  %v2517_v37 = vpack.c.bf16 %v2196_v57, %v2027_v63 }
 0x293   : > { %2644 = vst [vmem:[%s4553_s16 + $0xb0] sm:$0xf] %v2516_v32  ;;  %433 = vadd.xlane.f32.xlu2 %v4940_v22  ;;  %v3193_v20 = vpop.eup %3192 }
 0x294   : > { %2645 = vst [vmem:[%s4553_s16 + $0xb4] sm:$0xff] %v2517_v37  ;;  %v1163_v63 = vmul.f32 %v3193_v20, %v900_v4  ;;  %vm1169_vm4 = vweird.f32 %v3193_v20 }
 0x295   : > { %431 = vadd.xlane.f32.xlu1 %v4936_v30  ;;  %v4944_v33 = vpop.f32.mrf.mxu3  ;;  %vm1170_vm5 = vmor %vm1168_vm3, %vm1169_vm4 }
 0x296   : > { %v2364_v50 = vpop.f32.mrf.mxu2  ;;  %v1164_v57 = vmul.f32 %v3193_v20, %v1163_v63 }
 0x297   : > { %v2365_v2 = vadd.f32 %v2364_v50, %v4534_v52 }
 0x299   : > { %v2518_v0 = vpack.c.bf16 %v2365_v2, %v2365_v2 }
 0x29b   : > { %2646 = vst [vmem:[%s4553_s16 + $0xbc] sm:$0xf] %v2518_v0  ;;  %435 = vadd.xlane.f32.xlu2 %v4950_v28  ;;  %v1165_v0 = vmul.f32 0.5, %v1164_v57 }
 0x29d   : > { %v4952_v48 = vpop.f32.mrf.mxu3 }
 0x2a2   : > { %2446 = vmatmul.bf16.vlgmr.msra.gmra.mxu3 %v4080_v49 }
 0x2a5   : > { %v2278_v61 = vpop.f32.mrf.mxu3 }
 0x2a6   : > { %v2279_v34 = vadd.f32 %v2278_v61, %v4506_v16  ;;  %v1166_v61 = vsub.f32 1.5, %v1165_v0 }
 0x2a8   : > { %v2583_v26 = vpack.c.bf16 %v2279_v34, %v2110_v12 }
 0x2aa   : > { %2711 = vst [vmem:[%s4553_s16 + $0x240] sm:$0xff] %v2583_v26 }
 0x2ad   : > { %v2280_v55 = vpop.f32.mrf.mxu3 }
 0x2ae   : > { %v2281_v49 = vadd.f32 %v2280_v55, %v4506_v16 }
 0x2b0   : > { %v2585_v17 = vpack.c.bf16 %v2281_v49, %v2112_v43  ;;  %v1167_v49 = vmul.f32 %v3193_v20, %v1166_v61 }
 0x2b2   : > { %2713 = vst [vmem:[%s4553_s16 + $0x24c] sm:$0xff] %v2585_v17  ;;  %2451 = vmatmul.bf16.gmra.mxu3 %v4187_v1  ;;  %v2117_v1 = vadd.f32 %v4779_v46, %v4504_v58  ;;  %v2120_v46 = vadd.f32 %v4782_v40, %v4504_v58  ;;  %v1171_v63 = vsel %vm1170_vm5, %v3193_v20, %v1167_v49 }
 0x2b3   : > { %v2122_v40 = vadd.f32 %v4786_v11, %v4504_v58 }
 0x2b5   : > { %v2283_v60 = vpop.f32.mrf.mxu3 }
 0x2b6   : > { %v2284_v15 = vadd.f32 %v2283_v60, %v4506_v16 }
 0x2b8   : > { %v2587_v32 = vpack.c.bf16 %v2284_v15, %v2115_v19  ;;  %v733_v37 = vpop.xlane.xlu2 %732 }
 0x2b9   : > { %v837_v24 = vmul.f32 %v733_v37, %v3684_v27 }
 0x2ba   : > { %2715 = vst [vmem:[%s4553_s16 + $0x258] sm:$0xff] %v2587_v32 }
 0x2bb   : > { %v901_v50 = vadd.f32 1e-05, %v837_v24  ;;  %v1604_v24 = vmul.f32 %v1171_v63, %v4711_v31 }
 0x2bd   : > { %v2285_v2 = vpop.f32.mrf.mxu3  ;;  %3194 = vrsqrt.f32 %v901_v50  ;;  %vm1178_vm7 = vweird.f32 %v901_v50 }
 0x2be   : > { %v2286_v6 = vadd.f32 %v2285_v2, %v4506_v16 }
 0x2c0   : > { %v2589_v10 = vpack.c.bf16 %v2286_v6, %v2117_v1  ;;  %v735_v12 = vpop.xlane.xlu2 %734 }
 0x2c1   : > { %v838_v34 = vmul.f32 %v735_v12, %v3684_v27 }
 0x2c2   : > { %2717 = vst [vmem:[%s4553_s16 + $0x264] sm:$0xff] %v2589_v10  ;;  %2456 = vmatmul.bf16.gmra.mxu3 %v4379_v25 }
 0x2c3   : > { %v3195_v26 = vpop.eup %3194  ;;  %v4978_v55 = vadd.f32 1e-05, %v838_v34 }
 0x2c4   : > { %v1173_v17 = vmul.f32 %v3195_v26, %v901_v50  ;;  %vm1179_vm6 = vweird.f32 %v3195_v26 }
 0x2c5   : > { %v2288_v43 = vpop.f32.mrf.mxu3  ;;  %3196 = vrsqrt.f32 %v4978_v55  ;;  %vm1180_vm8 = vmor %vm1178_vm7, %vm1179_vm6  ;;  %vm1188_vm10 = vweird.f32 %v4978_v55 }
 0x2c6   : > { %v2289_v60 = vadd.f32 %v2288_v43, %v4506_v16  ;;  %v1174_v25 = vmul.f32 %v3195_v26, %v1173_v17  ;;  %v5004_v43 = vld [vmem:[#allocation5] ss:$0 sm:$0xff] }
 0x2c8   : > { %v2591_v19 = vpack.c.bf16 %v2289_v60, %v2120_v46  ;;  %v1175_v15 = vmul.f32 0.5, %v1174_v25  ;;  %v422_v4 = vpop.xlane.xlu2 %421  ;;  %v1671_v46 = vmul.f32 %v5004_v43, %v1604_v24 }
 0x2c9   : > { %v525_v32 = vmul.f32 %v3684_v27, %v422_v4 }
 0x2ca   : > { %2719 = vst [vmem:[%s4553_s16 + $0x270] sm:$0xff] %v2591_v19  ;;  %v1176_v57 = vsub.f32 1.5, %v1175_v15 }
 0x2cb   : > { %v4986_v37 = vpop.eup %3196  ;;  %v4992_v2 = vsub.f32 %v4813_v35, %v525_v32 }
 0x2cc   : > { %v1177_v20 = vmul.f32 %v3195_v26, %v1176_v57  ;;  %v1183_v0 = vmul.f32 %v4986_v37, %v4978_v55  ;;  %v5017_v57 = vld [vmem:[#allocation7] ss:$0 sm:$0xff]  ;;  %vm1189_vm9 = vweird.f32 %v4986_v37 }
 0x2cd   : > { %v2290_v1 = vpop.f32.mrf.mxu3  ;;  %v653_v10 = vmul.f32 %v4992_v2, %v4992_v2  ;;  %vm5033_vm11 = vmor %vm1188_vm10, %vm1189_vm9 }
 0x2ce   : > { %v2291_v6 = vadd.f32 %v2290_v1, %v4506_v16  ;;  %v1181_v61 = vsel %vm1180_vm8, %v3195_v26, %v1177_v20  ;;  %v1184_v11 = vmul.f32 %v4986_v37, %v1183_v0  ;;  %v737_v12 = vpop.xlane.xlu0 %736 }
 0x2cf   : > { %v1605_v35 = vmul.f32 %v1181_v61, %v4791_v36  ;;  %748 = vadd.xlane.f32.xlu0 %v653_v10  ;;  %v839_v34 = vmul.f32 %v737_v12, %v3684_v27  ;;  %v2125_v36 = vadd.f32 %v4797_v18, %v4504_v58 }
 0x2d0   : > { %v2593_v31 = vpack.c.bf16 %v2291_v6, %v2122_v40  ;;  %v424_v50 = vpop.xlane.xlu2 %423  ;;  %v1185_v49 = vmul.f32 0.5, %v1184_v11  ;;  %v1738_v40 = vadd.f32 %v5017_v57, %v1671_v46 }
 0x2d1   : > { %v526_v26 = vmul.f32 %v3684_v27, %v424_v50  ;;  %v903_v17 = vadd.f32 1e-05, %v839_v34  ;;  %v1672_v60 = vmul.f32 %v5004_v43, %v1605_v35  ;;  %v2127_v50 = vadd.f32 %v4815_v23, %v4504_v58 }
 0x2d2   : > { %2721 = vst [vmem:[%s4553_s16 + $0x27c] sm:$0xff] %v2593_v31  ;;  %2461 = vmatmul.bf16.gmra.mxu3 %v4442_v3  ;;  %v2029_v25 = vpop.f32.mrf.mxu0  ;;  %v1186_v24 = vsub.f32 1.5, %v1185_v49 }
 0x2d3   : > { %v5012_v19 = vsub.f32 %v4833_v45, %v526_v26  ;;  %3198 = vrsqrt.f32 %v903_v17  ;;  %v2030_v3 = vadd.f32 %v2029_v25, %v4504_v58  ;;  %v2198_v63 = vpop.f32.mrf.mxu1  ;;  %v1739_v18 = vadd.f32 %v5017_v57, %v1672_v60 }
 0x2d4   : > { %v2199_v4 = vadd.f32 %v2198_v63, %v4506_v16  ;;  %v1187_v61 = vmul.f32 %v4986_v37, %v1186_v24  ;;  %vm1198_vm12 = vweird.f32 %v903_v17 }
 0x2d5   : > { %v2293_v15 = vpop.f32.mrf.mxu3  ;;  %v654_v45 = vmul.f32 %v5012_v19, %v5012_v19  ;;  %v1791_v0 = vpack.c.bf16 %v1739_v18, %v1738_v40 }
 0x2d6   : > { %v2294_v32 = vadd.f32 %v2293_v15, %v4506_v16  ;;  %v2519_v1 = vpack.c.bf16 %v2199_v4, %v2030_v3  ;;  %v5040_v15 = vld [vmem:[%s3601_s28 + $0x138] sm:$0xff]  ;;  %v1191_v23 = vsel %vm5033_vm11, %v4986_v37, %v1187_v61 }
 0x2d7   : > { %v739_v6 = vpop.xlane.xlu0 %738  ;;  %750 = vadd.xlane.f32.xlu0 %v654_v45  ;;  %2043 = vmatmul.bf16.gmra.mxu0 %v1791_v0  ;;  %v1606_v37 = vmul.f32 %v1191_v23, %v4800_v56 }
 0x2d8   : > { %v2595_v20 = vpack.c.bf16 %v2294_v32, %v2125_v36  ;;  %2647 = vst [vmem:[%s4553_s16 + $0xc0] sm:$0xff] %v2519_v1  ;;  %2212 = vmatmul.bf16.gmra.mxu1 %v1791_v0  ;;  %2381 = vmatmul.bf16.gmra.mxu2 %v1791_v0  ;;  %v840_v31 = vmul.f32 %v739_v6, %v3684_v27 }
 0x2d9   : > { %v3199_v10 = vpop.eup %3198  ;;  %v2367_v11 = vpop.f32.mrf.mxu2 }
 0x2da   : > { %2723 = vst [vmem:[%s4553_s16 + $0x288] sm:$0xff] %v2595_v20  ;;  %v1193_v12 = vmul.f32 %v3199_v10, %v903_v17  ;;  %v2368_v35 = vadd.f32 %v2367_v11, %v4534_v52  ;;  %v2031_v34 = vpop.f32.mrf.mxu0  ;;  %v5045_v55 = vadd.f32 1e-05, %v840_v31  ;;  %vm1199_vm13 = vweird.f32 %v3199_v10 }
 0x2db   : > { %v2032_v46 = vadd.f32 %v2031_v34, %v4504_v58  ;;  %v2200_v49 = vpop.f32.mrf.mxu1  ;;  %vm1200_vm14 = vmor %vm1198_vm12, %vm1199_vm13 }
 0x2dc   : > { %v1194_v25 = vmul.f32 %v3199_v10, %v1193_v12  ;;  %v2520_v36 = vpack.c.bf16 %v2368_v35, %v2368_v35  ;;  %v2201_v3 = vadd.f32 %v2200_v49, %v4506_v16  ;;  %3200 = vrsqrt.f32 %v5045_v55  ;;  %v5065_v12 = vld [vmem:[%s3601_s28 + $0x140] sm:$0xff] }
 0x2dd   : > { %v2295_v26 = vpop.f32.mrf.mxu3  ;;  %v1673_v35 = vmul.f32 %v5004_v43, %v1606_v37  ;;  %vm1208_vm15 = vweird.f32 %v5045_v55 }
 0x2de   : > { %v2296_v63 = vadd.f32 %v2295_v26, %v4506_v16  ;;  %v1195_v4 = vmul.f32 0.5, %v1194_v25  ;;  %2648 = vst [vmem:[%s4553_s16 + $0xc8] sm:$0xf] %v2520_v36  ;;  %v2521_v32 = vpack.c.bf16 %v2201_v3, %v2032_v46 }
 0x2df   : > { %v426_v18 = vpop.xlane.xlu0 %425  ;;  %437 = vadd.xlane.f32.xlu0 %v5040_v15  ;;  %v1740_v25 = vadd.f32 %v5017_v57, %v1673_v35  ;;  %v5099_v35 = vld [vmem:[%s3601_s28 + $0x148] sm:$0xff] }
 0x2e0   : > { %v2597_v40 = vpack.c.bf16 %v2296_v63, %v2127_v50  ;;  %v527_v24 = vmul.f32 %v3684_v27, %v426_v18  ;;  %v1196_v45 = vsub.f32 1.5, %v1195_v4  ;;  %2649 = vst [vmem:[%s4553_s16 + $0xcc] sm:$0xff] %v2521_v32 }
 0x2e1   : > { %v2369_v17 = vpop.f32.mrf.mxu2 }
 0x2e2   : > { %2466 = vmatmul.bf16.gmra.mxu3 %v4456_v51  ;;  %2725 = vst [vmem:[%s4553_s16 + $0x294] sm:$0xff] %v2597_v40  ;;  %v5055_v1 = vsub.f32 %v4865_v29, %v527_v24  ;;  %v1197_v20 = vmul.f32 %v3199_v10, %v1196_v45  ;;  %v2370_v0 = vadd.f32 %v2369_v17, %v4534_v52 }
 0x2e3   : > { %v2130_v51 = vadd.f32 %v4839_v14, %v4504_v58 }
 0x2e4   : > { %v655_v61 = vmul.f32 %v5055_v1, %v5055_v1  ;;  %v1201_v56 = vsel %vm1200_vm14, %v3199_v10, %v1197_v20  ;;  %v2522_v11 = vpack.c.bf16 %v2370_v0, %v2370_v0  ;;  %v5073_v10 = vpop.eup %3200 }
 0x2e5   : > { %v2298_v6 = vpop.f32.mrf.mxu3  ;;  %v1607_v29 = vmul.f32 %v1201_v56, %v4823_v54  ;;  %v1203_v63 = vmul.f32 %v5073_v10, %v5045_v55  ;;  %vm1209_vm0 = vweird.f32 %v5073_v10 }
 0x2e6   : > { %v2299_v31 = vadd.f32 %v2298_v6, %v4506_v16  ;;  %752 = vadd.xlane.f32.xlu1 %v655_v61  ;;  %2650 = vst [vmem:[%s4553_s16 + $0xd4] sm:$0xf] %v2522_v11  ;;  %vm5124_vm1 = vmor %vm1208_vm15, %vm1209_vm0 }
 0x2e7   : > { %v428_v50 = vpop.xlane.xlu0 %427  ;;  %439 = vadd.xlane.f32.xlu0 %v5065_v12  ;;  %v1674_v14 = vmul.f32 %v5004_v43, %v1607_v29  ;;  %v1204_v37 = vmul.f32 %v5073_v10, %v1203_v63 }
 0x2e8   : > { %v2599_v34 = vpack.c.bf16 %v2299_v31, %v2130_v51  ;;  %v528_v46 = vmul.f32 %v3684_v27, %v428_v50  ;;  %v2034_v49 = vpop.f32.mrf.mxu0  ;;  %v2203_v60 = vpop.f32.mrf.mxu1 }
 0x2e9   : > { %v2035_v54 = vadd.f32 %v2034_v49, %v4504_v58  ;;  %v1741_v36 = vadd.f32 %v5017_v57, %v1674_v14  ;;  %v2204_v3 = vadd.f32 %v2203_v60, %v4506_v16  ;;  %v1205_v31 = vmul.f32 0.5, %v1204_v37 }
 0x2ea   : > { %2727 = vst [vmem:[%s4553_s16 + $0x2a0] sm:$0xff] %v2599_v34  ;;  %v5077_v26 = vsub.f32 %v4879_v9, %v528_v46  ;;  %v2132_v9 = vadd.f32 %v4860_v38, %v4504_v58  ;;  %v2135_v34 = vadd.f32 %v4874_v7, %v4504_v58 }
 0x2eb   : > { %v1792_v4 = vpack.c.bf16 %v1741_v36, %v1740_v25  ;;  %v2523_v40 = vpack.c.bf16 %v2204_v3, %v2035_v54  ;;  %v1206_v49 = vsub.f32 1.5, %v1205_v31 }
 0x2ec   : > { %v656_v32 = vmul.f32 %v5077_v26, %v5077_v26 }
 0x2ed   : > { %v2300_v23 = vpop.f32.mrf.mxu3  ;;  %2048 = vmatmul.bf16.gmra.mxu0 %v1792_v4  ;;  %2217 = vmatmul.bf16.gmra.mxu1 %v1792_v4  ;;  %2651 = vst [vmem:[%s4553_s16 + $0xd8] sm:$0xff] %v2523_v40 }
 0x2ee   : > { %v2301_v18 = vadd.f32 %v2300_v23, %v4506_v16  ;;  %2386 = vmatmul.bf16.gmra.mxu2 %v1792_v4  ;;  %754 = vadd.xlane.f32.xlu1 %v656_v32 }
 0x2ef   : > { %v741_v45 = vpop.xlane.xlu1 %740  ;;  %v2372_v17 = vpop.f32.mrf.mxu2 }
 0x2f0   : > { %v2601_v24 = vpack.c.bf16 %v2301_v18, %v2132_v9  ;;  %v841_v20 = vmul.f32 %v741_v45, %v3684_v27  ;;  %v2373_v38 = vadd.f32 %v2372_v17, %v4534_v52  ;;  %v2036_v0 = vpop.f32.mrf.mxu0  ;;  %v2205_v51 = vpop.f32.mrf.mxu1  ;;  %v1207_v9 = vmul.f32 %v5073_v10, %v1206_v49  ;;  %v5120_v18 = vld [vmem:[%s3601_s28 + $0x150] sm:$0xff] }
 0x2f1   : > { %v2037_v61 = vadd.f32 %v2036_v0, %v4504_v58  ;;  %v2206_v11 = vadd.f32 %v2205_v51, %v4506_v16 }
 0x2f2   : > { %2729 = vst [vmem:[%s4553_s16 + $0x2ac] sm:$0xff] %v2601_v24  ;;  %2471 = vmatmul.bf16.gmra.mxu3 %v4584_v47  ;;  %v905_v6 = vadd.f32 1e-05, %v841_v20  ;;  %v2524_v56 = vpack.c.bf16 %v2373_v38, %v2373_v38  ;;  %v2137_v24 = vadd.f32 %v4891_v5, %v4504_v58  ;;  %v1211_v5 = vsel %vm5124_vm1, %v5073_v10, %v1207_v9 }
 0x2f3   : > { %v2525_v50 = vpack.c.bf16 %v2206_v11, %v2037_v61  ;;  %v1608_v31 = vmul.f32 %v1211_v5, %v4848_v44 }
 0x2f4   : > { %3202 = vrsqrt.f32 %v905_v6  ;;  %2652 = vst [vmem:[%s4553_s16 + $0xe0] sm:$0xf] %v2524_v56  ;;  %vm1218_vm2 = vweird.f32 %v905_v6 }
 0x2f5   : > { %v2303_v29 = vpop.f32.mrf.mxu3  ;;  %2653 = vst [vmem:[%s4553_s16 + $0xe4] sm:$0xff] %v2525_v50 }
 0x2f6   : > { %v2304_v47 = vadd.f32 %v2303_v29, %v4506_v16  ;;  %441 = vadd.xlane.f32.xlu1 %v5099_v35  ;;  %v745_v54 = vpop.xlane.xlu2 %744 }
 0x2f7   : > { %v2374_v60 = vpop.f32.mrf.mxu2  ;;  %v843_v36 = vmul.f32 %v745_v54, %v3684_v27 }
 0x2f8   : > { %v2603_v46 = vpack.c.bf16 %v2304_v47, %v2135_v34  ;;  %v743_v14 = vpop.xlane.xlu1 %742  ;;  %v2375_v7 = vadd.f32 %v2374_v60, %v4534_v52 }
 0x2f9   : > { %v842_v25 = vmul.f32 %v743_v14, %v3684_v27  ;;  %v5115_v4 = vadd.f32 1e-05, %v843_v36 }
 0x2fa   : > { %2731 = vst [vmem:[%s4553_s16 + $0x2b8] sm:$0xff] %v2603_v46  ;;  %v3203_v3 = vpop.eup %3202  ;;  %v2526_v32 = vpack.c.bf16 %v2375_v7, %v2375_v7 }
 0x2fb   : > { %v5113_v63 = vadd.f32 1e-05, %v842_v25  ;;  %v1213_v23 = vmul.f32 %v3203_v3, %v905_v6  ;;  %vm1219_vm3 = vweird.f32 %v3203_v3  ;;  %v1675_v25 = vmul.f32 %v5004_v43, %v1608_v31 }
 0x2fc   : > { %2654 = vst [vmem:[%s4553_s16 + $0xec] sm:$0xf] %v2526_v32  ;;  %vm1220_vm4 = vmor %vm1218_vm2, %vm1219_vm3  ;;  %vm1238_vm7 = vweird.f32 %v5115_v4 }
 0x2fd   : > { %3204 = vrsqrt.f32 %v5113_v63  ;;  %v2305_v40 = vpop.f32.mrf.mxu3  ;;  %v1214_v45 = vmul.f32 %v3203_v3, %v1213_v23  ;;  %vm1228_vm5 = vweird.f32 %v5113_v63 }
 0x2fe   : > { %3206 = vrsqrt.f32 %v5115_v4  ;;  %v2306_v37 = vadd.f32 %v2305_v40, %v4506_v16  ;;  %443 = vadd.xlane.f32.xlu1 %v5120_v18  ;;  %v5135_v0 = vpop.xlane.xlu2 %746 }
 0x2ff   : > { %v1215_v17 = vmul.f32 0.5, %v1214_v45 }
 0x300   : > { %v2605_v20 = vpack.c.bf16 %v2306_v37, %v2137_v24  ;;  %v430_v38 = vpop.xlane.xlu1 %429 }
 0x301   : > { %v529_v61 = vmul.f32 %v3684_v27, %v430_v38  ;;  %v1216_v51 = vsub.f32 1.5, %v1215_v17 }
 0x302   : > { %2733 = vst [vmem:[%s4553_s16 + $0x2c4] sm:$0xff] %v2605_v20  ;;  %2476 = vmatmul.bf16.gmra.mxu3 %v4689_v41  ;;  %v2142_v20 = vadd.f32 %v4927_v62, %v4504_v58  ;;  %v5251_v62 = vld [vmem:[%s3601_s28 + $0x170] sm:$0xff] }
 0x303   : > { %v5140_v56 = vpop.eup %3204  ;;  %v5143_v6 = vsub.f32 %v4923_v8, %v529_v61  ;;  %v1217_v29 = vmul.f32 %v3203_v3, %v1216_v51  ;;  %v2140_v8 = vadd.f32 %v4904_v59, %v4504_v58 }
 0x304   : > { %v5145_v11 = vpop.eup %3206  ;;  %v1223_v10 = vmul.f32 %v5140_v56, %v5113_v63  ;;  %vm1229_vm6 = vweird.f32 %v5140_v56 }
 0x305   : > { %v1233_v34 = vmul.f32 %v5145_v11, %v5115_v4  ;;  %v2308_v50 = vpop.f32.mrf.mxu3  ;;  %v657_v41 = vmul.f32 %v5143_v6, %v5143_v6  ;;  %v1221_v47 = vsel %vm1220_vm4, %v3203_v3, %v1217_v29  ;;  %vm1239_vm8 = vweird.f32 %v5145_v11  ;;  %vm5185_vm9 = vmor %vm1228_vm5, %vm1229_vm6 }
 0x306   : > { %v1224_v46 = vmul.f32 %v5140_v56, %v1223_v10  ;;  %v1609_v14 = vmul.f32 %v1221_v47, %v4888_v39  ;;  %v2309_v49 = vadd.f32 %v2308_v50, %v4506_v16  ;;  %v434_v3 = vpop.xlane.xlu2 %433  ;;  %vm5192_vm10 = vmor %vm1238_vm7, %vm1239_vm8  ;;  %v1742_v29 = vadd.f32 %v5017_v57, %v1675_v25 }
 0x307   : > { %v1234_v44 = vmul.f32 %v5145_v11, %v1233_v34  ;;  %756 = vadd.xlane.f32.xlu2 %v657_v41  ;;  %v531_v39 = vmul.f32 %v3684_v27, %v434_v3  ;;  %v5221_v3 = vld [vmem:[%s3601_s28 + $0x158] sm:$0xff] }
 0x308   : > { %v1225_v54 = vmul.f32 0.5, %v1224_v46  ;;  %v432_v60 = vpop.xlane.xlu1 %431  ;;  %v2607_v7 = vpack.c.bf16 %v2309_v49, %v2140_v8  ;;  %v1676_v32 = vmul.f32 %v5004_v43, %v1609_v14 }
 0x309   : > { %v1235_v36 = vmul.f32 0.5, %v1234_v44  ;;  %v530_v23 = vmul.f32 %v3684_v27, %v432_v60  ;;  %v5173_v55 = vsub.f32 %v4940_v22, %v531_v39 }
 0x30a   : > { %v1226_v59 = vsub.f32 1.5, %v1225_v54  ;;  %2735 = vst [vmem:[%s4553_s16 + $0x2d0] sm:$0xff] %v2607_v7  ;;  %v2039_v24 = vpop.f32.mrf.mxu0  ;;  %v1743_v17 = vadd.f32 %v5017_v57, %v1676_v32 }
 0x30b   : > { %v1236_v9 = vsub.f32 1.5, %v1235_v36  ;;  %v5170_v40 = vsub.f32 %v4936_v30, %v530_v23  ;;  %v2040_v45 = vadd.f32 %v2039_v24, %v4504_v58  ;;  %v2208_v37 = vpop.f32.mrf.mxu1  ;;  %v659_v63 = vmul.f32 %v5173_v55, %v5173_v55 }
 0x30c   : > { %v1227_v5 = vmul.f32 %v5140_v56, %v1226_v59  ;;  %v2209_v22 = vadd.f32 %v2208_v37, %v4506_v16  ;;  %v1793_v50 = vpack.c.bf16 %v1743_v17, %v1742_v29  ;;  %v5238_v17 = vld [vmem:[%s3601_s28 + $0x168] sm:$0xff]  ;;  %v844_v29 = vmul.f32 %v5135_v0, %v3684_v27 }
 0x30d   : > { %v1237_v38 = vmul.f32 %v5145_v11, %v1236_v9  ;;  %v2310_v61 = vpop.f32.mrf.mxu3  ;;  %v658_v31 = vmul.f32 %v5170_v40, %v5170_v40  ;;  %760 = vadd.xlane.f32.xlu0 %v659_v63 }
 0x30e   : > { %v2311_v51 = vadd.f32 %v2310_v61, %v4506_v16  ;;  %v2527_v10 = vpack.c.bf16 %v2209_v22, %v2040_v45  ;;  %v1231_v41 = vsel %vm5185_vm9, %v5140_v56, %v1227_v5  ;;  %v436_v47 = vpop.xlane.xlu2 %435  ;;  %2053 = vmatmul.bf16.gmra.mxu0 %v1793_v50  ;;  %2222 = vmatmul.bf16.gmra.mxu1 %v1793_v50 }
 0x30f   : > { %758 = vadd.xlane.f32.xlu2 %v658_v31  ;;  %v1241_v4 = vsel %vm5192_vm10, %v5145_v11, %v1237_v38  ;;  %v532_v46 = vmul.f32 %v3684_v27, %v436_v47  ;;  %2391 = vmatmul.bf16.gmra.mxu2 %v1793_v50  ;;  %v1610_v56 = vmul.f32 %v1231_v41, %v4898_v13 }
 0x310   : > { %v2609_v34 = vpack.c.bf16 %v2311_v51, %v2142_v20  ;;  %2655 = vst [vmem:[%s4553_s16 + $0xf0] sm:$0xff] %v2527_v10  ;;  %v1611_v11 = vmul.f32 %v1241_v4, %v4901_v21  ;;  %v5241_v20 = vld [vmem:[%s3601_s28 + $0x160] sm:$0xff]  ;;  %v2147_v38 = vadd.f32 %v4952_v48, %v4504_v58 }
 0x311   : > { %v2377_v8 = vpop.f32.mrf.mxu2  ;;  %v5216_v49 = vsub.f32 %v4950_v28, %v532_v46  ;;  %v1677_v32 = vmul.f32 %v5004_v43, %v1610_v56 }
 0x312   : > { %2737 = vst [vmem:[%s4553_s16 + $0x2dc] sm:$0xff] %v2609_v34  ;;  %v2378_v14 = vadd.f32 %v2377_v8, %v4534_v52  ;;  %v2041_v44 = vpop.f32.mrf.mxu0  ;;  %2481 = vmatmul.bf16.gmra.mxu3 %v4751_v42  ;;  %v2145_v42 = vadd.f32 %v4944_v33, %v4504_v58  ;;  %v1678_v59 = vmul.f32 %v5004_v43, %v1611_v11  ;;  %v908_v34 = vadd.f32 1e-05, %v844_v29 }
 0x313   : > { %v2042_v54 = vadd.f32 %v2041_v44, %v4504_v58  ;;  %v2210_v60 = vpop.f32.mrf.mxu1  ;;  %v660_v13 = vmul.f32 %v5216_v49, %v5216_v49  ;;  %v1744_v9 = vadd.f32 %v5017_v57, %v1677_v32 }
 0x314   : > { %v2528_v25 = vpack.c.bf16 %v2378_v14, %v2378_v14  ;;  %v2211_v36 = vadd.f32 %v2210_v60, %v4506_v16  ;;  %v1745_v24 = vadd.f32 %v5017_v57, %v1678_v59  ;;  %3208 = vrsqrt.f32 %v908_v34 }
 0x315   : > { %v2313_v7 = vpop.f32.mrf.mxu3  ;;  %762 = vadd.xlane.f32.xlu0 %v660_v13  ;;  %vm1248_vm11 = vweird.f32 %v908_v34 }
 0x316   : > { %v2314_v21 = vadd.f32 %v2313_v7, %v4506_v16  ;;  %2656 = vst [vmem:[%s4553_s16 + $0xf8] sm:$0xf] %v2528_v25  ;;  %v2529_v28 = vpack.c.bf16 %v2211_v36, %v2042_v54  ;;  %v1794_v22 = vpack.c.bf16 %v1745_v24, %v1744_v9 }
 0x317   : > { %445 = vadd.xlane.f32.xlu2 %v5221_v3 }
 0x318   : > { %v2611_v23 = vpack.c.bf16 %v2314_v21, %v2145_v42  ;;  %2657 = vst [vmem:[%s4553_s16 + $0xfc] sm:$0xff] %v2529_v28 }
 0x319   : > { %v2379_v33 = vpop.f32.mrf.mxu2 }
 0x31a   : > { %2739 = vst [vmem:[%s4553_s16 + $0x2e8] sm:$0xff] %v2611_v23  ;;  %v2380_v39 = vadd.f32 %v2379_v33, %v4534_v52  ;;  %v3209_v47 = vpop.eup %3208 }
 0x31b   : > { %v1243_v14 = vmul.f32 %v3209_v47, %v908_v34  ;;  %vm1249_vm12 = vweird.f32 %v3209_v47 }
 0x31c   : > { %v2530_v45 = vpack.c.bf16 %v2380_v39, %v2380_v39  ;;  %vm1250_vm13 = vmor %vm1248_vm11, %vm1249_vm12 }
 0x31d   : > { %v2315_v37 = vpop.f32.mrf.mxu3  ;;  %449 = vadd.xlane.f32.xlu0 %v5238_v17  ;;  %v1244_v11 = vmul.f32 %v3209_v47, %v1243_v14 }
 0x31e   : > { %v2316_v5 = vadd.f32 %v2315_v37, %v4506_v16  ;;  %2658 = vst [vmem:[%s4553_s16 + $0x104] sm:$0xf] %v2530_v45  ;;  %2058 = vmatmul.bf16.gmra.mxu0 %v1794_v22  ;;  %2227 = vmatmul.bf16.gmra.mxu1 %v1794_v22 }
 0x31f   : > { %447 = vadd.xlane.f32.xlu2 %v5241_v20  ;;  %2396 = vmatmul.bf16.gmra.mxu2 %v1794_v22  ;;  %v1245_v36 = vmul.f32 0.5, %v1244_v11 }
 0x320   : > { %v2613_v30 = vpack.c.bf16 %v2316_v5, %v2147_v38 }
 0x321   : > { %v1246_v42 = vsub.f32 1.5, %v1245_v36 }
 0x322   : > { %2741 = vst [vmem:[%s4553_s16 + $0x2f4] sm:$0xff] %v2613_v30 }
 0x323   : > { %v1247_v33 = vmul.f32 %v3209_v47, %v1246_v42 }
 0x325   : > { %v2447_v61 = vpop.f32.mrf.mxu3  ;;  %451 = vadd.xlane.f32.xlu0 %v5251_v62  ;;  %v1251_v45 = vsel %vm1250_vm13, %v3209_v47, %v1247_v33 }
 0x326   : > { %v2448_v48 = vadd.f32 %v2447_v61, %v4534_v52 }
 0x328   : > { %v2584_v51 = vpack.c.bf16 %v2448_v48, %v2448_v48 }
 0x32a   : > { %2712 = vst [vmem:[%s4553_s16 + $0x248] sm:$0xf] %v2584_v51  ;;  %v1612_v51 = vmul.f32 %v1251_v45, %v4919_v53 }
 0x32d   : > { %v2449_v63 = vpop.f32.mrf.mxu3 }
 0x32e   : > { %v2450_v31 = vadd.f32 %v2449_v63, %v4534_v52 }
 0x330   : > { %v2586_v10 = vpack.c.bf16 %v2450_v31, %v2450_v31 }
 0x332   : > { %2714 = vst [vmem:[%s4553_s16 + $0x254] sm:$0xf] %v2586_v10 }
 0x335   : > { %v2452_v50 = vpop.f32.mrf.mxu3 }
 0x336   : > { %v2453_v4 = vadd.f32 %v2452_v50, %v4534_v52 }
 0x338   : > { %v2588_v41 = vpack.c.bf16 %v2453_v4, %v2453_v4 }
 0x33a   : > { %2716 = vst [vmem:[%s4553_s16 + $0x260] sm:$0xf] %v2588_v41 }
 0x33d   : > { %v2454_v46 = vpop.f32.mrf.mxu3 }
 0x33e   : > { %v2455_v8 = vadd.f32 %v2454_v46, %v4534_v52 }
 0x340   : > { %v2590_v44 = vpack.c.bf16 %v2455_v8, %v2455_v8 }
 0x342   : > { %2718 = vst [vmem:[%s4553_s16 + $0x26c] sm:$0xf] %v2590_v44  ;;  %v749_v56 = vpop.xlane.xlu0 %748 }
 0x343   : > { %v845_v0 = vmul.f32 %v749_v56, %v3684_v27  ;;  %v1679_v56 = vmul.f32 %v5004_v43, %v1612_v51 }
 0x345   : > { %v2457_v54 = vpop.f32.mrf.mxu3  ;;  %v909_v25 = vadd.f32 1e-05, %v845_v0 }
 0x346   : > { %v2458_v60 = vadd.f32 %v2457_v54, %v4534_v52 }
 0x347   : > { %3210 = vrsqrt.f32 %v909_v25  ;;  %vm1258_vm15 = vweird.f32 %v909_v25 }
 0x348   : > { %v2592_v7 = vpack.c.bf16 %v2458_v60, %v2458_v60 }
 0x34a   : > { %2720 = vst [vmem:[%s4553_s16 + $0x278] sm:$0xf] %v2592_v7  ;;  %v751_v21 = vpop.xlane.xlu0 %750 }
 0x34b   : > { %v846_v13 = vmul.f32 %v751_v21, %v3684_v27 }
 0x34d   : > { %v2459_v28 = vpop.f32.mrf.mxu3  ;;  %v3211_v32 = vpop.eup %3210  ;;  %v5269_v59 = vadd.f32 1e-05, %v846_v13 }
 0x34e   : > { %v2460_v23 = vadd.f32 %v2459_v28, %v4534_v52  ;;  %v1253_v39 = vmul.f32 %v3211_v32, %v909_v25  ;;  %vm1259_vm14 = vweird.f32 %v3211_v32 }
 0x34f   : > { %3212 = vrsqrt.f32 %v5269_v59  ;;  %vm1260_vm0 = vmor %vm1258_vm15, %vm1259_vm14  ;;  %vm1268_vm2 = vweird.f32 %v5269_v59 }
 0x350   : > { %v2594_v9 = vpack.c.bf16 %v2460_v23, %v2460_v23  ;;  %v1254_v24 = vmul.f32 %v3211_v32, %v1253_v39  ;;  %v1746_v39 = vadd.f32 %v5017_v57, %v1679_v56 }
 0x352   : > { %2722 = vst [vmem:[%s4553_s16 + $0x284] sm:$0xf] %v2594_v9  ;;  %v1255_v37 = vmul.f32 0.5, %v1254_v24  ;;  %v438_v38 = vpop.xlane.xlu0 %437 }
 0x353   : > { %v533_v5 = vmul.f32 %v3684_v27, %v438_v38 }
 0x354   : > { %v1256_v22 = vsub.f32 1.5, %v1255_v37  ;;  %v2044_v31 = vpop.f32.mrf.mxu0 }
 0x355   : > { %v2462_v30 = vpop.f32.mrf.mxu3  ;;  %v5275_v48 = vpop.eup %3212  ;;  %v5279_v63 = vsub.f32 %v5040_v15, %v533_v5  ;;  %v2045_v50 = vadd.f32 %v2044_v31, %v4504_v58 }
 0x356   : > { %v2463_v61 = vadd.f32 %v2462_v30, %v4534_v52  ;;  %v2213_v29 = vpop.f32.mrf.mxu1  ;;  %v1257_v10 = vmul.f32 %v3211_v32, %v1256_v22  ;;  %v1263_v34 = vmul.f32 %v5275_v48, %v5269_v59  ;;  %vm1269_vm1 = vweird.f32 %v5275_v48 }
 0x357   : > { %v2214_v4 = vadd.f32 %v2213_v29, %v4506_v16  ;;  %v661_v53 = vmul.f32 %v5279_v63, %v5279_v63  ;;  %vm1270_vm3 = vmor %vm1268_vm2, %vm1269_vm1 }
 0x358   : > { %v2596_v41 = vpack.c.bf16 %v2463_v61, %v2463_v61  ;;  %v1261_v15 = vsel %vm1260_vm0, %v3211_v32, %v1257_v10  ;;  %v1264_v47 = vmul.f32 %v5275_v48, %v1263_v34 }
 0x359   : > { %v753_v46 = vpop.xlane.xlu1 %752  ;;  %v1613_v8 = vmul.f32 %v1261_v15, %v4992_v2  ;;  %v2531_v14 = vpack.c.bf16 %v2214_v4, %v2045_v50  ;;  %764 = vadd.xlane.f32.xlu1 %v661_v53  ;;  %v5318_v53 = vld [vmem:[%s3601_s28 + $0x178] sm:$0xff]  ;;  %s3390_s28 = scalar_lea.hbm %s5666_s5, 1536 }
 0x35a   : > { %2724 = vst [vmem:[%s4553_s16 + $0x290] sm:$0xf] %v2596_v41  ;;  %v847_v44 = vmul.f32 %v753_v46, %v3684_v27  ;;  %v440_v11 = vpop.xlane.xlu0 %439  ;;  %v1265_v0 = vmul.f32 0.5, %v1264_v47  ;;  %p3392_p10 = scmp.lt.s32.totalorder %s3390_s28, %s3386_s13 }
 0x35b   : > { %2659 = vst [vmem:[%s4553_s16 + $0x108] sm:$0xff] %v2531_v14  ;;  %v534_v60 = vmul.f32 %v3684_v27, %v440_v11  ;;  %v1680_v36 = vmul.f32 %v5004_v43, %v1613_v8  ;;  %v2382_v7 = vpop.f32.mrf.mxu2 }
 0x35c   : > { %v911_v54 = vadd.f32 1e-05, %v847_v44  ;;  %v2383_v42 = vadd.f32 %v2382_v7, %v4534_v52  ;;  %v2046_v13 = vpop.f32.mrf.mxu0  ;;  %v1266_v9 = vsub.f32 1.5, %v1265_v0  ;;  %p3393_p2 = por %p3392_p10, %p3391_p9 }
 0x35d   : > { %v2464_v25 = vpop.f32.mrf.mxu3  ;;  %v5298_v21 = vsub.f32 %v5065_v12, %v534_v60  ;;  %v2047_v23 = vadd.f32 %v2046_v13, %v4504_v58  ;;  %v1747_v45 = vadd.f32 %v5017_v57, %v1680_v36 }
 0x35e   : > { %v2465_v2 = vadd.f32 %v2464_v25, %v4534_v52  ;;  %3214 = vrsqrt.f32 %v911_v54  ;;  %v2215_v28 = vpop.f32.mrf.mxu1  ;;  %v2532_v24 = vpack.c.bf16 %v2383_v42, %v2383_v42  ;;  %v1267_v61 = vmul.f32 %v5275_v48, %v1266_v9  ;;  %p3394_p11 = pnand %p3393_p2, %p3389_p8 }
 0x35f   : > { %v2216_v32 = vadd.f32 %v2215_v28, %v4506_v16  ;;  %v662_v37 = vmul.f32 %v5298_v21, %v5298_v21  ;;  %v1795_v12 = vpack.c.bf16 %v1747_v45, %v1746_v39  ;;  %vm1278_vm4 = vweird.f32 %v911_v54 }
 0x360   : > { %v2598_v33 = vpack.c.bf16 %v2465_v2, %v2465_v2  ;;  %2660 = vst [vmem:[%s4553_s16 + $0x110] sm:$0xf] %v2532_v24  ;;  %v1271_v15 = vsel %vm1270_vm3, %v5275_v48, %v1267_v61 }
 0x361   : > { %v2533_v38 = vpack.c.bf16 %v2216_v32, %v2047_v23  ;;  %766 = vadd.xlane.f32.xlu1 %v662_v37  ;;  %v755_v5 = vpop.xlane.xlu1 %754  ;;  %2063 = vmatmul.bf16.gmra.mxu0 %v1795_v12  ;;  %v1614_v8 = vmul.f32 %v1271_v15, %v5012_v19 }
 0x362   : > { %2726 = vst [vmem:[%s4553_s16 + $0x29c] sm:$0xf] %v2598_v33  ;;  %v848_v30 = vmul.f32 %v755_v5, %v3684_v27  ;;  %2232 = vmatmul.bf16.gmra.mxu1 %v1795_v12  ;;  %2401 = vmatmul.bf16.gmra.mxu2 %v1795_v12 }
 0x363   : > { %2661 = vst [vmem:[%s4553_s16 + $0x114] sm:$0xff] %v2533_v38  ;;  %v2384_v29 = vpop.f32.mrf.mxu2  ;;  %v1681_v13 = vmul.f32 %v5004_v43, %v1614_v8 }
 0x364   : > { %v3215_v22 = vpop.eup %3214  ;;  %v2385_v34 = vadd.f32 %v2384_v29, %v4534_v52  ;;  %v5315_v4 = vadd.f32 1e-05, %v848_v30 }
 0x365   : > { %v2467_v51 = vpop.f32.mrf.mxu3  ;;  %v1273_v31 = vmul.f32 %v3215_v22, %v911_v54  ;;  %vm1279_vm5 = vweird.f32 %v3215_v22  ;;  %v1748_v37 = vadd.f32 %v5017_v57, %v1681_v13 }
 0x366   : > { %v2468_v10 = vadd.f32 %v2467_v51, %v4534_v52  ;;  %v2534_v47 = vpack.c.bf16 %v2385_v34, %v2385_v34  ;;  %3216 = vrsqrt.f32 %v5315_v4  ;;  %vm1280_vm6 = vmor %vm1278_vm4, %vm1279_vm5  ;;  %vm1288_vm7 = vweird.f32 %v5315_v4 }
 0x367   : > { %v1274_v50 = vmul.f32 %v3215_v22, %v1273_v31 }
 0x368   : > { %v2600_v41 = vpack.c.bf16 %v2468_v10, %v2468_v10  ;;  %2662 = vst [vmem:[%s4553_s16 + $0x11c] sm:$0xf] %v2534_v47 }
 0x369   : > { %v1275_v46 = vmul.f32 0.5, %v1274_v50  ;;  %453 = vadd.xlane.f32.xlu1 %v5318_v53  ;;  %v442_v59 = vpop.xlane.xlu1 %441 }
 0x36a   : > { %2728 = vst [vmem:[%s4553_s16 + $0x2a8] sm:$0xf] %v2600_v41  ;;  %v535_v44 = vmul.f32 %v3684_v27, %v442_v59  ;;  %v2049_v11 = vpop.f32.mrf.mxu0  ;;  %v2218_v56 = vpop.f32.mrf.mxu1 }
 0x36b   : > { %v1276_v14 = vsub.f32 1.5, %v1275_v46  ;;  %v2050_v48 = vadd.f32 %v2049_v11, %v4504_v58  ;;  %v2219_v0 = vadd.f32 %v2218_v56, %v4506_v16 }
 0x36c   : > { %v5330_v25 = vsub.f32 %v5099_v35, %v535_v44  ;;  %v5338_v23 = vpop.eup %3216 }
 0x36d   : > { %v2469_v54 = vpop.f32.mrf.mxu3  ;;  %v1277_v60 = vmul.f32 %v3215_v22, %v1276_v14  ;;  %v2535_v36 = vpack.c.bf16 %v2219_v0, %v2050_v48  ;;  %vm1289_vm8 = vweird.f32 %v5338_v23 }
 0x36e   : > { %v2470_v19 = vadd.f32 %v2469_v54, %v4534_v52  ;;  %v663_v42 = vmul.f32 %v5330_v25, %v5330_v25  ;;  %vm5370_vm9 = vmor %vm1288_vm7, %vm1289_vm8 }
 0x36f   : > { %v1281_v7 = vsel %vm1280_vm6, %v3215_v22, %v1277_v60  ;;  %2663 = vst [vmem:[%s4553_s16 + $0x120] sm:$0xff] %v2535_v36 }
 0x370   : > { %v2602_v2 = vpack.c.bf16 %v2470_v19, %v2470_v19  ;;  %v1615_v28 = vmul.f32 %v1281_v7, %v5055_v1  ;;  %768 = vadd.xlane.f32.xlu2 %v663_v42  ;;  %v1283_v1 = vmul.f32 %v5338_v23, %v5315_v4 }
 0x371   : > { %v2387_v32 = vpop.f32.mrf.mxu2  ;;  %v444_v35 = vpop.xlane.xlu1 %443 }
 0x372   : > { %2730 = vst [vmem:[%s4553_s16 + $0x2b4] sm:$0xf] %v2602_v2  ;;  %v1682_v33 = vmul.f32 %v5004_v43, %v1615_v28  ;;  %v2388_v39 = vadd.f32 %v2387_v32, %v4534_v52  ;;  %v536_v9 = vmul.f32 %v3684_v27, %v444_v35  ;;  %v2051_v24 = vpop.f32.mrf.mxu0  ;;  %v2220_v45 = vpop.f32.mrf.mxu1  ;;  %v1284_v34 = vmul.f32 %v5338_v23, %v1283_v1 }
 0x373   : > { %v2052_v38 = vadd.f32 %v2051_v24, %v4504_v58  ;;  %v2221_v12 = vadd.f32 %v2220_v45, %v4506_v16 }
 0x374   : > { %v1749_v43 = vadd.f32 %v5017_v57, %v1682_v33  ;;  %v2536_v30 = vpack.c.bf16 %v2388_v39, %v2388_v39  ;;  %v5351_v22 = vsub.f32 %v5120_v18, %v536_v9  ;;  %v1285_v15 = vmul.f32 0.5, %v1284_v34 }
 0x375   : > { %v2472_v5 = vpop.f32.mrf.mxu3  ;;  %v2537_v51 = vpack.c.bf16 %v2221_v12, %v2052_v38 }
 0x376   : > { %v2473_v61 = vadd.f32 %v2472_v5, %v4534_v52  ;;  %v1796_v31 = vpack.c.bf16 %v1749_v43, %v1748_v37  ;;  %2664 = vst [vmem:[%s4553_s16 + $0x128] sm:$0xf] %v2536_v30  ;;  %v664_v10 = vmul.f32 %v5351_v22, %v5351_v22  ;;  %v1286_v44 = vsub.f32 1.5, %v1285_v15 }
 0x377   : > { %2665 = vst [vmem:[%s4553_s16 + $0x12c] sm:$0xff] %v2537_v51 }
 0x378   : > { %v2604_v29 = vpack.c.bf16 %v2473_v61, %v2473_v61  ;;  %2068 = vmatmul.bf16.gmra.mxu0 %v1796_v31  ;;  %2237 = vmatmul.bf16.gmra.mxu1 %v1796_v31  ;;  %v1287_v60 = vmul.f32 %v5338_v23, %v1286_v44 }
 0x379   : > { %770 = vadd.xlane.f32.xlu2 %v664_v10  ;;  %2406 = vmatmul.bf16.gmra.mxu2 %v1796_v31  ;;  %v2389_v50 = vpop.f32.mrf.mxu2  ;;  %v5393_v31 = vld [vmem:[#allocation5] ss:$0 sm:$0xff] }
 0x37a   : > { %2732 = vst [vmem:[%s4553_s16 + $0x2c0] sm:$0xf] %v2604_v29  ;;  %v757_v57 = vpop.xlane.xlu2 %756  ;;  %v2390_v41 = vadd.f32 %v2389_v50, %v4534_v52  ;;  %v1291_v28 = vsel %vm5370_vm9, %v5338_v23, %v1287_v60 }
 0x37b   : > { %v849_v18 = vmul.f32 %v757_v57, %v3684_v27  ;;  %v1616_v9 = vmul.f32 %v1291_v28, %v5077_v26 }
 0x37c   : > { %v2538_v59 = vpack.c.bf16 %v2390_v41, %v2390_v41 }
 0x37d   : > { %v913_v47 = vadd.f32 1e-05, %v849_v18  ;;  %v2474_v46 = vpop.f32.mrf.mxu3  ;;  %v1683_v29 = vmul.f32 %v5393_v31, %v1616_v9 }
 0x37e   : > { %v2475_v8 = vadd.f32 %v2474_v46, %v4534_v52  ;;  %2666 = vst [vmem:[%s4553_s16 + $0x134] sm:$0xf] %v2538_v59 }
 0x37f   : > { %3218 = vrsqrt.f32 %v913_v47  ;;  %vm1298_vm10 = vweird.f32 %v913_v47 }
 0x380   : > { %v2606_v14 = vpack.c.bf16 %v2475_v8, %v2475_v8  ;;  %v761_v56 = vpop.xlane.xlu0 %760 }
 0x381   : > { %v851_v0 = vmul.f32 %v761_v56, %v3684_v27  ;;  %v5409_v56 = vld [vmem:[#allocation7] ss:$0 sm:$0xff] }
 0x382   : > { %2734 = vst [vmem:[%s4553_s16 + $0x2cc] sm:$0xf] %v2606_v14  ;;  %v759_v11 = vpop.xlane.xlu2 %758  ;;  %v1750_v36 = vadd.f32 %v5409_v56, %v1683_v29 }
 0x383   : > { %v850_v48 = vmul.f32 %v759_v11, %v3684_v27  ;;  %v915_v4 = vadd.f32 1e-05, %v851_v0 }
 0x385   : > { %v3219_v54 = vpop.eup %3218  ;;  %v2477_v19 = vpop.f32.mrf.mxu3  ;;  %v914_v2 = vadd.f32 1e-05, %v850_v48  ;;  %vm1318_vm14 = vweird.f32 %v915_v4 }
 0x386   : > { %v1293_v7 = vmul.f32 %v3219_v54, %v913_v47  ;;  %v2478_v42 = vadd.f32 %v2477_v19, %v4534_v52  ;;  %vm1299_vm11 = vweird.f32 %v3219_v54 }
 0x387   : > { %3220 = vrsqrt.f32 %v914_v2  ;;  %vm1300_vm12 = vmor %vm1298_vm10, %vm1299_vm11  ;;  %vm1308_vm13 = vweird.f32 %v914_v2 }
 0x388   : > { %v1294_v13 = vmul.f32 %v3219_v54, %v1293_v7  ;;  %3222 = vrsqrt.f32 %v915_v4  ;;  %v2608_v32 = vpack.c.bf16 %v2478_v42, %v2478_v42  ;;  %v5379_v39 = vpop.xlane.xlu0 %762 }
 0x38a   : > { %v1295_v35 = vmul.f32 0.5, %v1294_v13  ;;  %2736 = vst [vmem:[%s4553_s16 + $0x2d8] sm:$0xf] %v2608_v32  ;;  %v446_v33 = vpop.xlane.xlu2 %445 }
 0x38b   : > { %v537_v45 = vmul.f32 %v3684_v27, %v446_v33  ;;  %v2054_v30 = vpop.f32.mrf.mxu0  ;;  %v2223_v61 = vpop.f32.mrf.mxu1 }
 0x38c   : > { %v1296_v24 = vsub.f32 1.5, %v1295_v35  ;;  %v2055_v34 = vadd.f32 %v2054_v30, %v4504_v58  ;;  %v2224_v18 = vadd.f32 %v2223_v61, %v4506_v16 }
 0x38d   : > { %v2479_v37 = vpop.f32.mrf.mxu3  ;;  %v5383_v1 = vpop.eup %3220  ;;  %v5386_v23 = vsub.f32 %v5221_v3, %v537_v45 }
 0x38e   : > { %v1297_v38 = vmul.f32 %v3219_v54, %v1296_v24  ;;  %v2480_v12 = vadd.f32 %v2479_v37, %v4534_v52  ;;  %v5389_v5 = vpop.eup %3222  ;;  %v1303_v43 = vmul.f32 %v5383_v1, %v914_v2  ;;  %vm1309_vm15 = vweird.f32 %v5383_v1 }
 0x38f   : > { %v1313_v51 = vmul.f32 %v5389_v5, %v915_v4  ;;  %v665_v41 = vmul.f32 %v5386_v23, %v5386_v23  ;;  %vm1319_vm0 = vweird.f32 %v5389_v5  ;;  %v2539_v8 = vpack.c.bf16 %v2224_v18, %v2055_v34  ;;  %vm5413_vm1 = vmor %vm1308_vm13, %vm1309_vm15 }
 0x390   : > { %v1301_v26 = vsel %vm1300_vm12, %v3219_v54, %v1297_v38  ;;  %v1304_v3 = vmul.f32 %v5383_v1, %v1303_v43  ;;  %v2610_v50 = vpack.c.bf16 %v2480_v12, %v2480_v12  ;;  %v450_v47 = vpop.xlane.xlu0 %449  ;;  %vm5423_vm2 = vmor %vm1318_vm14, %vm1319_vm0 }
 0x391   : > { %v1617_v10 = vmul.f32 %v1301_v26, %v5143_v6  ;;  %v1314_v57 = vmul.f32 %v5389_v5, %v1313_v51  ;;  %772 = vadd.xlane.f32.xlu0 %v665_v41  ;;  %v539_v44 = vmul.f32 %v3684_v27, %v450_v47  ;;  %2667 = vst [vmem:[%s4553_s16 + $0x138] sm:$0xff] %v2539_v8 }
 0x392   : > { %v1305_v15 = vmul.f32 0.5, %v1304_v3  ;;  %v448_v6 = vpop.xlane.xlu2 %447  ;;  %2738 = vst [vmem:[%s4553_s16 + $0x2e4] sm:$0xf] %v2610_v50  ;;  %v2392_v60 = vpop.f32.mrf.mxu2 }
 0x393   : > { %v1684_v46 = vmul.f32 %v5393_v31, %v1617_v10  ;;  %v1315_v59 = vmul.f32 0.5, %v1314_v57  ;;  %v538_v14 = vmul.f32 %v3684_v27, %v448_v6  ;;  %v2393_v13 = vadd.f32 %v2392_v60, %v4534_v52  ;;  %v2056_v32 = vpop.f32.mrf.mxu0  ;;  %v2225_v35 = vpop.f32.mrf.mxu1 }
 0x394   : > { %v1306_v11 = vsub.f32 1.5, %v1305_v15  ;;  %v5432_v28 = vsub.f32 %v5238_v17, %v539_v44  ;;  %v2057_v4 = vadd.f32 %v2056_v32, %v4504_v58  ;;  %v2226_v9 = vadd.f32 %v2225_v35, %v4506_v16 }
 0x395   : > { %v1751_v48 = vadd.f32 %v5409_v56, %v1684_v46  ;;  %v1316_v54 = vsub.f32 1.5, %v1315_v59  ;;  %v2482_v19 = vpop.f32.mrf.mxu3  ;;  %v5428_v2 = vsub.f32 %v5241_v20, %v538_v14  ;;  %v2540_v45 = vpack.c.bf16 %v2393_v13, %v2393_v13 }
 0x396   : > { %v1307_v7 = vmul.f32 %v5383_v1, %v1306_v11  ;;  %v2483_v24 = vadd.f32 %v2482_v19, %v4534_v52  ;;  %v2541_v38 = vpack.c.bf16 %v2226_v9, %v2057_v4  ;;  %v667_v61 = vmul.f32 %v5432_v28, %v5432_v28 }
 0x397   : > { %v1317_v33 = vmul.f32 %v5389_v5, %v1316_v54  ;;  %v1797_v37 = vpack.c.bf16 %v1751_v48, %v1750_v36  ;;  %2668 = vst [vmem:[%s4553_s16 + $0x140] sm:$0xf] %v2540_v45  ;;  %v666_v43 = vmul.f32 %v5428_v2, %v5428_v2  ;;  %v852_v13 = vmul.f32 %v5379_v39, %v3684_v27 }
 0x398   : > { %v1311_v20 = vsel %vm5413_vm1, %v5383_v1, %v1307_v7  ;;  %v2612_v12 = vpack.c.bf16 %v2483_v24, %v2483_v24  ;;  %v452_v30 = vpop.xlane.xlu0 %451  ;;  %2669 = vst [vmem:[%s4553_s16 + $0x144] sm:$0xff] %v2541_v38  ;;  %776 = vadd.xlane.f32.xlu2 %v667_v61 }
 0x399   : > { %v1321_v17 = vsel %vm5423_vm2, %v5389_v5, %v1317_v33  ;;  %2073 = vmatmul.bf16.gmra.mxu0 %v1797_v37  ;;  %2242 = vmatmul.bf16.gmra.mxu1 %v1797_v37  ;;  %v540_v1 = vmul.f32 %v3684_v27, %v452_v30  ;;  %v1618_v26 = vmul.f32 %v1311_v20, %v5170_v40  ;;  %v916_v32 = vadd.f32 1e-05, %v852_v13 }
 0x39a   : > { %2411 = vmatmul.bf16.gmra.mxu2 %v1797_v37  ;;  %v1619_v5 = vmul.f32 %v1321_v17, %v5173_v55  ;;  %2740 = vst [vmem:[%s4553_s16 + $0x2f0] sm:$0xf] %v2612_v12  ;;  %774 = vadd.xlane.f32.xlu1 %v666_v43  ;;  %v2394_v51 = vpop.f32.mrf.mxu2 }
 0x39b   : > { %v5455_v29 = vsub.f32 %v5251_v62, %v540_v1  ;;  %v2395_v3 = vadd.f32 %v2394_v51, %v4534_v52  ;;  %v2059_v34 = vpop.f32.mrf.mxu0  ;;  %v2228_v57 = vpop.f32.mrf.mxu1  ;;  %v1685_v62 = vmul.f32 %v5393_v31, %v1618_v26  ;;  %3224 = vrsqrt.f32 %v916_v32 }
 0x39c   : > { %v2060_v40 = vadd.f32 %v2059_v34, %v4504_v58  ;;  %v2229_v55 = vadd.f32 %v2228_v57, %v4506_v16  ;;  %v1686_v6 = vmul.f32 %v5393_v31, %v1619_v5  ;;  %vm1328_vm3 = vweird.f32 %v916_v32 }
 0x39d   : > { %v2484_v10 = vpop.f32.mrf.mxu3  ;;  %v668_v50 = vmul.f32 %v5455_v29, %v5455_v29  ;;  %v2542_v41 = vpack.c.bf16 %v2395_v3, %v2395_v3  ;;  %v1752_v46 = vadd.f32 %v5409_v56, %v1685_v62 }
 0x39e   : > { %v2485_v18 = vadd.f32 %v2484_v10, %v4534_v52  ;;  %v2543_v47 = vpack.c.bf16 %v2229_v55, %v2060_v40  ;;  %v1753_v59 = vadd.f32 %v5409_v56, %v1686_v6 }
 0x39f   : > { %778 = vadd.xlane.f32.xlu0 %v668_v50  ;;  %2670 = vst [vmem:[%s4553_s16 + $0x14c] sm:$0xf] %v2542_v41 }
 0x3a0   : > { %v2614_v15 = vpack.c.bf16 %v2485_v18, %v2485_v18  ;;  %2671 = vst [vmem:[%s4553_s16 + $0x150] sm:$0xff] %v2543_v47  ;;  %v1798_v60 = vpack.c.bf16 %v1753_v59, %v1752_v46 }
 0x3a1   : > { %v3225_v35 = vpop.eup %3224 }
 0x3a2   : > { %2742 = vst [vmem:[%s4553_s16 + $0x2fc] sm:$0xf] %v2614_v15  ;;  %v2397_v8 = vpop.f32.mrf.mxu2  ;;  %v1323_v33 = vmul.f32 %v3225_v35, %v916_v32  ;;  %vm1329_vm4 = vweird.f32 %v3225_v35 }
 0x3a3   : > { %v2398_v14 = vadd.f32 %v2397_v8, %v4534_v52  ;;  %v2061_v44 = vpop.f32.mrf.mxu0  ;;  %v2230_v11 = vpop.f32.mrf.mxu1  ;;  %vm1330_vm5 = vmor %vm1328_vm3, %vm1329_vm4 }
 0x3a4   : > { %v2062_v48 = vadd.f32 %v2061_v44, %v4504_v58  ;;  %v2231_v0 = vadd.f32 %v2230_v11, %v4506_v16  ;;  %v1324_v4 = vmul.f32 %v3225_v35, %v1323_v33 }
 0x3a5   : > { %v2544_v54 = vpack.c.bf16 %v2398_v14, %v2398_v14 }
 0x3a6   : > { %v2545_v19 = vpack.c.bf16 %v2231_v0, %v2062_v48  ;;  %v1325_v37 = vmul.f32 0.5, %v1324_v4 }
 0x3a7   : > { %2672 = vst [vmem:[%s4553_s16 + $0x158] sm:$0xf] %v2544_v54 }
 0x3a8   : > { %2673 = vst [vmem:[%s4553_s16 + $0x15c] sm:$0xff] %v2545_v19  ;;  %v1326_v20 = vsub.f32 1.5, %v1325_v37 }
 0x3a9   : > { %2078 = vmatmul.bf16.gmra.mxu0 %v1798_v60  ;;  %2247 = vmatmul.bf16.gmra.mxu1 %v1798_v60 }
 0x3aa   : > { %2416 = vmatmul.bf16.gmra.mxu2 %v1798_v60  ;;  %v2399_v36 = vpop.f32.mrf.mxu2  ;;  %v1327_v39 = vmul.f32 %v3225_v35, %v1326_v20 }
 0x3ab   : > { %v2400_v7 = vadd.f32 %v2399_v36, %v4534_v52 }
 0x3ac   : > { %v1331_v1 = vsel %vm1330_vm5, %v3225_v35, %v1327_v39 }
 0x3ad   : > { %v2546_v42 = vpack.c.bf16 %v2400_v7, %v2400_v7  ;;  %v1620_v34 = vmul.f32 %v1331_v1, %v5216_v49 }
 0x3af   : > { %2674 = vst [vmem:[%s4553_s16 + $0x164] sm:$0xf] %v2546_v42  ;;  %v1687_v59 = vmul.f32 %v5393_v31, %v1620_v34 }
 0x3b1   : > { %v1754_v0 = vadd.f32 %v5409_v56, %v1687_v59 }
 0x3cc   : > { %v765_v9 = vpop.xlane.xlu1 %764 }
 0x3cd   : > { %v853_v24 = vmul.f32 %v765_v9, %v3684_v27 }
 0x3cf   : > { %v917_v45 = vadd.f32 1e-05, %v853_v24 }
 0x3d1   : > { %3226 = vrsqrt.f32 %v917_v45  ;;  %vm1338_vm7 = vweird.f32 %v917_v45 }
 0x3d4   : > { %v767_v17 = vpop.xlane.xlu1 %766 }
 0x3d5   : > { %v854_v38 = vmul.f32 %v767_v17, %v3684_v27 }
 0x3d7   : > { %v3227_v12 = vpop.eup %3226  ;;  %v5481_v43 = vadd.f32 1e-05, %v854_v38 }
 0x3d8   : > { %v1333_v30 = vmul.f32 %v3227_v12, %v917_v45  ;;  %vm1339_vm6 = vweird.f32 %v3227_v12 }
 0x3d9   : > { %3228 = vrsqrt.f32 %v5481_v43  ;;  %vm1340_vm8 = vmor %vm1338_vm7, %vm1339_vm6  ;;  %vm1348_vm10 = vweird.f32 %v5481_v43 }
 0x3da   : > { %v1334_v61 = vmul.f32 %v3227_v12, %v1333_v30 }
 0x3dc   : > { %v1335_v26 = vmul.f32 0.5, %v1334_v61  ;;  %v454_v5 = vpop.xlane.xlu1 %453 }
 0x3dd   : > { %v541_v51 = vmul.f32 %v3684_v27, %v454_v5 }
 0x3de   : > { %v1336_v10 = vsub.f32 1.5, %v1335_v26  ;;  %v2064_v55 = vpop.f32.mrf.mxu0 }
 0x3df   : > { %v5485_v3 = vpop.eup %3228  ;;  %v5489_v57 = vsub.f32 %v5318_v53, %v541_v51  ;;  %v2233_v50 = vpop.f32.mrf.mxu1  ;;  %v2065_v41 = vadd.f32 %v2064_v55, %v4504_v58 }
 0x3e0   : > { %v1337_v18 = vmul.f32 %v3227_v12, %v1336_v10  ;;  %v1343_v40 = vmul.f32 %v5485_v3, %v5481_v43  ;;  %v2234_v15 = vadd.f32 %v2233_v50, %v4506_v16  ;;  %vm1349_vm9 = vweird.f32 %v5485_v3 }
 0x3e1   : > { %v669_v62 = vmul.f32 %v5489_v57, %v5489_v57  ;;  %vm1350_vm11 = vmor %vm1348_vm10, %vm1349_vm9 }
 0x3e2   : > { %v1341_v49 = vsel %vm1340_vm8, %v3227_v12, %v1337_v18  ;;  %v1344_v6 = vmul.f32 %v5485_v3, %v1343_v40  ;;  %v2547_v47 = vpack.c.bf16 %v2234_v15, %v2065_v41 }
 0x3e3   : > { %v1621_v53 = vmul.f32 %v1341_v49, %v5279_v63  ;;  %780 = vadd.xlane.f32.xlu1 %v669_v62  ;;  %v769_v46 = vpop.xlane.xlu2 %768 }
 0x3e4   : > { %v855_v8 = vmul.f32 %v769_v46, %v3684_v27  ;;  %2675 = vst [vmem:[%s4553_s16 + $0x168] sm:$0xff] %v2547_v47  ;;  %v1345_v11 = vmul.f32 0.5, %v1344_v6 }
 0x3e5   : > { %v1688_v14 = vmul.f32 %v5393_v31, %v1621_v53  ;;  %v2402_v48 = vpop.f32.mrf.mxu2 }
 0x3e6   : > { %v919_v44 = vadd.f32 1e-05, %v855_v8  ;;  %v2403_v54 = vadd.f32 %v2402_v48, %v4534_v52  ;;  %v2066_v60 = vpop.f32.mrf.mxu0  ;;  %v1346_v32 = vsub.f32 1.5, %v1345_v11 }
 0x3e7   : > { %v1755_v63 = vadd.f32 %v5409_v56, %v1688_v14  ;;  %v2235_v19 = vpop.f32.mrf.mxu1  ;;  %v2067_v36 = vadd.f32 %v2066_v60, %v4504_v58 }
 0x3e8   : > { %3230 = vrsqrt.f32 %v919_v44  ;;  %v2236_v7 = vadd.f32 %v2235_v19, %v4506_v16  ;;  %v2548_v13 = vpack.c.bf16 %v2403_v54, %v2403_v54  ;;  %v1347_v24 = vmul.f32 %v5485_v3, %v1346_v32 }
 0x3e9   : > { %v1799_v42 = vpack.c.bf16 %v1755_v63, %v1754_v0  ;;  %vm1358_vm12 = vweird.f32 %v919_v44 }
 0x3ea   : > { %v2549_v35 = vpack.c.bf16 %v2236_v7, %v2067_v36  ;;  %2676 = vst [vmem:[%s4553_s16 + $0x170] sm:$0xf] %v2548_v13  ;;  %v1351_v39 = vsel %vm1350_vm11, %v5485_v3, %v1347_v24 }
 0x3eb   : > { %2083 = vmatmul.bf16.gmra.mxu0 %v1799_v42  ;;  %2252 = vmatmul.bf16.gmra.mxu1 %v1799_v42  ;;  %v1622_v43 = vmul.f32 %v1351_v39, %v5298_v21 }
 0x3ec   : > { %v771_v33 = vpop.xlane.xlu2 %770  ;;  %2421 = vmatmul.bf16.gmra.mxu2 %v1799_v42  ;;  %2677 = vst [vmem:[%s4553_s16 + $0x174] sm:$0xff] %v2549_v35 }
 0x3ed   : > { %v856_v4 = vmul.f32 %v771_v33, %v3684_v27  ;;  %v2404_v37 = vpop.f32.mrf.mxu2  ;;  %v1689_v40 = vmul.f32 %v5393_v31, %v1622_v43 }
 0x3ee   : > { %v3231_v9 = vpop.eup %3230  ;;  %v2405_v20 = vadd.f32 %v2404_v37, %v4534_v52 }
 0x3ef   : > { %v1353_v45 = vmul.f32 %v3231_v9, %v919_v44  ;;  %v920_v38 = vadd.f32 1e-05, %v856_v4  ;;  %vm1359_vm13 = vweird.f32 %v3231_v9  ;;  %v1756_v46 = vadd.f32 %v5409_v56, %v1689_v40 }
 0x3f0   : > { %v2550_v12 = vpack.c.bf16 %v2405_v20, %v2405_v20  ;;  %vm1360_vm14 = vmor %vm1358_vm12, %vm1359_vm13 }
 0x3f1   : > { %v1354_v17 = vmul.f32 %v3231_v9, %v1353_v45  ;;  %3232 = vrsqrt.f32 %v920_v38  ;;  %vm1368_vm15 = vweird.f32 %v920_v38 }
 0x3f2   : > { %2678 = vst [vmem:[%s4553_s16 + $0x17c] sm:$0xf] %v2550_v12 }
 0x3f3   : > { %v1355_v30 = vmul.f32 0.5, %v1354_v17 }
 0x3f5   : > { %v2069_v61 = vpop.f32.mrf.mxu0  ;;  %v2238_v1 = vpop.f32.mrf.mxu1  ;;  %v1356_v26 = vsub.f32 1.5, %v1355_v30 }
 0x3f6   : > { %v2070_v5 = vadd.f32 %v2069_v61, %v4504_v58  ;;  %v2239_v51 = vadd.f32 %v2238_v1, %v4506_v16 }
 0x3f7   : > { %v1357_v10 = vmul.f32 %v3231_v9, %v1356_v26  ;;  %v3233_v55 = vpop.eup %3232 }
 0x3f8   : > { %v2551_v34 = vpack.c.bf16 %v2239_v51, %v2070_v5  ;;  %v1363_v6 = vmul.f32 %v3233_v55, %v920_v38  ;;  %vm1369_vm0 = vweird.f32 %v3233_v55 }
 0x3f9   : > { %v1361_v18 = vsel %vm1360_vm14, %v3231_v9, %v1357_v10  ;;  %vm1370_vm1 = vmor %vm1368_vm15, %vm1369_vm0 }
 0x3fa   : > { %2679 = vst [vmem:[%s4553_s16 + $0x180] sm:$0xff] %v2551_v34  ;;  %v1623_v3 = vmul.f32 %v1361_v18, %v5330_v25  ;;  %v1364_v14 = vmul.f32 %v3233_v55, %v1363_v6 }
 0x3fc   : > { %v2407_v50 = vpop.f32.mrf.mxu2  ;;  %v1690_v49 = vmul.f32 %v5393_v31, %v1623_v3  ;;  %v1365_v0 = vmul.f32 0.5, %v1364_v14 }
 0x3fd   : > { %v2408_v41 = vadd.f32 %v2407_v50, %v4534_v52  ;;  %v2071_v15 = vpop.f32.mrf.mxu0  ;;  %v2240_v62 = vpop.f32.mrf.mxu1 }
 0x3fe   : > { %v2072_v21 = vadd.f32 %v2071_v15, %v4504_v58  ;;  %v2241_v53 = vadd.f32 %v2240_v62, %v4506_v16  ;;  %v1757_v25 = vadd.f32 %v5409_v56, %v1690_v49  ;;  %v1366_v19 = vsub.f32 1.5, %v1365_v0 }
 0x3ff   : > { %v2552_v47 = vpack.c.bf16 %v2408_v41, %v2408_v41 }
 0x400   : > { %v2553_v59 = vpack.c.bf16 %v2241_v53, %v2072_v21  ;;  %v1800_v8 = vpack.c.bf16 %v1757_v25, %v1756_v46  ;;  %v1367_v36 = vmul.f32 %v3233_v55, %v1366_v19 }
 0x401   : > { %2680 = vst [vmem:[%s4553_s16 + $0x188] sm:$0xf] %v2552_v47 }
 0x402   : > { %2681 = vst [vmem:[%s4553_s16 + $0x18c] sm:$0xff] %v2553_v59  ;;  %2088 = vmatmul.bf16.gmra.mxu0 %v1800_v8  ;;  %2257 = vmatmul.bf16.gmra.mxu1 %v1800_v8  ;;  %v1371_v9 = vsel %vm1370_vm1, %v3233_v55, %v1367_v36 }
 0x403   : > { %2426 = vmatmul.bf16.gmra.mxu2 %v1800_v8  ;;  %v1624_v37 = vmul.f32 %v1371_v9, %v5351_v22 }
 0x404   : > { %v2409_v44 = vpop.f32.mrf.mxu2  ;;  %v773_v48 = vpop.xlane.xlu0 %772 }
 0x405   : > { %v2410_v11 = vadd.f32 %v2409_v44, %v4534_v52  ;;  %v857_v54 = vmul.f32 %v773_v48, %v3684_v27  ;;  %v1691_v5 = vmul.f32 %v5393_v31, %v1624_v37 }
 0x407   : > { %v2554_v63 = vpack.c.bf16 %v2410_v11, %v2410_v11  ;;  %v921_v60 = vadd.f32 1e-05, %v857_v54  ;;  %v1758_v55 = vadd.f32 %v5409_v56, %v1691_v5 }
 0x409   : > { %2682 = vst [vmem:[%s4553_s16 + $0x194] sm:$0xf] %v2554_v63  ;;  %3234 = vrsqrt.f32 %v921_v60  ;;  %vm1378_vm2 = vweird.f32 %v921_v60 }
 0x40b   : > { %v777_v13 = vpop.xlane.xlu2 %776 }
 0x40c   : > { %v859_v35 = vmul.f32 %v777_v13, %v3684_v27 }
 0x40d   : > { %v775_v7 = vpop.xlane.xlu1 %774 }
 0x40e   : > { %v858_v42 = vmul.f32 %v775_v7, %v3684_v27  ;;  %v923_v24 = vadd.f32 1e-05, %v859_v35 }
 0x40f   : > { %v3235_v32 = vpop.eup %3234 }
 0x410   : > { %v1373_v33 = vmul.f32 %v3235_v32, %v921_v60  ;;  %v922_v4 = vadd.f32 1e-05, %v858_v42  ;;  %vm1379_vm3 = vweird.f32 %v3235_v32  ;;  %vm1398_vm7 = vweird.f32 %v923_v24 }
 0x411   : > { %vm1380_vm4 = vmor %vm1378_vm2, %vm1379_vm3 }
 0x412   : > { %v1374_v45 = vmul.f32 %v3235_v32, %v1373_v33  ;;  %3236 = vrsqrt.f32 %v922_v4  ;;  %vm1388_vm5 = vweird.f32 %v922_v4 }
 0x413   : > { %3238 = vrsqrt.f32 %v923_v24 }
 0x414   : > { %v1375_v20 = vmul.f32 0.5, %v1374_v45 }
 0x416   : > { %v2074_v17 = vpop.f32.mrf.mxu0  ;;  %v2243_v38 = vpop.f32.mrf.mxu1  ;;  %v1376_v12 = vsub.f32 1.5, %v1375_v20 }
 0x417   : > { %v2075_v39 = vadd.f32 %v2074_v17, %v4504_v58  ;;  %v2244_v30 = vadd.f32 %v2243_v38, %v4506_v16 }
 0x418   : > { %v3237_v61 = vpop.eup %3236  ;;  %v1377_v1 = vmul.f32 %v3235_v32, %v1376_v12 }
 0x419   : > { %v2555_v26 = vpack.c.bf16 %v2244_v30, %v2075_v39  ;;  %v3239_v51 = vpop.eup %3238  ;;  %v1383_v43 = vmul.f32 %v3237_v61, %v922_v4  ;;  %vm1389_vm6 = vweird.f32 %v3237_v61 }
 0x41a   : > { %v1381_v22 = vsel %vm1380_vm4, %v3235_v32, %v1377_v1  ;;  %v1393_v10 = vmul.f32 %v3239_v51, %v923_v24  ;;  %vm1399_vm8 = vweird.f32 %v3239_v51  ;;  %vm1390_vm9 = vmor %vm1388_vm5, %vm1389_vm6  ;;  %v779_v1 = vpop.xlane.xlu0 %778 }
 0x41b   : > { %2683 = vst [vmem:[%s4553_s16 + $0x198] sm:$0xff] %v2555_v26  ;;  %v1625_v34 = vmul.f32 %v1381_v22, %v5386_v23  ;;  %v1384_v18 = vmul.f32 %v3237_v61, %v1383_v43  ;;  %vm1400_vm10 = vmor %vm1398_vm7, %vm1399_vm8  ;;  %v860_v26 = vmul.f32 %v779_v1, %v3684_v27 }
 0x41c   : > { %v1394_v3 = vmul.f32 %v3239_v51, %v1393_v10 }
 0x41d   : > { %v2412_v40 = vpop.f32.mrf.mxu2  ;;  %v1385_v50 = vmul.f32 0.5, %v1384_v18  ;;  %v1692_v49 = vmul.f32 %v5393_v31, %v1625_v34  ;;  %v924_v5 = vadd.f32 1e-05, %v860_v26 }
 0x41e   : > { %v2413_v41 = vadd.f32 %v2412_v40, %v4534_v52  ;;  %v2076_v15 = vpop.f32.mrf.mxu0  ;;  %v2245_v62 = vpop.f32.mrf.mxu1  ;;  %v1395_v21 = vmul.f32 0.5, %v1394_v3 }
 0x41f   : > { %v2077_v23 = vadd.f32 %v2076_v15, %v4504_v58  ;;  %v1386_v53 = vsub.f32 1.5, %v1385_v50  ;;  %v2246_v47 = vadd.f32 %v2245_v62, %v4506_v16  ;;  %v1759_v46 = vadd.f32 %v5409_v56, %v1692_v49 }
 0x420   : > { %v2556_v6 = vpack.c.bf16 %v2413_v41, %v2413_v41  ;;  %v1396_v25 = vsub.f32 1.5, %v1395_v21  ;;  %3240 = vrsqrt.f32 %v924_v5  ;;  %vm1408_vm11 = vweird.f32 %v924_v5 }
 0x421   : > { %v1387_v59 = vmul.f32 %v3237_v61, %v1386_v53  ;;  %v2557_v8 = vpack.c.bf16 %v2246_v47, %v2077_v23  ;;  %v1801_v14 = vpack.c.bf16 %v1759_v46, %v1758_v55 }
 0x422   : > { %2684 = vst [vmem:[%s4553_s16 + $0x1a0] sm:$0xf] %v2556_v6  ;;  %v1397_v44 = vmul.f32 %v3239_v51, %v1396_v25 }
 0x423   : > { %v1391_v11 = vsel %vm1390_vm9, %v3237_v61, %v1387_v59  ;;  %2685 = vst [vmem:[%s4553_s16 + $0x1a4] sm:$0xff] %v2557_v8  ;;  %2093 = vmatmul.bf16.gmra.mxu0 %v1801_v14  ;;  %2262 = vmatmul.bf16.gmra.mxu1 %v1801_v14 }
 0x424   : > { %v1401_v48 = vsel %vm1400_vm10, %v3239_v51, %v1397_v44  ;;  %2431 = vmatmul.bf16.gmra.mxu2 %v1801_v14  ;;  %v1626_v63 = vmul.f32 %v1391_v11, %v5428_v2 }
 0x425   : > { %v2414_v0 = vpop.f32.mrf.mxu2  ;;  %v1627_v54 = vmul.f32 %v1401_v48, %v5432_v28 }
 0x426   : > { %v2415_v60 = vadd.f32 %v2414_v0, %v4534_v52  ;;  %v2079_v19 = vpop.f32.mrf.mxu0  ;;  %v2248_v36 = vpop.f32.mrf.mxu1  ;;  %v1693_v35 = vmul.f32 %v5393_v31, %v1626_v63 }
 0x427   : > { %v2080_v7 = vadd.f32 %v2079_v19, %v4504_v58  ;;  %v2249_v42 = vadd.f32 %v2248_v36, %v4506_v16  ;;  %v1694_v33 = vmul.f32 %v5393_v31, %v1627_v54  ;;  %v3241_v51 = vpop.eup %3240 }
 0x428   : > { %v2558_v13 = vpack.c.bf16 %v2415_v60, %v2415_v60  ;;  %v1760_v24 = vadd.f32 %v5409_v56, %v1693_v35  ;;  %v1403_v43 = vmul.f32 %v3241_v51, %v924_v5  ;;  %vm1409_vm12 = vweird.f32 %v3241_v51 }
 0x429   : > { %v2559_v32 = vpack.c.bf16 %v2249_v42, %v2080_v7  ;;  %v1761_v45 = vadd.f32 %v5409_v56, %v1694_v33  ;;  %vm1410_vm13 = vmor %vm1408_vm11, %vm1409_vm12 }
 0x42a   : > { %2686 = vst [vmem:[%s4553_s16 + $0x1ac] sm:$0xf] %v2558_v13  ;;  %v1404_v22 = vmul.f32 %v3241_v51, %v1403_v43 }
 0x42b   : > { %2687 = vst [vmem:[%s4553_s16 + $0x1b0] sm:$0xff] %v2559_v32  ;;  %v1802_v12 = vpack.c.bf16 %v1761_v45, %v1760_v24 }
 0x42c   : > { %v1405_v3 = vmul.f32 0.5, %v1404_v22 }
 0x42d   : > { %v2417_v2 = vpop.f32.mrf.mxu2 }
 0x42e   : > { %v2418_v28 = vadd.f32 %v2417_v2, %v4534_v52  ;;  %v2081_v4 = vpop.f32.mrf.mxu0  ;;  %v2250_v9 = vpop.f32.mrf.mxu1  ;;  %v1406_v40 = vsub.f32 1.5, %v1405_v3 }
 0x42f   : > { %v2082_v37 = vadd.f32 %v2081_v4, %v4504_v58  ;;  %v2251_v20 = vadd.f32 %v2250_v9, %v4506_v16 }
 0x430   : > { %v2560_v17 = vpack.c.bf16 %v2418_v28, %v2418_v28  ;;  %v1407_v50 = vmul.f32 %v3241_v51, %v1406_v40 }
 0x431   : > { %v2561_v38 = vpack.c.bf16 %v2251_v20, %v2082_v37 }
 0x432   : > { %2688 = vst [vmem:[%s4553_s16 + $0x1b8] sm:$0xf] %v2560_v17  ;;  %v1411_v62 = vsel %vm1410_vm13, %v3241_v51, %v1407_v50 }
 0x433   : > { %2689 = vst [vmem:[%s4553_s16 + $0x1bc] sm:$0xff] %v2561_v38  ;;  %2098 = vmatmul.bf16.gmra.mxu0 %v1802_v12  ;;  %2267 = vmatmul.bf16.gmra.mxu1 %v1802_v12 }
 0x434   : > { %2436 = vmatmul.bf16.gmra.mxu2 %v1802_v12 }
 0x435   : > { %v2419_v39 = vpop.f32.mrf.mxu2 }
 0x436   : > { %v2420_v30 = vadd.f32 %v2419_v39, %v4534_v52 }
 0x438   : > { %v2562_v61 = vpack.c.bf16 %v2420_v30, %v2420_v30 }
 0x43a   : > { %2690 = vst [vmem:[%s4553_s16 + $0x1c4] sm:$0xf] %v2562_v61 }
 0x456   : > { %v781_v10 = vpop.xlane.xlu1 %780 }
 0x457   : > { %v861_v34 = vmul.f32 %v781_v10, %v3684_v27  ;;  %v1628_v27 = vmul.f32 %v1411_v62, %v5455_v29 }
 0x459   : > { %v925_v18 = vadd.f32 1e-05, %v861_v34  ;;  %v1695_v14 = vmul.f32 %v5393_v31, %v1628_v27 }
 0x45b   : > { %3242 = vrsqrt.f32 %v925_v18  ;;  %vm1418_vm15 = vweird.f32 %v925_v18  ;;  %v1762_v60 = vadd.f32 %v5409_v56, %v1695_v14 }
 0x461   : > { %v3243_v55 = vpop.eup %3242 }
 0x462   : > { %v1413_v41 = vmul.f32 %v3243_v55, %v925_v18  ;;  %vm1419_vm14 = vweird.f32 %v3243_v55 }
 0x463   : > { %vm1420_vm0 = vmor %vm1418_vm15, %vm1419_vm14 }
 0x464   : > { %v1414_v15 = vmul.f32 %v3243_v55, %v1413_v41 }
 0x466   : > { %v1415_v49 = vmul.f32 0.5, %v1414_v15 }
 0x468   : > { %v1416_v21 = vsub.f32 1.5, %v1415_v49  ;;  %v2084_v23 = vpop.f32.mrf.mxu0  ;;  %v2253_v53 = vpop.f32.mrf.mxu1 }
 0x469   : > { %v2085_v6 = vadd.f32 %v2084_v23, %v4504_v58  ;;  %v2254_v47 = vadd.f32 %v2253_v53, %v4506_v16 }
 0x46a   : > { %v1417_v46 = vmul.f32 %v3243_v55, %v1416_v21 }
 0x46b   : > { %v2563_v25 = vpack.c.bf16 %v2254_v47, %v2085_v6 }
 0x46c   : > { %v1421_v59 = vsel %vm1420_vm0, %v3243_v55, %v1417_v46 }
 0x46d   : > { %v1629_v8 = vmul.f32 %v1421_v59, %v5489_v57  ;;  %2691 = vst [vmem:[%s4553_s16 + $0x1c8] sm:$0xff] %v2563_v25 }
 0x46f   : > { %v2422_v44 = vpop.f32.mrf.mxu2  ;;  %v1696_v11 = vmul.f32 %v5393_v31, %v1629_v8 }
 0x470   : > { %v2423_v29 = vadd.f32 %v2422_v44, %v4534_v52  ;;  %v2086_v48 = vpop.f32.mrf.mxu0  ;;  %v2255_v0 = vpop.f32.mrf.mxu1 }
 0x471   : > { %v2087_v63 = vadd.f32 %v2086_v48, %v4504_v58  ;;  %v2256_v54 = vadd.f32 %v2255_v0, %v4506_v16  ;;  %v1763_v57 = vadd.f32 %v5409_v56, %v1696_v11 }
 0x472   : > { %v2564_v19 = vpack.c.bf16 %v2423_v29, %v2423_v29 }
 0x473   : > { %v2565_v36 = vpack.c.bf16 %v2256_v54, %v2087_v63  ;;  %v1803_v7 = vpack.c.bf16 %v1763_v57, %v1762_v60 }
 0x474   : > { %2692 = vst [vmem:[%s4553_s16 + $0x1d0] sm:$0xf] %v2564_v19 }
 0x475   : > { %2693 = vst [vmem:[%s4553_s16 + $0x1d4] sm:$0xff] %v2565_v36  ;;  %2103 = vmatmul.bf16.gmra.mxu0 %v1803_v7  ;;  %2272 = vmatmul.bf16.gmra.mxu1 %v1803_v7 }
 0x476   : > { %2441 = vmatmul.bf16.gmra.mxu2 %v1803_v7 }
 0x477   : > { %v2424_v31 = vpop.f32.mrf.mxu2 }
 0x478   : > { %v2425_v42 = vadd.f32 %v2424_v31, %v4534_v52 }
 0x47a   : > { %v2566_v13 = vpack.c.bf16 %v2425_v42, %v2425_v42 }
 0x47c   : > { %2694 = vst [vmem:[%s4553_s16 + $0x1dc] sm:$0xf] %v2566_v13 }
 0x47f   : > { %v2089_v32 = vpop.f32.mrf.mxu0  ;;  %v2258_v35 = vpop.f32.mrf.mxu1 }
 0x480   : > { %v2090_v56 = vadd.f32 %v2089_v32, %v4504_v58  ;;  %v2259_v33 = vadd.f32 %v2258_v35, %v4506_v16 }
 0x482   : > { %v2567_v2 = vpack.c.bf16 %v2259_v33, %v2090_v56 }
 0x484   : > { %2695 = vst [vmem:[%s4553_s16 + $0x1e0] sm:$0xff] %v2567_v2 }
 0x486   : > { %v2427_v28 = vpop.f32.mrf.mxu2 }
 0x487   : > { %v2428_v4 = vadd.f32 %v2427_v28, %v4534_v52  ;;  %v2091_v9 = vpop.f32.mrf.mxu0  ;;  %v2260_v24 = vpop.f32.mrf.mxu1 }
 0x488   : > { %v2092_v45 = vadd.f32 %v2091_v9, %v4504_v58  ;;  %v2261_v37 = vadd.f32 %v2260_v24, %v4506_v16 }
 0x489   : > { %v2568_v20 = vpack.c.bf16 %v2428_v4, %v2428_v4 }
 0x48a   : > { %v2569_v17 = vpack.c.bf16 %v2261_v37, %v2092_v45 }
 0x48b   : > { %2696 = vst [vmem:[%s4553_s16 + $0x1e8] sm:$0xf] %v2568_v20 }
 0x48c   : > { %2697 = vst [vmem:[%s4553_s16 + $0x1ec] sm:$0xff] %v2569_v17 }
 0x48e   : > { %v2429_v38 = vpop.f32.mrf.mxu2 }
 0x48f   : > { %v2430_v12 = vadd.f32 %v2429_v38, %v4534_v52 }
 0x491   : > { %v2570_v39 = vpack.c.bf16 %v2430_v12, %v2430_v12 }
 0x493   : > { %2698 = vst [vmem:[%s4553_s16 + $0x1f4] sm:$0xf] %v2570_v39 }
 0x4a0   : > { %v2094_v30 = vpop.f32.mrf.mxu0  ;;  %v2263_v61 = vpop.f32.mrf.mxu1 }
 0x4a1   : > { %v2095_v1 = vadd.f32 %v2094_v30, %v4504_v58  ;;  %v2264_v26 = vadd.f32 %v2263_v61, %v4506_v16 }
 0x4a3   : > { %v2571_v5 = vpack.c.bf16 %v2264_v26, %v2095_v1 }
 0x4a5   : > { %2699 = vst [vmem:[%s4553_s16 + $0x1f8] sm:$0xff] %v2571_v5 }
 0x4a7   : > { %v2432_v51 = vpop.f32.mrf.mxu2 }
 0x4a8   : > { %v2433_v43 = vadd.f32 %v2432_v51, %v4534_v52  ;;  %v2096_v22 = vpop.f32.mrf.mxu0  ;;  %v2265_v10 = vpop.f32.mrf.mxu1 }
 0x4a9   : > { %v2097_v34 = vadd.f32 %v2096_v22, %v4504_v58  ;;  %v2266_v18 = vadd.f32 %v2265_v10, %v4506_v16 }
 0x4aa   : > { %v2572_v3 = vpack.c.bf16 %v2433_v43, %v2433_v43 }
 0x4ab   : > { %v2573_v40 = vpack.c.bf16 %v2266_v18, %v2097_v34 }
 0x4ac   : > { %2700 = vst [vmem:[%s4553_s16 + $0x200] sm:$0xf] %v2572_v3 }
 0x4ad   : > { %2701 = vst [vmem:[%s4553_s16 + $0x204] sm:$0xff] %v2573_v40 }
 0x4af   : > { %v2434_v55 = vpop.f32.mrf.mxu2 }
 0x4b0   : > { %v2435_v50 = vadd.f32 %v2434_v55, %v4534_v52  ;;  %v2099_v41 = vpop.f32.mrf.mxu0  ;;  %v2268_v15 = vpop.f32.mrf.mxu1 }
 0x4b1   : > { %v2100_v62 = vadd.f32 %v2099_v41, %v4504_v58  ;;  %v2269_v49 = vadd.f32 %v2268_v15, %v4506_v16 }
 0x4b2   : > { %v2574_v21 = vpack.c.bf16 %v2435_v50, %v2435_v50 }
 0x4b3   : > { %v2575_v23 = vpack.c.bf16 %v2269_v49, %v2100_v62 }
 0x4b4   : > { %2702 = vst [vmem:[%s4553_s16 + $0x20c] sm:$0xf] %v2574_v21 }
 0x4b5   : > { %2703 = vst [vmem:[%s4553_s16 + $0x210] sm:$0xff] %v2575_v23 }
 0x4b7   : > { %v2437_v53 = vpop.f32.mrf.mxu2 }
 0x4b8   : > { %v2438_v27 = vadd.f32 %v2437_v53, %v4534_v52  ;;  %v2101_v6 = vpop.f32.mrf.mxu0  ;;  %v2270_v47 = vpop.f32.mrf.mxu1 }
 0x4b9   : > { %v2102_v46 = vadd.f32 %v2101_v6, %v4504_v58  ;;  %v2271_v25 = vadd.f32 %v2270_v47, %v4506_v16 }
 0x4ba   : > { %v2576_v59 = vpack.c.bf16 %v2438_v27, %v2438_v27 }
 0x4bb   : > { %v2577_v8 = vpack.c.bf16 %v2271_v25, %v2102_v46 }
 0x4bc   : > { %2704 = vst [vmem:[%s4553_s16 + $0x218] sm:$0xf] %v2576_v59 }
 0x4bd   : > { %2705 = vst [vmem:[%s4553_s16 + $0x21c] sm:$0xff] %v2577_v8 }
 0x4bf   : > { %v2439_v14 = vpop.f32.mrf.mxu2 }
 0x4c0   : > { %v2440_v44 = vadd.f32 %v2439_v14, %v4534_v52 }
 0x4c2   : > { %v2578_v11 = vpack.c.bf16 %v2440_v44, %v2440_v44 }
 0x4c4   : > { %2706 = vst [vmem:[%s4553_s16 + $0x224] sm:$0xf] %v2578_v11 }
 0x4f2   : > { %v2104_v29 = vpop.f32.mrf.mxu0  ;;  %v2273_v48 = vpop.f32.mrf.mxu1 }
 0x4f3   : > { %v2105_v0 = vadd.f32 %v2104_v29, %v4504_v58  ;;  %v2274_v63 = vadd.f32 %v2273_v48, %v4506_v16 }
 0x4f5   : > { %v2579_v54 = vpack.c.bf16 %v2274_v63, %v2105_v0 }
 0x4f7   : > { %2707 = vst [vmem:[%s4553_s16 + $0x228] sm:$0xff] %v2579_v54 }
 0x4f9   : > { %v2442_v60 = vpop.f32.mrf.mxu2 }
 0x4fa   : > { %v2443_v57 = vadd.f32 %v2442_v60, %v4534_v52  ;;  %v2106_v19 = vpop.f32.mrf.mxu0  ;;  %v2275_v36 = vpop.f32.mrf.mxu1 }
 0x4fb   : > { %v2107_v7 = vadd.f32 %v2106_v19, %v4504_v58  ;;  %v2276_v31 = vadd.f32 %v2275_v36, %v4506_v16 }
 0x4fc   : > { %v2580_v42 = vpack.c.bf16 %v2443_v57, %v2443_v57 }
 0x4fd   : > { %v2581_v13 = vpack.c.bf16 %v2276_v31, %v2107_v7 }
 0x4fe   : > { %2708 = vst [vmem:[%s4553_s16 + $0x230] sm:$0xf] %v2580_v42 }
 0x4ff   : > { %2709 = vst [vmem:[%s4553_s16 + $0x234] sm:$0xff] %v2581_v13 }
 0x501   : > { %v2444_v32 = vpop.f32.mrf.mxu2 }
 0x502   : > { %v2445_v35 = vadd.f32 %v2444_v32, %v4534_v52 }
 0x504   : > { %v2582_v56 = vpack.c.bf16 %v2445_v35, %v2445_v35 }
 0x506   : > { %2710 = vst [vmem:[%s4553_s16 + $0x23c] sm:$0xf] %v2582_v56 }
 0x507   : > { %3397 = shalt.err (!%p3394_p11)
}
 0x508   : > { %s3454_s15 = smov 192   ;;  %s3455_s14 = smov 12  }
 0x509   : > { %3042 = dma.vmem_to_hbm [thread:$0]  (%p3569_p7), %s2758_s11, 12288, %s2760_s12, %s2744_s22, %s3454_s15, %s3454_s15, %s3455_s14  }
 0x50a PF: > { %s2774_s16 = sand.u32 1, %s3432_s18   ;;  %p5758_p12 = scmp.ge.s32.totalorder %s3444_s21, 2 }
 0x50b   : > { %s2775_s17 = scalar_lea.sflag [#allocation4], %s2774_s16 }
 0x50c   : > { %p3059_p13 = pnand %p5758_p12, %p3521_p6 }
 0x50e   : > { %p3060_p0 = pneg %p3059_p13 }
 0x510   : > { %3427 = dma.done.wait (%p3060_p0), %s2775_s17, 12288  }
 0x511   : > { %3429 = vsyncadd (%p3060_p0), %s2775_s17, 4294955008  ;;  %p20_p3 = scmp.ge.s32.totalorder %s3555_s27, 4   ;;  %s5759_s18 = smov %s3436_s19 }
 0x512   : > { %s5760_s19 = smov %s3440_s20  ;;  %s5761_s20 = smov %s3565_s6 }
 0x513   : > { %s5762_s21 = smov %s3555_s27  ;;  %22 = sbr.rel (!%p20_p3) target bundleno = 7 (0x7), region = 97 }
 0x518   :  { %2781 = vsyncpa [#allocation3], 1 }
 0x519   :  { %2783 = vsyncpa [#allocation3 + $0x1], 1 }
 0x51a   :  { %2784 = vsyncpa [#allocation6], 1 }
 0x51b   :  { %2785 = vsyncpa [#allocation9], 1 }
 0x51c   :  { %2786 = vsyncpa [#allocation4], 1 }
 0x51d   :  { %2788 = vsyncpa [#allocation4 + $0x1], 1 }

</bundles_post_ra>
